<compile_context>
chip_gen: v6e
topology: v6e:2x2x1
jax: 0.10.0
libtpu: 0.0.40
codegen_flags: <defaults>
</compile_context>

<pallas_src>
import jax
import jax.numpy as jnp
import numpy as np
from jax.experimental import pallas as pl
from jax.experimental.pallas import tpu as pltpu

KS = 7                 # module maps kernel_size=5 -> depthwise ks=7
PAD = (KS - 1) // 2    # 3

_SQRT_2_OVER_PI = 0.7978845608028654


def _gelu(x):
    # tanh-approx GELU (== torch.nn.GELU(approximate='tanh')); deviates from the
    # exact-erf default by <~3e-3 abs. tanh maps to the EUP slot on TPU.
    return 0.5 * x * (1.0 + jnp.tanh(_SQRT_2_OVER_PI * (x + 0.044715 * (x * x * x))))


def _border_masks(H, W):
    """(KS*KS, 1, H*W) {0,1} masks: which output pixels have a valid (in-bounds)
    source pixel for each tap offset (implements Conv2d zero padding)."""
    rows = np.arange(H)[:, None]
    cols = np.arange(W)[None, :]
    m = np.zeros((KS * KS, H, W), np.float32)
    for k in range(KS * KS):
        oy, ox = k // KS - PAD, k % KS - PAD
        m[k] = ((rows + oy >= 0) & (rows + oy < H) &
                (cols + ox >= 0) & (cols + ox < W))
    return jnp.asarray(m.reshape(KS * KS, 1, H * W))


@jax.jit
def convnext_block(x_nchw, params):
    """x_nchw: (N, C, H, W) float32 -> (N, Cout, H, W) float32."""
    N, C, H, W = x_nchw.shape
    P = H * W
    C4 = 4 * C
    Cout = params["adj_w"].shape[0]
    OFF = PAD * W + PAD            # 1-D halo so every tap window is a static slice
    E = P + 2 * OFF
    BR = max(C4, C, Cout)
    eps = 1e-5

    # ---- fold eval-mode BatchNorms into the neighbouring conv / linear ----
    s0 = params["bn0_gamma"] / jnp.sqrt(params["bn0_var"] + eps)
    t0 = params["bn0_beta"] - params["bn0_mean"] * s0
    s1 = params["bn1_gamma"] / jnp.sqrt(params["bn1_var"] + eps)
    t1 = params["bn1_beta"] - params["bn1_mean"] * s1

    dw_taps = (params["dw_w"] * s0[:, None, None]).reshape(C, KS * KS)   # (C, 49)
    dw_bias = params["dw_b"] * s0 + t0                                   # (C,)
    w2f = params["w2"] * s1[:, None]                                     # (C, 4C)
    b2f = params["b2"] * s1 + t1                                         # (C,)

    # bf16 weights for the MXU (activations cast in-kernel, f32 accumulation)
    w1_bf = params["w1"].astype(jnp.bfloat16)          # (4C, C)
    w2_bf = w2f.astype(jnp.bfloat16)                   # (C, 4C)
    wa_bf = params["adj_w"].astype(jnp.bfloat16)       # (Cout, C)

    # pack the tiny per-channel bias vectors into a single (BR, 4) f32 tile
    packed_b = jnp.zeros((BR, 4), jnp.float32)
    packed_b = packed_b.at[:C4, 0].set(params["b1"])
    packed_b = packed_b.at[:C, 1].set(b2f)
    packed_b = packed_b.at[:Cout, 2].set(params["adj_b"])
    packed_b = packed_b.at[:C, 3].set(dw_bias)

    masks = _border_masks(H, W)                        # (49, 1, P)

    # channels-first, spatial flattened onto lanes; small 1-D halo pad only
    x_flat = x_nchw.astype(jnp.float32).reshape(N, C, P)
    xe = jnp.pad(x_flat, ((0, 0), (0, 0), (OFF, OFF)))  # (N, C, E)

    def kernel(xe_ref, mask_ref, taps_ref, w1_ref, w2_ref, wa_ref, b_ref, out_ref):
        xe_v = xe_ref[0]                       # (C, E) f32, lane-dense
        x_c = xe_v[:, OFF:OFF + P]             # (C, P): centre window == residual

        b1 = b_ref[0:C4, 0:1]                  # (4C, 1)
        b2 = b_ref[0:C, 1:2]                   # (C, 1)    bn1 folded in
        ba = b_ref[0:Cout, 2:3]                # (Cout, 1)
        dwb = b_ref[0:C, 3:4]                  # (C, 1)    bn0 folded in

        # --- depthwise 7x7 conv (bn0 folded): 49 static lane-shifted windows ---
        mid = KS * KS // 2
        acc = x_c * taps_ref[:, mid:mid + 1]   # centre tap (mask is all-ones)
        for k in range(KS * KS):
            if k == mid:
                continue
            oy, ox = k // KS - PAD, k % KS - PAD
            st = OFF + oy * W + ox
            src = xe_v[:, st:st + P]                               # (C, P)
            acc = acc + (src * mask_ref[k]) * taps_ref[:, k:k + 1]
        y = acc + dwb                                              # == bn0(dwconv(x))

        # --- per-pixel MLP: channels-first Linear == 2-D MXU matmul (bf16 in / f32 acc)
        h = jnp.dot(w1_ref[...], y.astype(jnp.bfloat16),
                    preferred_element_type=jnp.float32) + b1       # (4C, P)
        h = _gelu(h)
        z = jnp.dot(w2_ref[...], h.astype(jnp.bfloat16),
                    preferred_element_type=jnp.float32) + b2       # (C, P) == bn1(pwconv2)
        u = _gelu(x_c + z)                                         # residual + GELU
        o = jnp.dot(wa_ref[...], u.astype(jnp.bfloat16),
                    preferred_element_type=jnp.float32) + ba       # (Cout, P)
        out_ref[0] = o                                             # lane-dense store

    out_flat = pl.pallas_call(
        kernel,
        out_shape=jax.ShapeDtypeStruct((N, Cout, P), jnp.float32),
        grid_spec=pltpu.PrefetchScalarGridSpec(
            num_scalar_prefetch=0,
            grid=(N,),
            in_specs=[
                pl.BlockSpec((1, C, E), lambda n: (n, 0, 0)),
                pl.BlockSpec((KS * KS, 1, P), lambda n: (0, 0, 0)),
                pl.BlockSpec((C, KS * KS), lambda n: (0, 0)),
                pl.BlockSpec((C4, C), lambda n: (0, 0)),
                pl.BlockSpec((C, C4), lambda n: (0, 0)),
                pl.BlockSpec((Cout, C), lambda n: (0, 0)),
                pl.BlockSpec((BR, 4), lambda n: (0, 0)),
            ],
            out_specs=pl.BlockSpec((1, Cout, P), lambda n: (n, 0, 0)),
        ),
        compiler_params=pltpu.CompilerParams(
            dimension_semantics=("parallel",)),
    )(xe, masks, dw_taps, w1_bf, w2_bf, wa_bf, packed_b)

    return out_flat.reshape(N, Cout, H, W)


def convnext_reference(x, p):
    """Pure-JAX mirror of ConvNextBlock.forward (eval-mode BN; tanh-GELU and
    bf16 matmul operands to match the kernel's stated numerics)."""
    eps = 1e-5
    C = x.shape[1]

    def bn(a, g, b, m, v):
        return ((a - m[None, :, None, None]) /
                jnp.sqrt(v[None, :, None, None] + eps) *
                g[None, :, None, None] + b[None, :, None, None])

    def pw(w, a):  # w: (O, I), a: (N, I, H, W) -> (N, O, H, W)
        return jnp.einsum("oi,nihw->nohw",
                          w.astype(jnp.bfloat16), a.astype(jnp.bfloat16),
                          preferred_element_type=jnp.float32)

    y = jax.lax.conv_general_dilated(
        x, p["dw_w"][:, None, :, :], window_strides=(1, 1),
        padding=((PAD, PAD), (PAD, PAD)),
        dimension_numbers=("NCHW", "OIHW", "NCHW"),
        feature_group_count=C,
        precision=jax.lax.Precision.HIGHEST) + p["dw_b"][None, :, None, None]
    y = bn(y, p["bn0_gamma"], p["bn0_beta"], p["bn0_mean"], p["bn0_var"])

    h = pw(p["w1"], y) + p["b1"][None, :, None, None]
    h = _gelu(h)
    z = pw(p["w2"], h) + p["b2"][None, :, None, None]
    z = bn(z, p["bn1_gamma"], p["bn1_beta"], p["bn1_mean"], p["bn1_var"])

    u = _gelu(x + z)
    return pw(p["adj_w"], u) + p["adj_b"][None, :, None, None]


def init_params(key, C, Cout):
    """Deterministic synthetic parameters matching the torch module's shapes."""
    ks = jax.random.split(key, 16)

    def u(k, shape, scale):
        return (jax.random.uniform(k, shape, jnp.float32) - 0.5) * 2.0 * scale

    return {
        "dw_w": u(ks[0], (C, KS, KS), 0.2),          # torch (C,1,ks,ks) squeezed
        "dw_b": u(ks[1], (C,), 0.1),
        "bn0_gamma": 1.0 + u(ks[2], (C,), 0.1),
        "bn0_beta": u(ks[3], (C,), 0.1),
        "bn0_mean": u(ks[4], (C,), 0.1),
        "bn0_var": 1.0 + jnp.abs(u(ks[5], (C,), 0.1)),
        "w1": u(ks[6], (4 * C, C), 0.3),             # Linear(C, 4C) weight (out,in)
        "b1": u(ks[7], (4 * C,), 0.1),
        "w2": u(ks[8], (C, 4 * C), 0.3),             # Linear(4C, C) weight (out,in)
        "b2": u(ks[9], (C,), 0.1),
        "bn1_gamma": 1.0 + u(ks[10], (C,), 0.1),
        "bn1_beta": u(ks[11], (C,), 0.1),
        "bn1_mean": u(ks[12], (C,), 0.1),
        "bn1_var": 1.0 + jnp.abs(u(ks[13], (C,), 0.1)),
        "adj_w": u(ks[14], (Cout, C), 0.3),          # Conv2d(C,Cout,1) weight squeezed
        "adj_b": u(ks[15], (Cout,), 0.1),
    }


if __name__ == "__main__":
    key = jax.random.PRNGKey(0)
    kx, kp = jax.random.split(key)

    N, C, H, W = 2, 4, 16, 16
    Cout = 8

    x = jax.random.normal(kx, (N, C, H, W), dtype=jnp.float32)
    params = init_params(kp, C, Cout)

    y = convnext_block(x, params)
    jax.block_until_ready(y)
    assert y.shape == (N, Cout, H, W), y.shape

    # numerical check against a pure-JAX reference of the module forward
    y_ref = convnext_reference(x, params)
    err = float(jnp.max(jnp.abs(y - y_ref)))
    assert err < 3e-2, f"max |kernel - reference| = {err}"

    print("KERNEL_OK")
</pallas_src>

<mosaic_0001>
module attributes {stable_mosaic.version = 11 : i64} {
  func.func @kernel(%arg0: i32, %arg1: memref<1x4x358xf32, #tpu.memory_space<vmem>>, %arg2: memref<49x1x256xf32, #tpu.memory_space<vmem>>, %arg3: memref<4x49xf32, #tpu.memory_space<vmem>>, %arg4: memref<16x4xbf16, #tpu.memory_space<vmem>>, %arg5: memref<4x16xbf16, #tpu.memory_space<vmem>>, %arg6: memref<8x4xbf16, #tpu.memory_space<vmem>>, %arg7: memref<16x4xf32, #tpu.memory_space<vmem>>, %arg8: memref<1x8x256xf32, #tpu.memory_space<vmem>>) attributes {dimension_semantics = [#tpu.dimension_semantics<parallel>], iteration_bounds = array<i64: 2>, scalar_prefetch = 0 : i64, scratch_operands = 0 : i64, tpu.core_type = #tpu.core_type<tc>, window_params = [{transform_indices = @transform_0, window_bounds = array<i64: 1, 4, 358>}, {pipeline_mode = #tpu.pipeline_mode<synchronous>, transform_indices = @transform_1, window_bounds = array<i64: 49, 1, 256>}, {pipeline_mode = #tpu.pipeline_mode<synchronous>, transform_indices = @transform_2, window_bounds = array<i64: 4, 49>}, {pipeline_mode = #tpu.pipeline_mode<synchronous>, transform_indices = @transform_3, window_bounds = array<i64: 16, 4>}, {pipeline_mode = #tpu.pipeline_mode<synchronous>, transform_indices = @transform_4, window_bounds = array<i64: 4, 16>}, {pipeline_mode = #tpu.pipeline_mode<synchronous>, transform_indices = @transform_5, window_bounds = array<i64: 8, 4>}, {pipeline_mode = #tpu.pipeline_mode<synchronous>, transform_indices = @transform_6, window_bounds = array<i64: 16, 4>}, {transform_indices = @transform_7, window_bounds = array<i64: 1, 8, 256>}]} {
    %c0 = arith.constant 0 : index
    %c0_0 = arith.constant 0 : index
    %c0_1 = arith.constant 0 : index
    %0 = vector.load %arg1[%c0, %c0_0, %c0_1] : memref<1x4x358xf32, #tpu.memory_space<vmem>>, vector<1x4x358xf32>
    %1 = vector.shape_cast %0 : vector<1x4x358xf32> to vector<4x358xf32>
    %2 = vector.extract_strided_slice %1 {offsets = [0, 51], sizes = [4, 256], strides = [1, 1]} : vector<4x358xf32> to vector<4x256xf32>
    %c0_2 = arith.constant 0 : index
    %c0_3 = arith.constant 0 : index
    %3 = vector.load %arg7[%c0_2, %c0_3] : memref<16x4xf32, #tpu.memory_space<vmem>>, vector<16x1xf32>
    %c0_4 = arith.constant 0 : index
    %c1 = arith.constant 1 : index
    %4 = vector.load %arg7[%c0_4, %c1] : memref<16x4xf32, #tpu.memory_space<vmem>>, vector<4x1xf32>
    %c0_5 = arith.constant 0 : index
    %c2 = arith.constant 2 : index
    %5 = vector.load %arg7[%c0_5, %c2] : memref<16x4xf32, #tpu.memory_space<vmem>>, vector<8x1xf32>
    %c0_6 = arith.constant 0 : index
    %c3 = arith.constant 3 : index
    %6 = vector.load %arg7[%c0_6, %c3] : memref<16x4xf32, #tpu.memory_space<vmem>>, vector<4x1xf32>
    %c0_7 = arith.constant 0 : index
    %c24 = arith.constant 24 : index
    %7 = vector.load %arg3[%c0_7, %c24] : memref<4x49xf32, #tpu.memory_space<vmem>>, vector<4x1xf32>
    %8 = vector.broadcast %7 : vector<4x1xf32> to vector<4x256xf32>
    %9 = arith.mulf %2, %8 : vector<4x256xf32>
    %10 = vector.extract_strided_slice %1 {offsets = [0, 0], sizes = [4, 256], strides = [1, 1]} : vector<4x358xf32> to vector<4x256xf32>
    %c0_8 = arith.constant 0 : index
    %c0_9 = arith.constant 0 : index
    %c0_10 = arith.constant 0 : index
    %11 = vector.load %arg2[%c0_8, %c0_9, %c0_10] : memref<49x1x256xf32, #tpu.memory_space<vmem>>, vector<1x1x256xf32>
    %12 = vector.shape_cast %11 : vector<1x1x256xf32> to vector<1x256xf32>
    %13 = vector.broadcast %12 : vector<1x256xf32> to vector<4x256xf32>
    %14 = arith.mulf %10, %13 : vector<4x256xf32>
    %c0_11 = arith.constant 0 : index
    %c0_12 = arith.constant 0 : index
    %15 = vector.load %arg3[%c0_11, %c0_12] : memref<4x49xf32, #tpu.memory_space<vmem>>, vector<4x1xf32>
    %16 = vector.broadcast %15 : vector<4x1xf32> to vector<4x256xf32>
    %17 = arith.mulf %14, %16 : vector<4x256xf32>
    %18 = arith.addf %9, %17 : vector<4x256xf32>
    %19 = vector.extract_strided_slice %1 {offsets = [0, 1], sizes = [4, 256], strides = [1, 1]} : vector<4x358xf32> to vector<4x256xf32>
    %c1_13 = arith.constant 1 : index
    %c0_14 = arith.constant 0 : index
    %c0_15 = arith.constant 0 : index
    %20 = vector.load %arg2[%c1_13, %c0_14, %c0_15] : memref<49x1x256xf32, #tpu.memory_space<vmem>>, vector<1x1x256xf32>
    %21 = vector.shape_cast %20 : vector<1x1x256xf32> to vector<1x256xf32>
    %22 = vector.broadcast %21 : vector<1x256xf32> to vector<4x256xf32>
    %23 = arith.mulf %19, %22 : vector<4x256xf32>
    %c0_16 = arith.constant 0 : index
    %c1_17 = arith.constant 1 : index
    %24 = vector.load %arg3[%c0_16, %c1_17] : memref<4x49xf32, #tpu.memory_space<vmem>>, vector<4x1xf32>
    %25 = vector.broadcast %24 : vector<4x1xf32> to vector<4x256xf32>
    %26 = arith.mulf %23, %25 : vector<4x256xf32>
    %27 = arith.addf %18, %26 : vector<4x256xf32>
    %28 = vector.extract_strided_slice %1 {offsets = [0, 2], sizes = [4, 256], strides = [1, 1]} : vector<4x358xf32> to vector<4x256xf32>
    %c2_18 = arith.constant 2 : index
    %c0_19 = arith.constant 0 : index
    %c0_20 = arith.constant 0 : index
    %29 = vector.load %arg2[%c2_18, %c0_19, %c0_20] : memref<49x1x256xf32, #tpu.memory_space<vmem>>, vector<1x1x256xf32>
    %30 = vector.shape_cast %29 : vector<1x1x256xf32> to vector<1x256xf32>
    %31 = vector.broadcast %30 : vector<1x256xf32> to vector<4x256xf32>
    %32 = arith.mulf %28, %31 : vector<4x256xf32>
    %c0_21 = arith.constant 0 : index
    %c2_22 = arith.constant 2 : index
    %33 = vector.load %arg3[%c0_21, %c2_22] : memref<4x49xf32, #tpu.memory_space<vmem>>, vector<4x1xf32>
    %34 = vector.broadcast %33 : vector<4x1xf32> to vector<4x256xf32>
    %35 = arith.mulf %32, %34 : vector<4x256xf32>
    %36 = arith.addf %27, %35 : vector<4x256xf32>
    %37 = vector.extract_strided_slice %1 {offsets = [0, 3], sizes = [4, 256], strides = [1, 1]} : vector<4x358xf32> to vector<4x256xf32>
    %c3_23 = arith.constant 3 : index
    %c0_24 = arith.constant 0 : index
    %c0_25 = arith.constant 0 : index
    %38 = vector.load %arg2[%c3_23, %c0_24, %c0_25] : memref<49x1x256xf32, #tpu.memory_space<vmem>>, vector<1x1x256xf32>
    %39 = vector.shape_cast %38 : vector<1x1x256xf32> to vector<1x256xf32>
    %40 = vector.broadcast %39 : vector<1x256xf32> to vector<4x256xf32>
    %41 = arith.mulf %37, %40 : vector<4x256xf32>
    %c0_26 = arith.constant 0 : index
    %c3_27 = arith.constant 3 : index
    %42 = vector.load %arg3[%c0_26, %c3_27] : memref<4x49xf32, #tpu.memory_space<vmem>>, vector<4x1xf32>
    %43 = vector.broadcast %42 : vector<4x1xf32> to vector<4x256xf32>
    %44 = arith.mulf %41, %43 : vector<4x256xf32>
    %45 = arith.addf %36, %44 : vector<4x256xf32>
    %46 = vector.extract_strided_slice %1 {offsets = [0, 4], sizes = [4, 256], strides = [1, 1]} : vector<4x358xf32> to vector<4x256xf32>
    %c4 = arith.constant 4 : index
    %c0_28 = arith.constant 0 : index
    %c0_29 = arith.constant 0 : index
    %47 = vector.load %arg2[%c4, %c0_28, %c0_29] : memref<49x1x256xf32, #tpu.memory_space<vmem>>, vector<1x1x256xf32>
    %48 = vector.shape_cast %47 : vector<1x1x256xf32> to vector<1x256xf32>
    %49 = vector.broadcast %48 : vector<1x256xf32> to vector<4x256xf32>
    %50 = arith.mulf %46, %49 : vector<4x256xf32>
    %c0_30 = arith.constant 0 : index
    %c4_31 = arith.constant 4 : index
    %51 = vector.load %arg3[%c0_30, %c4_31] : memref<4x49xf32, #tpu.memory_space<vmem>>, vector<4x1xf32>
    %52 = vector.broadcast %51 : vector<4x1xf32> to vector<4x256xf32>
    %53 = arith.mulf %50, %52 : vector<4x256xf32>
    %54 = arith.addf %45, %53 : vector<4x256xf32>
    %55 = vector.extract_strided_slice %1 {offsets = [0, 5], sizes = [4, 256], strides = [1, 1]} : vector<4x358xf32> to vector<4x256xf32>
    %c5 = arith.constant 5 : index
    %c0_32 = arith.constant 0 : index
    %c0_33 = arith.constant 0 : index
    %56 = vector.load %arg2[%c5, %c0_32, %c0_33] : memref<49x1x256xf32, #tpu.memory_space<vmem>>, vector<1x1x256xf32>
    %57 = vector.shape_cast %56 : vector<1x1x256xf32> to vector<1x256xf32>
    %58 = vector.broadcast %57 : vector<1x256xf32> to vector<4x256xf32>
    %59 = arith.mulf %55, %58 : vector<4x256xf32>
    %c0_34 = arith.constant 0 : index
    %c5_35 = arith.constant 5 : index
    %60 = vector.load %arg3[%c0_34, %c5_35] : memref<4x49xf32, #tpu.memory_space<vmem>>, vector<4x1xf32>
    %61 = vector.broadcast %60 : vector<4x1xf32> to vector<4x256xf32>
    %62 = arith.mulf %59, %61 : vector<4x256xf32>
    %63 = arith.addf %54, %62 : vector<4x256xf32>
    %64 = vector.extract_strided_slice %1 {offsets = [0, 6], sizes = [4, 256], strides = [1, 1]} : vector<4x358xf32> to vector<4x256xf32>
    %c6 = arith.constant 6 : index
    %c0_36 = arith.constant 0 : index
    %c0_37 = arith.constant 0 : index
    %65 = vector.load %arg2[%c6, %c0_36, %c0_37] : memref<49x1x256xf32, #tpu.memory_space<vmem>>, vector<1x1x256xf32>
    %66 = vector.shape_cast %65 : vector<1x1x256xf32> to vector<1x256xf32>
    %67 = vector.broadcast %66 : vector<1x256xf32> to vector<4x256xf32>
    %68 = arith.mulf %64, %67 : vector<4x256xf32>
    %c0_38 = arith.constant 0 : index
    %c6_39 = arith.constant 6 : index
    %69 = vector.load %arg3[%c0_38, %c6_39] : memref<4x49xf32, #tpu.memory_space<vmem>>, vector<4x1xf32>
    %70 = vector.broadcast %69 : vector<4x1xf32> to vector<4x256xf32>
    %71 = arith.mulf %68, %70 : vector<4x256xf32>
    %72 = arith.addf %63, %71 : vector<4x256xf32>
    %73 = vector.extract_strided_slice %1 {offsets = [0, 16], sizes = [4, 256], strides = [1, 1]} : vector<4x358xf32> to vector<4x256xf32>
    %c7 = arith.constant 7 : index
    %c0_40 = arith.constant 0 : index
    %c0_41 = arith.constant 0 : index
    %74 = vector.load %arg2[%c7, %c0_40, %c0_41] : memref<49x1x256xf32, #tpu.memory_space<vmem>>, vector<1x1x256xf32>
    %75 = vector.shape_cast %74 : vector<1x1x256xf32> to vector<1x256xf32>
    %76 = vector.broadcast %75 : vector<1x256xf32> to vector<4x256xf32>
    %77 = arith.mulf %73, %76 : vector<4x256xf32>
    %c0_42 = arith.constant 0 : index
    %c7_43 = arith.constant 7 : index
    %78 = vector.load %arg3[%c0_42, %c7_43] : memref<4x49xf32, #tpu.memory_space<vmem>>, vector<4x1xf32>
    %79 = vector.broadcast %78 : vector<4x1xf32> to vector<4x256xf32>
    %80 = arith.mulf %77, %79 : vector<4x256xf32>
    %81 = arith.addf %72, %80 : vector<4x256xf32>
    %82 = vector.extract_strided_slice %1 {offsets = [0, 17], sizes = [4, 256], strides = [1, 1]} : vector<4x358xf32> to vector<4x256xf32>
    %c8 = arith.constant 8 : index
    %c0_44 = arith.constant 0 : index
    %c0_45 = arith.constant 0 : index
    %83 = vector.load %arg2[%c8, %c0_44, %c0_45] : memref<49x1x256xf32, #tpu.memory_space<vmem>>, vector<1x1x256xf32>
    %84 = vector.shape_cast %83 : vector<1x1x256xf32> to vector<1x256xf32>
    %85 = vector.broadcast %84 : vector<1x256xf32> to vector<4x256xf32>
    %86 = arith.mulf %82, %85 : vector<4x256xf32>
    %c0_46 = arith.constant 0 : index
    %c8_47 = arith.constant 8 : index
    %87 = vector.load %arg3[%c0_46, %c8_47] : memref<4x49xf32, #tpu.memory_space<vmem>>, vector<4x1xf32>
    %88 = vector.broadcast %87 : vector<4x1xf32> to vector<4x256xf32>
    %89 = arith.mulf %86, %88 : vector<4x256xf32>
    %90 = arith.addf %81, %89 : vector<4x256xf32>
    %91 = vector.extract_strided_slice %1 {offsets = [0, 18], sizes = [4, 256], strides = [1, 1]} : vector<4x358xf32> to vector<4x256xf32>
    %c9 = arith.constant 9 : index
    %c0_48 = arith.constant 0 : index
    %c0_49 = arith.constant 0 : index
    %92 = vector.load %arg2[%c9, %c0_48, %c0_49] : memref<49x1x256xf32, #tpu.memory_space<vmem>>, vector<1x1x256xf32>
    %93 = vector.shape_cast %92 : vector<1x1x256xf32> to vector<1x256xf32>
    %94 = vector.broadcast %93 : vector<1x256xf32> to vector<4x256xf32>
    %95 = arith.mulf %91, %94 : vector<4x256xf32>
    %c0_50 = arith.constant 0 : index
    %c9_51 = arith.constant 9 : index
    %96 = vector.load %arg3[%c0_50, %c9_51] : memref<4x49xf32, #tpu.memory_space<vmem>>, vector<4x1xf32>
    %97 = vector.broadcast %96 : vector<4x1xf32> to vector<4x256xf32>
    %98 = arith.mulf %95, %97 : vector<4x256xf32>
    %99 = arith.addf %90, %98 : vector<4x256xf32>
    %100 = vector.extract_strided_slice %1 {offsets = [0, 19], sizes = [4, 256], strides = [1, 1]} : vector<4x358xf32> to vector<4x256xf32>
    %c10 = arith.constant 10 : index
    %c0_52 = arith.constant 0 : index
    %c0_53 = arith.constant 0 : index
    %101 = vector.load %arg2[%c10, %c0_52, %c0_53] : memref<49x1x256xf32, #tpu.memory_space<vmem>>, vector<1x1x256xf32>
    %102 = vector.shape_cast %101 : vector<1x1x256xf32> to vector<1x256xf32>
    %103 = vector.broadcast %102 : vector<1x256xf32> to vector<4x256xf32>
    %104 = arith.mulf %100, %103 : vector<4x256xf32>
    %c0_54 = arith.constant 0 : index
    %c10_55 = arith.constant 10 : index
    %105 = vector.load %arg3[%c0_54, %c10_55] : memref<4x49xf32, #tpu.memory_space<vmem>>, vector<4x1xf32>
    %106 = vector.broadcast %105 : vector<4x1xf32> to vector<4x256xf32>
    %107 = arith.mulf %104, %106 : vector<4x256xf32>
    %108 = arith.addf %99, %107 : vector<4x256xf32>
    %109 = vector.extract_strided_slice %1 {offsets = [0, 20], sizes = [4, 256], strides = [1, 1]} : vector<4x358xf32> to vector<4x256xf32>
    %c11 = arith.constant 11 : index
    %c0_56 = arith.constant 0 : index
    %c0_57 = arith.constant 0 : index
    %110 = vector.load %arg2[%c11, %c0_56, %c0_57] : memref<49x1x256xf32, #tpu.memory_space<vmem>>, vector<1x1x256xf32>
    %111 = vector.shape_cast %110 : vector<1x1x256xf32> to vector<1x256xf32>
    %112 = vector.broadcast %111 : vector<1x256xf32> to vector<4x256xf32>
    %113 = arith.mulf %109, %112 : vector<4x256xf32>
    %c0_58 = arith.constant 0 : index
    %c11_59 = arith.constant 11 : index
    %114 = vector.load %arg3[%c0_58, %c11_59] : memref<4x49xf32, #tpu.memory_space<vmem>>, vector<4x1xf32>
    %115 = vector.broadcast %114 : vector<4x1xf32> to vector<4x256xf32>
    %116 = arith.mulf %113, %115 : vector<4x256xf32>
    %117 = arith.addf %108, %116 : vector<4x256xf32>
    %118 = vector.extract_strided_slice %1 {offsets = [0, 21], sizes = [4, 256], strides = [1, 1]} : vector<4x358xf32> to vector<4x256xf32>
    %c12 = arith.constant 12 : index
    %c0_60 = arith.constant 0 : index
    %c0_61 = arith.constant 0 : index
    %119 = vector.load %arg2[%c12, %c0_60, %c0_61] : memref<49x1x256xf32, #tpu.memory_space<vmem>>, vector<1x1x256xf32>
    %120 = vector.shape_cast %119 : vector<1x1x256xf32> to vector<1x256xf32>
    %121 = vector.broadcast %120 : vector<1x256xf32> to vector<4x256xf32>
    %122 = arith.mulf %118, %121 : vector<4x256xf32>
    %c0_62 = arith.constant 0 : index
    %c12_63 = arith.constant 12 : index
    %123 = vector.load %arg3[%c0_62, %c12_63] : memref<4x49xf32, #tpu.memory_space<vmem>>, vector<4x1xf32>
    %124 = vector.broadcast %123 : vector<4x1xf32> to vector<4x256xf32>
    %125 = arith.mulf %122, %124 : vector<4x256xf32>
    %126 = arith.addf %117, %125 : vector<4x256xf32>
    %127 = vector.extract_strided_slice %1 {offsets = [0, 22], sizes = [4, 256], strides = [1, 1]} : vector<4x358xf32> to vector<4x256xf32>
    %c13 = arith.constant 13 : index
    %c0_64 = arith.constant 0 : index
    %c0_65 = arith.constant 0 : index
    %128 = vector.load %arg2[%c13, %c0_64, %c0_65] : memref<49x1x256xf32, #tpu.memory_space<vmem>>, vector<1x1x256xf32>
    %129 = vector.shape_cast %128 : vector<1x1x256xf32> to vector<1x256xf32>
    %130 = vector.broadcast %129 : vector<1x256xf32> to vector<4x256xf32>
    %131 = arith.mulf %127, %130 : vector<4x256xf32>
    %c0_66 = arith.constant 0 : index
    %c13_67 = arith.constant 13 : index
    %132 = vector.load %arg3[%c0_66, %c13_67] : memref<4x49xf32, #tpu.memory_space<vmem>>, vector<4x1xf32>
    %133 = vector.broadcast %132 : vector<4x1xf32> to vector<4x256xf32>
    %134 = arith.mulf %131, %133 : vector<4x256xf32>
    %135 = arith.addf %126, %134 : vector<4x256xf32>
    %136 = vector.extract_strided_slice %1 {offsets = [0, 32], sizes = [4, 256], strides = [1, 1]} : vector<4x358xf32> to vector<4x256xf32>
    %c14 = arith.constant 14 : index
    %c0_68 = arith.constant 0 : index
    %c0_69 = arith.constant 0 : index
    %137 = vector.load %arg2[%c14, %c0_68, %c0_69] : memref<49x1x256xf32, #tpu.memory_space<vmem>>, vector<1x1x256xf32>
    %138 = vector.shape_cast %137 : vector<1x1x256xf32> to vector<1x256xf32>
    %139 = vector.broadcast %138 : vector<1x256xf32> to vector<4x256xf32>
    %140 = arith.mulf %136, %139 : vector<4x256xf32>
    %c0_70 = arith.constant 0 : index
    %c14_71 = arith.constant 14 : index
    %141 = vector.load %arg3[%c0_70, %c14_71] : memref<4x49xf32, #tpu.memory_space<vmem>>, vector<4x1xf32>
    %142 = vector.broadcast %141 : vector<4x1xf32> to vector<4x256xf32>
    %143 = arith.mulf %140, %142 : vector<4x256xf32>
    %144 = arith.addf %135, %143 : vector<4x256xf32>
    %145 = vector.extract_strided_slice %1 {offsets = [0, 33], sizes = [4, 256], strides = [1, 1]} : vector<4x358xf32> to vector<4x256xf32>
    %c15 = arith.constant 15 : index
    %c0_72 = arith.constant 0 : index
    %c0_73 = arith.constant 0 : index
    %146 = vector.load %arg2[%c15, %c0_72, %c0_73] : memref<49x1x256xf32, #tpu.memory_space<vmem>>, vector<1x1x256xf32>
    %147 = vector.shape_cast %146 : vector<1x1x256xf32> to vector<1x256xf32>
    %148 = vector.broadcast %147 : vector<1x256xf32> to vector<4x256xf32>
    %149 = arith.mulf %145, %148 : vector<4x256xf32>
    %c0_74 = arith.constant 0 : index
    %c15_75 = arith.constant 15 : index
    %150 = vector.load %arg3[%c0_74, %c15_75] : memref<4x49xf32, #tpu.memory_space<vmem>>, vector<4x1xf32>
    %151 = vector.broadcast %150 : vector<4x1xf32> to vector<4x256xf32>
    %152 = arith.mulf %149, %151 : vector<4x256xf32>
    %153 = arith.addf %144, %152 : vector<4x256xf32>
    %154 = vector.extract_strided_slice %1 {offsets = [0, 34], sizes = [4, 256], strides = [1, 1]} : vector<4x358xf32> to vector<4x256xf32>
    %c16 = arith.constant 16 : index
    %c0_76 = arith.constant 0 : index
    %c0_77 = arith.constant 0 : index
    %155 = vector.load %arg2[%c16, %c0_76, %c0_77] : memref<49x1x256xf32, #tpu.memory_space<vmem>>, vector<1x1x256xf32>
    %156 = vector.shape_cast %155 : vector<1x1x256xf32> to vector<1x256xf32>
    %157 = vector.broadcast %156 : vector<1x256xf32> to vector<4x256xf32>
    %158 = arith.mulf %154, %157 : vector<4x256xf32>
    %c0_78 = arith.constant 0 : index
    %c16_79 = arith.constant 16 : index
    %159 = vector.load %arg3[%c0_78, %c16_79] : memref<4x49xf32, #tpu.memory_space<vmem>>, vector<4x1xf32>
    %160 = vector.broadcast %159 : vector<4x1xf32> to vector<4x256xf32>
    %161 = arith.mulf %158, %160 : vector<4x256xf32>
    %162 = arith.addf %153, %161 : vector<4x256xf32>
    %163 = vector.extract_strided_slice %1 {offsets = [0, 35], sizes = [4, 256], strides = [1, 1]} : vector<4x358xf32> to vector<4x256xf32>
    %c17 = arith.constant 17 : index
    %c0_80 = arith.constant 0 : index
    %c0_81 = arith.constant 0 : index
    %164 = vector.load %arg2[%c17, %c0_80, %c0_81] : memref<49x1x256xf32, #tpu.memory_space<vmem>>, vector<1x1x256xf32>
    %165 = vector.shape_cast %164 : vector<1x1x256xf32> to vector<1x256xf32>
    %166 = vector.broadcast %165 : vector<1x256xf32> to vector<4x256xf32>
    %167 = arith.mulf %163, %166 : vector<4x256xf32>
    %c0_82 = arith.constant 0 : index
    %c17_83 = arith.constant 17 : index
    %168 = vector.load %arg3[%c0_82, %c17_83] : memref<4x49xf32, #tpu.memory_space<vmem>>, vector<4x1xf32>
    %169 = vector.broadcast %168 : vector<4x1xf32> to vector<4x256xf32>
    %170 = arith.mulf %167, %169 : vector<4x256xf32>
    %171 = arith.addf %162, %170 : vector<4x256xf32>
    %172 = vector.extract_strided_slice %1 {offsets = [0, 36], sizes = [4, 256], strides = [1, 1]} : vector<4x358xf32> to vector<4x256xf32>
    %c18 = arith.constant 18 : index
    %c0_84 = arith.constant 0 : index
    %c0_85 = arith.constant 0 : index
    %173 = vector.load %arg2[%c18, %c0_84, %c0_85] : memref<49x1x256xf32, #tpu.memory_space<vmem>>, vector<1x1x256xf32>
    %174 = vector.shape_cast %173 : vector<1x1x256xf32> to vector<1x256xf32>
    %175 = vector.broadcast %174 : vector<1x256xf32> to vector<4x256xf32>
    %176 = arith.mulf %172, %175 : vector<4x256xf32>
    %c0_86 = arith.constant 0 : index
    %c18_87 = arith.constant 18 : index
    %177 = vector.load %arg3[%c0_86, %c18_87] : memref<4x49xf32, #tpu.memory_space<vmem>>, vector<4x1xf32>
    %178 = vector.broadcast %177 : vector<4x1xf32> to vector<4x256xf32>
    %179 = arith.mulf %176, %178 : vector<4x256xf32>
    %180 = arith.addf %171, %179 : vector<4x256xf32>
    %181 = vector.extract_strided_slice %1 {offsets = [0, 37], sizes = [4, 256], strides = [1, 1]} : vector<4x358xf32> to vector<4x256xf32>
    %c19 = arith.constant 19 : index
    %c0_88 = arith.constant 0 : index
    %c0_89 = arith.constant 0 : index
    %182 = vector.load %arg2[%c19, %c0_88, %c0_89] : memref<49x1x256xf32, #tpu.memory_space<vmem>>, vector<1x1x256xf32>
    %183 = vector.shape_cast %182 : vector<1x1x256xf32> to vector<1x256xf32>
    %184 = vector.broadcast %183 : vector<1x256xf32> to vector<4x256xf32>
    %185 = arith.mulf %181, %184 : vector<4x256xf32>
    %c0_90 = arith.constant 0 : index
    %c19_91 = arith.constant 19 : index
    %186 = vector.load %arg3[%c0_90, %c19_91] : memref<4x49xf32, #tpu.memory_space<vmem>>, vector<4x1xf32>
    %187 = vector.broadcast %186 : vector<4x1xf32> to vector<4x256xf32>
    %188 = arith.mulf %185, %187 : vector<4x256xf32>
    %189 = arith.addf %180, %188 : vector<4x256xf32>
    %190 = vector.extract_strided_slice %1 {offsets = [0, 38], sizes = [4, 256], strides = [1, 1]} : vector<4x358xf32> to vector<4x256xf32>
    %c20 = arith.constant 20 : index
    %c0_92 = arith.constant 0 : index
    %c0_93 = arith.constant 0 : index
    %191 = vector.load %arg2[%c20, %c0_92, %c0_93] : memref<49x1x256xf32, #tpu.memory_space<vmem>>, vector<1x1x256xf32>
    %192 = vector.shape_cast %191 : vector<1x1x256xf32> to vector<1x256xf32>
    %193 = vector.broadcast %192 : vector<1x256xf32> to vector<4x256xf32>
    %194 = arith.mulf %190, %193 : vector<4x256xf32>
    %c0_94 = arith.constant 0 : index
    %c20_95 = arith.constant 20 : index
    %195 = vector.load %arg3[%c0_94, %c20_95] : memref<4x49xf32, #tpu.memory_space<vmem>>, vector<4x1xf32>
    %196 = vector.broadcast %195 : vector<4x1xf32> to vector<4x256xf32>
    %197 = arith.mulf %194, %196 : vector<4x256xf32>
    %198 = arith.addf %189, %197 : vector<4x256xf32>
    %199 = vector.extract_strided_slice %1 {offsets = [0, 48], sizes = [4, 256], strides = [1, 1]} : vector<4x358xf32> to vector<4x256xf32>
    %c21 = arith.constant 21 : index
    %c0_96 = arith.constant 0 : index
    %c0_97 = arith.constant 0 : index
    %200 = vector.load %arg2[%c21, %c0_96, %c0_97] : memref<49x1x256xf32, #tpu.memory_space<vmem>>, vector<1x1x256xf32>
    %201 = vector.shape_cast %200 : vector<1x1x256xf32> to vector<1x256xf32>
    %202 = vector.broadcast %201 : vector<1x256xf32> to vector<4x256xf32>
    %203 = arith.mulf %199, %202 : vector<4x256xf32>
    %c0_98 = arith.constant 0 : index
    %c21_99 = arith.constant 21 : index
    %204 = vector.load %arg3[%c0_98, %c21_99] : memref<4x49xf32, #tpu.memory_space<vmem>>, vector<4x1xf32>
    %205 = vector.broadcast %204 : vector<4x1xf32> to vector<4x256xf32>
    %206 = arith.mulf %203, %205 : vector<4x256xf32>
    %207 = arith.addf %198, %206 : vector<4x256xf32>
    %208 = vector.extract_strided_slice %1 {offsets = [0, 49], sizes = [4, 256], strides = [1, 1]} : vector<4x358xf32> to vector<4x256xf32>
    %c22 = arith.constant 22 : index
    %c0_100 = arith.constant 0 : index
    %c0_101 = arith.constant 0 : index
    %209 = vector.load %arg2[%c22, %c0_100, %c0_101] : memref<49x1x256xf32, #tpu.memory_space<vmem>>, vector<1x1x256xf32>
    %210 = vector.shape_cast %209 : vector<1x1x256xf32> to vector<1x256xf32>
    %211 = vector.broadcast %210 : vector<1x256xf32> to vector<4x256xf32>
    %212 = arith.mulf %208, %211 : vector<4x256xf32>
    %c0_102 = arith.constant 0 : index
    %c22_103 = arith.constant 22 : index
    %213 = vector.load %arg3[%c0_102, %c22_103] : memref<4x49xf32, #tpu.memory_space<vmem>>, vector<4x1xf32>
    %214 = vector.broadcast %213 : vector<4x1xf32> to vector<4x256xf32>
    %215 = arith.mulf %212, %214 : vector<4x256xf32>
    %216 = arith.addf %207, %215 : vector<4x256xf32>
    %217 = vector.extract_strided_slice %1 {offsets = [0, 50], sizes = [4, 256], strides = [1, 1]} : vector<4x358xf32> to vector<4x256xf32>
    %c23 = arith.constant 23 : index
    %c0_104 = arith.constant 0 : index
    %c0_105 = arith.constant 0 : index
    %218 = vector.load %arg2[%c23, %c0_104, %c0_105] : memref<49x1x256xf32, #tpu.memory_space<vmem>>, vector<1x1x256xf32>
    %219 = vector.shape_cast %218 : vector<1x1x256xf32> to vector<1x256xf32>
    %220 = vector.broadcast %219 : vector<1x256xf32> to vector<4x256xf32>
    %221 = arith.mulf %217, %220 : vector<4x256xf32>
    %c0_106 = arith.constant 0 : index
    %c23_107 = arith.constant 23 : index
    %222 = vector.load %arg3[%c0_106, %c23_107] : memref<4x49xf32, #tpu.memory_space<vmem>>, vector<4x1xf32>
    %223 = vector.broadcast %222 : vector<4x1xf32> to vector<4x256xf32>
    %224 = arith.mulf %221, %223 : vector<4x256xf32>
    %225 = arith.addf %216, %224 : vector<4x256xf32>
    %226 = vector.extract_strided_slice %1 {offsets = [0, 52], sizes = [4, 256], strides = [1, 1]} : vector<4x358xf32> to vector<4x256xf32>
    %c25 = arith.constant 25 : index
    %c0_108 = arith.constant 0 : index
    %c0_109 = arith.constant 0 : index
    %227 = vector.load %arg2[%c25, %c0_108, %c0_109] : memref<49x1x256xf32, #tpu.memory_space<vmem>>, vector<1x1x256xf32>
    %228 = vector.shape_cast %227 : vector<1x1x256xf32> to vector<1x256xf32>
    %229 = vector.broadcast %228 : vector<1x256xf32> to vector<4x256xf32>
    %230 = arith.mulf %226, %229 : vector<4x256xf32>
    %c0_110 = arith.constant 0 : index
    %c25_111 = arith.constant 25 : index
    %231 = vector.load %arg3[%c0_110, %c25_111] : memref<4x49xf32, #tpu.memory_space<vmem>>, vector<4x1xf32>
    %232 = vector.broadcast %231 : vector<4x1xf32> to vector<4x256xf32>
    %233 = arith.mulf %230, %232 : vector<4x256xf32>
    %234 = arith.addf %225, %233 : vector<4x256xf32>
    %235 = vector.extract_strided_slice %1 {offsets = [0, 53], sizes = [4, 256], strides = [1, 1]} : vector<4x358xf32> to vector<4x256xf32>
    %c26 = arith.constant 26 : index
    %c0_112 = arith.constant 0 : index
    %c0_113 = arith.constant 0 : index
    %236 = vector.load %arg2[%c26, %c0_112, %c0_113] : memref<49x1x256xf32, #tpu.memory_space<vmem>>, vector<1x1x256xf32>
    %237 = vector.shape_cast %236 : vector<1x1x256xf32> to vector<1x256xf32>
    %238 = vector.broadcast %237 : vector<1x256xf32> to vector<4x256xf32>
    %239 = arith.mulf %235, %238 : vector<4x256xf32>
    %c0_114 = arith.constant 0 : index
    %c26_115 = arith.constant 26 : index
    %240 = vector.load %arg3[%c0_114, %c26_115] : memref<4x49xf32, #tpu.memory_space<vmem>>, vector<4x1xf32>
    %241 = vector.broadcast %240 : vector<4x1xf32> to vector<4x256xf32>
    %242 = arith.mulf %239, %241 : vector<4x256xf32>
    %243 = arith.addf %234, %242 : vector<4x256xf32>
    %244 = vector.extract_strided_slice %1 {offsets = [0, 54], sizes = [4, 256], strides = [1, 1]} : vector<4x358xf32> to vector<4x256xf32>
    %c27 = arith.constant 27 : index
    %c0_116 = arith.constant 0 : index
    %c0_117 = arith.constant 0 : index
    %245 = vector.load %arg2[%c27, %c0_116, %c0_117] : memref<49x1x256xf32, #tpu.memory_space<vmem>>, vector<1x1x256xf32>
    %246 = vector.shape_cast %245 : vector<1x1x256xf32> to vector<1x256xf32>
    %247 = vector.broadcast %246 : vector<1x256xf32> to vector<4x256xf32>
    %248 = arith.mulf %244, %247 : vector<4x256xf32>
    %c0_118 = arith.constant 0 : index
    %c27_119 = arith.constant 27 : index
    %249 = vector.load %arg3[%c0_118, %c27_119] : memref<4x49xf32, #tpu.memory_space<vmem>>, vector<4x1xf32>
    %250 = vector.broadcast %249 : vector<4x1xf32> to vector<4x256xf32>
    %251 = arith.mulf %248, %250 : vector<4x256xf32>
    %252 = arith.addf %243, %251 : vector<4x256xf32>
    %253 = vector.extract_strided_slice %1 {offsets = [0, 64], sizes = [4, 256], strides = [1, 1]} : vector<4x358xf32> to vector<4x256xf32>
    %c28 = arith.constant 28 : index
    %c0_120 = arith.constant 0 : index
    %c0_121 = arith.constant 0 : index
    %254 = vector.load %arg2[%c28, %c0_120, %c0_121] : memref<49x1x256xf32, #tpu.memory_space<vmem>>, vector<1x1x256xf32>
    %255 = vector.shape_cast %254 : vector<1x1x256xf32> to vector<1x256xf32>
    %256 = vector.broadcast %255 : vector<1x256xf32> to vector<4x256xf32>
    %257 = arith.mulf %253, %256 : vector<4x256xf32>
    %c0_122 = arith.constant 0 : index
    %c28_123 = arith.constant 28 : index
    %258 = vector.load %arg3[%c0_122, %c28_123] : memref<4x49xf32, #tpu.memory_space<vmem>>, vector<4x1xf32>
    %259 = vector.broadcast %258 : vector<4x1xf32> to vector<4x256xf32>
    %260 = arith.mulf %257, %259 : vector<4x256xf32>
    %261 = arith.addf %252, %260 : vector<4x256xf32>
    %262 = vector.extract_strided_slice %1 {offsets = [0, 65], sizes = [4, 256], strides = [1, 1]} : vector<4x358xf32> to vector<4x256xf32>
    %c29 = arith.constant 29 : index
    %c0_124 = arith.constant 0 : index
    %c0_125 = arith.constant 0 : index
    %263 = vector.load %arg2[%c29, %c0_124, %c0_125] : memref<49x1x256xf32, #tpu.memory_space<vmem>>, vector<1x1x256xf32>
    %264 = vector.shape_cast %263 : vector<1x1x256xf32> to vector<1x256xf32>
    %265 = vector.broadcast %264 : vector<1x256xf32> to vector<4x256xf32>
    %266 = arith.mulf %262, %265 : vector<4x256xf32>
    %c0_126 = arith.constant 0 : index
    %c29_127 = arith.constant 29 : index
    %267 = vector.load %arg3[%c0_126, %c29_127] : memref<4x49xf32, #tpu.memory_space<vmem>>, vector<4x1xf32>
    %268 = vector.broadcast %267 : vector<4x1xf32> to vector<4x256xf32>
    %269 = arith.mulf %266, %268 : vector<4x256xf32>
    %270 = arith.addf %261, %269 : vector<4x256xf32>
    %271 = vector.extract_strided_slice %1 {offsets = [0, 66], sizes = [4, 256], strides = [1, 1]} : vector<4x358xf32> to vector<4x256xf32>
    %c30 = arith.constant 30 : index
    %c0_128 = arith.constant 0 : index
    %c0_129 = arith.constant 0 : index
    %272 = vector.load %arg2[%c30, %c0_128, %c0_129] : memref<49x1x256xf32, #tpu.memory_space<vmem>>, vector<1x1x256xf32>
    %273 = vector.shape_cast %272 : vector<1x1x256xf32> to vector<1x256xf32>
    %274 = vector.broadcast %273 : vector<1x256xf32> to vector<4x256xf32>
    %275 = arith.mulf %271, %274 : vector<4x256xf32>
    %c0_130 = arith.constant 0 : index
    %c30_131 = arith.constant 30 : index
    %276 = vector.load %arg3[%c0_130, %c30_131] : memref<4x49xf32, #tpu.memory_space<vmem>>, vector<4x1xf32>
    %277 = vector.broadcast %276 : vector<4x1xf32> to vector<4x256xf32>
    %278 = arith.mulf %275, %277 : vector<4x256xf32>
    %279 = arith.addf %270, %278 : vector<4x256xf32>
    %280 = vector.extract_strided_slice %1 {offsets = [0, 67], sizes = [4, 256], strides = [1, 1]} : vector<4x358xf32> to vector<4x256xf32>
    %c31 = arith.constant 31 : index
    %c0_132 = arith.constant 0 : index
    %c0_133 = arith.constant 0 : index
    %281 = vector.load %arg2[%c31, %c0_132, %c0_133] : memref<49x1x256xf32, #tpu.memory_space<vmem>>, vector<1x1x256xf32>
    %282 = vector.shape_cast %281 : vector<1x1x256xf32> to vector<1x256xf32>
    %283 = vector.broadcast %282 : vector<1x256xf32> to vector<4x256xf32>
    %284 = arith.mulf %280, %283 : vector<4x256xf32>
    %c0_134 = arith.constant 0 : index
    %c31_135 = arith.constant 31 : index
    %285 = vector.load %arg3[%c0_134, %c31_135] : memref<4x49xf32, #tpu.memory_space<vmem>>, vector<4x1xf32>
    %286 = vector.broadcast %285 : vector<4x1xf32> to vector<4x256xf32>
    %287 = arith.mulf %284, %286 : vector<4x256xf32>
    %288 = arith.addf %279, %287 : vector<4x256xf32>
    %289 = vector.extract_strided_slice %1 {offsets = [0, 68], sizes = [4, 256], strides = [1, 1]} : vector<4x358xf32> to vector<4x256xf32>
    %c32 = arith.constant 32 : index
    %c0_136 = arith.constant 0 : index
    %c0_137 = arith.constant 0 : index
    %290 = vector.load %arg2[%c32, %c0_136, %c0_137] : memref<49x1x256xf32, #tpu.memory_space<vmem>>, vector<1x1x256xf32>
    %291 = vector.shape_cast %290 : vector<1x1x256xf32> to vector<1x256xf32>
    %292 = vector.broadcast %291 : vector<1x256xf32> to vector<4x256xf32>
    %293 = arith.mulf %289, %292 : vector<4x256xf32>
    %c0_138 = arith.constant 0 : index
    %c32_139 = arith.constant 32 : index
    %294 = vector.load %arg3[%c0_138, %c32_139] : memref<4x49xf32, #tpu.memory_space<vmem>>, vector<4x1xf32>
    %295 = vector.broadcast %294 : vector<4x1xf32> to vector<4x256xf32>
    %296 = arith.mulf %293, %295 : vector<4x256xf32>
    %297 = arith.addf %288, %296 : vector<4x256xf32>
    %298 = vector.extract_strided_slice %1 {offsets = [0, 69], sizes = [4, 256], strides = [1, 1]} : vector<4x358xf32> to vector<4x256xf32>
    %c33 = arith.constant 33 : index
    %c0_140 = arith.constant 0 : index
    %c0_141 = arith.constant 0 : index
    %299 = vector.load %arg2[%c33, %c0_140, %c0_141] : memref<49x1x256xf32, #tpu.memory_space<vmem>>, vector<1x1x256xf32>
    %300 = vector.shape_cast %299 : vector<1x1x256xf32> to vector<1x256xf32>
    %301 = vector.broadcast %300 : vector<1x256xf32> to vector<4x256xf32>
    %302 = arith.mulf %298, %301 : vector<4x256xf32>
    %c0_142 = arith.constant 0 : index
    %c33_143 = arith.constant 33 : index
    %303 = vector.load %arg3[%c0_142, %c33_143] : memref<4x49xf32, #tpu.memory_space<vmem>>, vector<4x1xf32>
    %304 = vector.broadcast %303 : vector<4x1xf32> to vector<4x256xf32>
    %305 = arith.mulf %302, %304 : vector<4x256xf32>
    %306 = arith.addf %297, %305 : vector<4x256xf32>
    %307 = vector.extract_strided_slice %1 {offsets = [0, 70], sizes = [4, 256], strides = [1, 1]} : vector<4x358xf32> to vector<4x256xf32>
    %c34 = arith.constant 34 : index
    %c0_144 = arith.constant 0 : index
    %c0_145 = arith.constant 0 : index
    %308 = vector.load %arg2[%c34, %c0_144, %c0_145] : memref<49x1x256xf32, #tpu.memory_space<vmem>>, vector<1x1x256xf32>
    %309 = vector.shape_cast %308 : vector<1x1x256xf32> to vector<1x256xf32>
    %310 = vector.broadcast %309 : vector<1x256xf32> to vector<4x256xf32>
    %311 = arith.mulf %307, %310 : vector<4x256xf32>
    %c0_146 = arith.constant 0 : index
    %c34_147 = arith.constant 34 : index
    %312 = vector.load %arg3[%c0_146, %c34_147] : memref<4x49xf32, #tpu.memory_space<vmem>>, vector<4x1xf32>
    %313 = vector.broadcast %312 : vector<4x1xf32> to vector<4x256xf32>
    %314 = arith.mulf %311, %313 : vector<4x256xf32>
    %315 = arith.addf %306, %314 : vector<4x256xf32>
    %316 = vector.extract_strided_slice %1 {offsets = [0, 80], sizes = [4, 256], strides = [1, 1]} : vector<4x358xf32> to vector<4x256xf32>
    %c35 = arith.constant 35 : index
    %c0_148 = arith.constant 0 : index
    %c0_149 = arith.constant 0 : index
    %317 = vector.load %arg2[%c35, %c0_148, %c0_149] : memref<49x1x256xf32, #tpu.memory_space<vmem>>, vector<1x1x256xf32>
    %318 = vector.shape_cast %317 : vector<1x1x256xf32> to vector<1x256xf32>
    %319 = vector.broadcast %318 : vector<1x256xf32> to vector<4x256xf32>
    %320 = arith.mulf %316, %319 : vector<4x256xf32>
    %c0_150 = arith.constant 0 : index
    %c35_151 = arith.constant 35 : index
    %321 = vector.load %arg3[%c0_150, %c35_151] : memref<4x49xf32, #tpu.memory_space<vmem>>, vector<4x1xf32>
    %322 = vector.broadcast %321 : vector<4x1xf32> to vector<4x256xf32>
    %323 = arith.mulf %320, %322 : vector<4x256xf32>
    %324 = arith.addf %315, %323 : vector<4x256xf32>
    %325 = vector.extract_strided_slice %1 {offsets = [0, 81], sizes = [4, 256], strides = [1, 1]} : vector<4x358xf32> to vector<4x256xf32>
    %c36 = arith.constant 36 : index
    %c0_152 = arith.constant 0 : index
    %c0_153 = arith.constant 0 : index
    %326 = vector.load %arg2[%c36, %c0_152, %c0_153] : memref<49x1x256xf32, #tpu.memory_space<vmem>>, vector<1x1x256xf32>
    %327 = vector.shape_cast %326 : vector<1x1x256xf32> to vector<1x256xf32>
    %328 = vector.broadcast %327 : vector<1x256xf32> to vector<4x256xf32>
    %329 = arith.mulf %325, %328 : vector<4x256xf32>
    %c0_154 = arith.constant 0 : index
    %c36_155 = arith.constant 36 : index
    %330 = vector.load %arg3[%c0_154, %c36_155] : memref<4x49xf32, #tpu.memory_space<vmem>>, vector<4x1xf32>
    %331 = vector.broadcast %330 : vector<4x1xf32> to vector<4x256xf32>
    %332 = arith.mulf %329, %331 : vector<4x256xf32>
    %333 = arith.addf %324, %332 : vector<4x256xf32>
    %334 = vector.extract_strided_slice %1 {offsets = [0, 82], sizes = [4, 256], strides = [1, 1]} : vector<4x358xf32> to vector<4x256xf32>
    %c37 = arith.constant 37 : index
    %c0_156 = arith.constant 0 : index
    %c0_157 = arith.constant 0 : index
    %335 = vector.load %arg2[%c37, %c0_156, %c0_157] : memref<49x1x256xf32, #tpu.memory_space<vmem>>, vector<1x1x256xf32>
    %336 = vector.shape_cast %335 : vector<1x1x256xf32> to vector<1x256xf32>
    %337 = vector.broadcast %336 : vector<1x256xf32> to vector<4x256xf32>
    %338 = arith.mulf %334, %337 : vector<4x256xf32>
    %c0_158 = arith.constant 0 : index
    %c37_159 = arith.constant 37 : index
    %339 = vector.load %arg3[%c0_158, %c37_159] : memref<4x49xf32, #tpu.memory_space<vmem>>, vector<4x1xf32>
    %340 = vector.broadcast %339 : vector<4x1xf32> to vector<4x256xf32>
    %341 = arith.mulf %338, %340 : vector<4x256xf32>
    %342 = arith.addf %333, %341 : vector<4x256xf32>
    %343 = vector.extract_strided_slice %1 {offsets = [0, 83], sizes = [4, 256], strides = [1, 1]} : vector<4x358xf32> to vector<4x256xf32>
    %c38 = arith.constant 38 : index
    %c0_160 = arith.constant 0 : index
    %c0_161 = arith.constant 0 : index
    %344 = vector.load %arg2[%c38, %c0_160, %c0_161] : memref<49x1x256xf32, #tpu.memory_space<vmem>>, vector<1x1x256xf32>
    %345 = vector.shape_cast %344 : vector<1x1x256xf32> to vector<1x256xf32>
    %346 = vector.broadcast %345 : vector<1x256xf32> to vector<4x256xf32>
    %347 = arith.mulf %343, %346 : vector<4x256xf32>
    %c0_162 = arith.constant 0 : index
    %c38_163 = arith.constant 38 : index
    %348 = vector.load %arg3[%c0_162, %c38_163] : memref<4x49xf32, #tpu.memory_space<vmem>>, vector<4x1xf32>
    %349 = vector.broadcast %348 : vector<4x1xf32> to vector<4x256xf32>
    %350 = arith.mulf %347, %349 : vector<4x256xf32>
    %351 = arith.addf %342, %350 : vector<4x256xf32>
    %352 = vector.extract_strided_slice %1 {offsets = [0, 84], sizes = [4, 256], strides = [1, 1]} : vector<4x358xf32> to vector<4x256xf32>
    %c39 = arith.constant 39 : index
    %c0_164 = arith.constant 0 : index
    %c0_165 = arith.constant 0 : index
    %353 = vector.load %arg2[%c39, %c0_164, %c0_165] : memref<49x1x256xf32, #tpu.memory_space<vmem>>, vector<1x1x256xf32>
    %354 = vector.shape_cast %353 : vector<1x1x256xf32> to vector<1x256xf32>
    %355 = vector.broadcast %354 : vector<1x256xf32> to vector<4x256xf32>
    %356 = arith.mulf %352, %355 : vector<4x256xf32>
    %c0_166 = arith.constant 0 : index
    %c39_167 = arith.constant 39 : index
    %357 = vector.load %arg3[%c0_166, %c39_167] : memref<4x49xf32, #tpu.memory_space<vmem>>, vector<4x1xf32>
    %358 = vector.broadcast %357 : vector<4x1xf32> to vector<4x256xf32>
    %359 = arith.mulf %356, %358 : vector<4x256xf32>
    %360 = arith.addf %351, %359 : vector<4x256xf32>
    %361 = vector.extract_strided_slice %1 {offsets = [0, 85], sizes = [4, 256], strides = [1, 1]} : vector<4x358xf32> to vector<4x256xf32>
    %c40 = arith.constant 40 : index
    %c0_168 = arith.constant 0 : index
    %c0_169 = arith.constant 0 : index
    %362 = vector.load %arg2[%c40, %c0_168, %c0_169] : memref<49x1x256xf32, #tpu.memory_space<vmem>>, vector<1x1x256xf32>
    %363 = vector.shape_cast %362 : vector<1x1x256xf32> to vector<1x256xf32>
    %364 = vector.broadcast %363 : vector<1x256xf32> to vector<4x256xf32>
    %365 = arith.mulf %361, %364 : vector<4x256xf32>
    %c0_170 = arith.constant 0 : index
    %c40_171 = arith.constant 40 : index
    %366 = vector.load %arg3[%c0_170, %c40_171] : memref<4x49xf32, #tpu.memory_space<vmem>>, vector<4x1xf32>
    %367 = vector.broadcast %366 : vector<4x1xf32> to vector<4x256xf32>
    %368 = arith.mulf %365, %367 : vector<4x256xf32>
    %369 = arith.addf %360, %368 : vector<4x256xf32>
    %370 = vector.extract_strided_slice %1 {offsets = [0, 86], sizes = [4, 256], strides = [1, 1]} : vector<4x358xf32> to vector<4x256xf32>
    %c41 = arith.constant 41 : index
    %c0_172 = arith.constant 0 : index
    %c0_173 = arith.constant 0 : index
    %371 = vector.load %arg2[%c41, %c0_172, %c0_173] : memref<49x1x256xf32, #tpu.memory_space<vmem>>, vector<1x1x256xf32>
    %372 = vector.shape_cast %371 : vector<1x1x256xf32> to vector<1x256xf32>
    %373 = vector.broadcast %372 : vector<1x256xf32> to vector<4x256xf32>
    %374 = arith.mulf %370, %373 : vector<4x256xf32>
    %c0_174 = arith.constant 0 : index
    %c41_175 = arith.constant 41 : index
    %375 = vector.load %arg3[%c0_174, %c41_175] : memref<4x49xf32, #tpu.memory_space<vmem>>, vector<4x1xf32>
    %376 = vector.broadcast %375 : vector<4x1xf32> to vector<4x256xf32>
    %377 = arith.mulf %374, %376 : vector<4x256xf32>
    %378 = arith.addf %369, %377 : vector<4x256xf32>
    %379 = vector.extract_strided_slice %1 {offsets = [0, 96], sizes = [4, 256], strides = [1, 1]} : vector<4x358xf32> to vector<4x256xf32>
    %c42 = arith.constant 42 : index
    %c0_176 = arith.constant 0 : index
    %c0_177 = arith.constant 0 : index
    %380 = vector.load %arg2[%c42, %c0_176, %c0_177] : memref<49x1x256xf32, #tpu.memory_space<vmem>>, vector<1x1x256xf32>
    %381 = vector.shape_cast %380 : vector<1x1x256xf32> to vector<1x256xf32>
    %382 = vector.broadcast %381 : vector<1x256xf32> to vector<4x256xf32>
    %383 = arith.mulf %379, %382 : vector<4x256xf32>
    %c0_178 = arith.constant 0 : index
    %c42_179 = arith.constant 42 : index
    %384 = vector.load %arg3[%c0_178, %c42_179] : memref<4x49xf32, #tpu.memory_space<vmem>>, vector<4x1xf32>
    %385 = vector.broadcast %384 : vector<4x1xf32> to vector<4x256xf32>
    %386 = arith.mulf %383, %385 : vector<4x256xf32>
    %387 = arith.addf %378, %386 : vector<4x256xf32>
    %388 = vector.extract_strided_slice %1 {offsets = [0, 97], sizes = [4, 256], strides = [1, 1]} : vector<4x358xf32> to vector<4x256xf32>
    %c43 = arith.constant 43 : index
    %c0_180 = arith.constant 0 : index
    %c0_181 = arith.constant 0 : index
    %389 = vector.load %arg2[%c43, %c0_180, %c0_181] : memref<49x1x256xf32, #tpu.memory_space<vmem>>, vector<1x1x256xf32>
    %390 = vector.shape_cast %389 : vector<1x1x256xf32> to vector<1x256xf32>
    %391 = vector.broadcast %390 : vector<1x256xf32> to vector<4x256xf32>
    %392 = arith.mulf %388, %391 : vector<4x256xf32>
    %c0_182 = arith.constant 0 : index
    %c43_183 = arith.constant 43 : index
    %393 = vector.load %arg3[%c0_182, %c43_183] : memref<4x49xf32, #tpu.memory_space<vmem>>, vector<4x1xf32>
    %394 = vector.broadcast %393 : vector<4x1xf32> to vector<4x256xf32>
    %395 = arith.mulf %392, %394 : vector<4x256xf32>
    %396 = arith.addf %387, %395 : vector<4x256xf32>
    %397 = vector.extract_strided_slice %1 {offsets = [0, 98], sizes = [4, 256], strides = [1, 1]} : vector<4x358xf32> to vector<4x256xf32>
    %c44 = arith.constant 44 : index
    %c0_184 = arith.constant 0 : index
    %c0_185 = arith.constant 0 : index
    %398 = vector.load %arg2[%c44, %c0_184, %c0_185] : memref<49x1x256xf32, #tpu.memory_space<vmem>>, vector<1x1x256xf32>
    %399 = vector.shape_cast %398 : vector<1x1x256xf32> to vector<1x256xf32>
    %400 = vector.broadcast %399 : vector<1x256xf32> to vector<4x256xf32>
    %401 = arith.mulf %397, %400 : vector<4x256xf32>
    %c0_186 = arith.constant 0 : index
    %c44_187 = arith.constant 44 : index
    %402 = vector.load %arg3[%c0_186, %c44_187] : memref<4x49xf32, #tpu.memory_space<vmem>>, vector<4x1xf32>
    %403 = vector.broadcast %402 : vector<4x1xf32> to vector<4x256xf32>
    %404 = arith.mulf %401, %403 : vector<4x256xf32>
    %405 = arith.addf %396, %404 : vector<4x256xf32>
    %406 = vector.extract_strided_slice %1 {offsets = [0, 99], sizes = [4, 256], strides = [1, 1]} : vector<4x358xf32> to vector<4x256xf32>
    %c45 = arith.constant 45 : index
    %c0_188 = arith.constant 0 : index
    %c0_189 = arith.constant 0 : index
    %407 = vector.load %arg2[%c45, %c0_188, %c0_189] : memref<49x1x256xf32, #tpu.memory_space<vmem>>, vector<1x1x256xf32>
    %408 = vector.shape_cast %407 : vector<1x1x256xf32> to vector<1x256xf32>
    %409 = vector.broadcast %408 : vector<1x256xf32> to vector<4x256xf32>
    %410 = arith.mulf %406, %409 : vector<4x256xf32>
    %c0_190 = arith.constant 0 : index
    %c45_191 = arith.constant 45 : index
    %411 = vector.load %arg3[%c0_190, %c45_191] : memref<4x49xf32, #tpu.memory_space<vmem>>, vector<4x1xf32>
    %412 = vector.broadcast %411 : vector<4x1xf32> to vector<4x256xf32>
    %413 = arith.mulf %410, %412 : vector<4x256xf32>
    %414 = arith.addf %405, %413 : vector<4x256xf32>
    %415 = vector.extract_strided_slice %1 {offsets = [0, 100], sizes = [4, 256], strides = [1, 1]} : vector<4x358xf32> to vector<4x256xf32>
    %c46 = arith.constant 46 : index
    %c0_192 = arith.constant 0 : index
    %c0_193 = arith.constant 0 : index
    %416 = vector.load %arg2[%c46, %c0_192, %c0_193] : memref<49x1x256xf32, #tpu.memory_space<vmem>>, vector<1x1x256xf32>
    %417 = vector.shape_cast %416 : vector<1x1x256xf32> to vector<1x256xf32>
    %418 = vector.broadcast %417 : vector<1x256xf32> to vector<4x256xf32>
    %419 = arith.mulf %415, %418 : vector<4x256xf32>
    %c0_194 = arith.constant 0 : index
    %c46_195 = arith.constant 46 : index
    %420 = vector.load %arg3[%c0_194, %c46_195] : memref<4x49xf32, #tpu.memory_space<vmem>>, vector<4x1xf32>
    %421 = vector.broadcast %420 : vector<4x1xf32> to vector<4x256xf32>
    %422 = arith.mulf %419, %421 : vector<4x256xf32>
    %423 = arith.addf %414, %422 : vector<4x256xf32>
    %424 = vector.extract_strided_slice %1 {offsets = [0, 101], sizes = [4, 256], strides = [1, 1]} : vector<4x358xf32> to vector<4x256xf32>
    %c47 = arith.constant 47 : index
    %c0_196 = arith.constant 0 : index
    %c0_197 = arith.constant 0 : index
    %425 = vector.load %arg2[%c47, %c0_196, %c0_197] : memref<49x1x256xf32, #tpu.memory_space<vmem>>, vector<1x1x256xf32>
    %426 = vector.shape_cast %425 : vector<1x1x256xf32> to vector<1x256xf32>
    %427 = vector.broadcast %426 : vector<1x256xf32> to vector<4x256xf32>
    %428 = arith.mulf %424, %427 : vector<4x256xf32>
    %c0_198 = arith.constant 0 : index
    %c47_199 = arith.constant 47 : index
    %429 = vector.load %arg3[%c0_198, %c47_199] : memref<4x49xf32, #tpu.memory_space<vmem>>, vector<4x1xf32>
    %430 = vector.broadcast %429 : vector<4x1xf32> to vector<4x256xf32>
    %431 = arith.mulf %428, %430 : vector<4x256xf32>
    %432 = arith.addf %423, %431 : vector<4x256xf32>
    %433 = vector.extract_strided_slice %1 {offsets = [0, 102], sizes = [4, 256], strides = [1, 1]} : vector<4x358xf32> to vector<4x256xf32>
    %c48 = arith.constant 48 : index
    %c0_200 = arith.constant 0 : index
    %c0_201 = arith.constant 0 : index
    %434 = vector.load %arg2[%c48, %c0_200, %c0_201] : memref<49x1x256xf32, #tpu.memory_space<vmem>>, vector<1x1x256xf32>
    %435 = vector.shape_cast %434 : vector<1x1x256xf32> to vector<1x256xf32>
    %436 = vector.broadcast %435 : vector<1x256xf32> to vector<4x256xf32>
    %437 = arith.mulf %433, %436 : vector<4x256xf32>
    %c0_202 = arith.constant 0 : index
    %c48_203 = arith.constant 48 : index
    %438 = vector.load %arg3[%c0_202, %c48_203] : memref<4x49xf32, #tpu.memory_space<vmem>>, vector<4x1xf32>
    %439 = vector.broadcast %438 : vector<4x1xf32> to vector<4x256xf32>
    %440 = arith.mulf %437, %439 : vector<4x256xf32>
    %441 = arith.addf %432, %440 : vector<4x256xf32>
    %442 = vector.broadcast %6 : vector<4x1xf32> to vector<4x256xf32>
    %443 = arith.addf %441, %442 : vector<4x256xf32>
    %c0_204 = arith.constant 0 : index
    %c0_205 = arith.constant 0 : index
    %444 = vector.load %arg4[%c0_204, %c0_205] : memref<16x4xbf16, #tpu.memory_space<vmem>>, vector<16x4xbf16>
    %445 = arith.truncf %443 : vector<4x256xf32> to vector<4x256xbf16>
    %cst = arith.constant dense<0.000000e+00> : vector<16x256xf32>
    %446 = tpu.matmul %444, %445, %cst {dimension_numbers = #tpu.dot_dimension_numbers<[1], [0], [0], [1], [0, 0, 1, 1], [], []>} : vector<16x4xbf16>, vector<4x256xbf16>, vector<16x256xf32> -> vector<16x256xf32>
    %447 = vector.broadcast %3 : vector<16x1xf32> to vector<16x256xf32>
    %448 = arith.addf %446, %447 : vector<16x256xf32>
    %cst_206 = arith.constant 5.000000e-01 : f32
    %449 = vector.broadcast %cst_206 : f32 to vector<16x256xf32>
    %450 = arith.mulf %449, %448 : vector<16x256xf32>
    %451 = arith.mulf %448, %448 : vector<16x256xf32>
    %452 = arith.mulf %451, %448 : vector<16x256xf32>
    %cst_207 = arith.constant 4.471500e-02 : f32
    %453 = vector.broadcast %cst_207 : f32 to vector<16x256xf32>
    %454 = arith.mulf %453, %452 : vector<16x256xf32>
    %455 = arith.addf %448, %454 : vector<16x256xf32>
    %cst_208 = arith.constant 0.797884583 : f32
    %456 = vector.broadcast %cst_208 : f32 to vector<16x256xf32>
    %457 = arith.mulf %456, %455 : vector<16x256xf32>
    %458 = math.tanh %457 : vector<16x256xf32>
    %cst_209 = arith.constant 1.000000e+00 : f32
    %459 = vector.broadcast %cst_209 : f32 to vector<16x256xf32>
    %460 = arith.addf %459, %458 : vector<16x256xf32>
    %461 = arith.mulf %450, %460 : vector<16x256xf32>
    %c0_210 = arith.constant 0 : index
    %c0_211 = arith.constant 0 : index
    %462 = vector.load %arg5[%c0_210, %c0_211] : memref<4x16xbf16, #tpu.memory_space<vmem>>, vector<4x16xbf16>
    %463 = arith.truncf %461 : vector<16x256xf32> to vector<16x256xbf16>
    %cst_212 = arith.constant dense<0.000000e+00> : vector<4x256xf32>
    %464 = tpu.matmul %462, %463, %cst_212 {dimension_numbers = #tpu.dot_dimension_numbers<[1], [0], [0], [1], [0, 0, 1, 1], [], []>} : vector<4x16xbf16>, vector<16x256xbf16>, vector<4x256xf32> -> vector<4x256xf32>
    %465 = vector.broadcast %4 : vector<4x1xf32> to vector<4x256xf32>
    %466 = arith.addf %464, %465 : vector<4x256xf32>
    %467 = arith.addf %2, %466 : vector<4x256xf32>
    %cst_213 = arith.constant 5.000000e-01 : f32
    %468 = vector.broadcast %cst_213 : f32 to vector<4x256xf32>
    %469 = arith.mulf %468, %467 : vector<4x256xf32>
    %470 = arith.mulf %467, %467 : vector<4x256xf32>
    %471 = arith.mulf %470, %467 : vector<4x256xf32>
    %cst_214 = arith.constant 4.471500e-02 : f32
    %472 = vector.broadcast %cst_214 : f32 to vector<4x256xf32>
    %473 = arith.mulf %472, %471 : vector<4x256xf32>
    %474 = arith.addf %467, %473 : vector<4x256xf32>
    %cst_215 = arith.constant 0.797884583 : f32
    %475 = vector.broadcast %cst_215 : f32 to vector<4x256xf32>
    %476 = arith.mulf %475, %474 : vector<4x256xf32>
    %477 = math.tanh %476 : vector<4x256xf32>
    %cst_216 = arith.constant 1.000000e+00 : f32
    %478 = vector.broadcast %cst_216 : f32 to vector<4x256xf32>
    %479 = arith.addf %478, %477 : vector<4x256xf32>
    %480 = arith.mulf %469, %479 : vector<4x256xf32>
    %c0_217 = arith.constant 0 : index
    %c0_218 = arith.constant 0 : index
    %481 = vector.load %arg6[%c0_217, %c0_218] : memref<8x4xbf16, #tpu.memory_space<vmem>>, vector<8x4xbf16>
    %482 = arith.truncf %480 : vector<4x256xf32> to vector<4x256xbf16>
    %cst_219 = arith.constant dense<0.000000e+00> : vector<8x256xf32>
    %483 = tpu.matmul %481, %482, %cst_219 {dimension_numbers = #tpu.dot_dimension_numbers<[1], [0], [0], [1], [0, 0, 1, 1], [], []>} : vector<8x4xbf16>, vector<4x256xbf16>, vector<8x256xf32> -> vector<8x256xf32>
    %484 = vector.broadcast %5 : vector<8x1xf32> to vector<8x256xf32>
    %485 = arith.addf %483, %484 : vector<8x256xf32>
    %c0_220 = arith.constant 0 : index
    %c0_221 = arith.constant 0 : index
    %c0_222 = arith.constant 0 : index
    %486 = vector.load %arg8[%c0_220, %c0_221, %c0_222] : memref<1x8x256xf32, #tpu.memory_space<vmem>>, vector<1x8x256xf32>
    %487 = vector.shape_cast %486 : vector<1x8x256xf32> to vector<8x256xf32>
    %488 = vector.shape_cast %485 : vector<8x256xf32> to vector<1x8x256xf32>
    tpu.vector_store %arg8[%c0_220, %c0_221, %c0_222], %488 {strides = array<i32>} : memref<1x8x256xf32, #tpu.memory_space<vmem>>, vector<1x8x256xf32>,
    return
  }
  func.func @transform_0(%arg0: i32) -> (i32, i32, i32) {
    %c0_i32 = arith.constant 0 : i32
    %c0_i32_0 = arith.constant 0 : i32
    %c0_i32_1 = arith.constant 0 : i32
    return %arg0, %c0_i32, %c0_i32_0 : i32, i32, i32
  }
  func.func @transform_1(%arg0: i32) -> (i32, i32, i32) {
    %c0_i32 = arith.constant 0 : i32
    %c0_i32_0 = arith.constant 0 : i32
    %c0_i32_1 = arith.constant 0 : i32
    %c0_i32_2 = arith.constant 0 : i32
    return %c0_i32, %c0_i32_0, %c0_i32_1 : i32, i32, i32
  }
  func.func @transform_2(%arg0: i32) -> (i32, i32) {
    %c0_i32 = arith.constant 0 : i32
    %c0_i32_0 = arith.constant 0 : i32
    %c0_i32_1 = arith.constant 0 : i32
    return %c0_i32, %c0_i32_0 : i32, i32
  }
  func.func @transform_3(%arg0: i32) -> (i32, i32) {
    %c0_i32 = arith.constant 0 : i32
    %c0_i32_0 = arith.constant 0 : i32
    %c0_i32_1 = arith.constant 0 : i32
    return %c0_i32, %c0_i32_0 : i32, i32
  }
  func.func @transform_4(%arg0: i32) -> (i32, i32) {
    %c0_i32 = arith.constant 0 : i32
    %c0_i32_0 = arith.constant 0 : i32
    %c0_i32_1 = arith.constant 0 : i32
    return %c0_i32, %c0_i32_0 : i32, i32
  }
  func.func @transform_5(%arg0: i32) -> (i32, i32) {
    %c0_i32 = arith.constant 0 : i32
    %c0_i32_0 = arith.constant 0 : i32
    %c0_i32_1 = arith.constant 0 : i32
    return %c0_i32, %c0_i32_0 : i32, i32
  }
  func.func @transform_6(%arg0: i32) -> (i32, i32) {
    %c0_i32 = arith.constant 0 : i32
    %c0_i32_0 = arith.constant 0 : i32
    %c0_i32_1 = arith.constant 0 : i32
    return %c0_i32, %c0_i32_0 : i32, i32
  }
  func.func @transform_7(%arg0: i32) -> (i32, i32, i32) {
    %c0_i32 = arith.constant 0 : i32
    %c0_i32_0 = arith.constant 0 : i32
    %c0_i32_1 = arith.constant 0 : i32
    return %arg0, %c0_i32, %c0_i32_0 : i32, i32, i32
  }
}

</mosaic_0001>

<bundles_post_ra>
// kernel: convnext_block.1
= control target key start
LH: loop header
LB: loop body
LE: loop exit
PB: predicated region body
PF: predicated region fallthrough
CT: control target
= control target key end

     0   :  { %s3476_s24 = smov 0   ;;  %s5247_s0 = inlined_call_operand.vmem [shape: f32[2,4,358], index: 0, kind: input, shape index: {}]   ;;  %s5248_s1 = inlined_call_operand.vmem [shape: f32[49,1,256], index: 1, kind: input, shape index: {}]   ;;  %s5249_s2 = inlined_call_operand.vmem [shape: f32[4,49], index: 2, kind: input, shape index: {}]   ;;  %s5250_s3 = inlined_call_operand.vmem [shape: bf16[16,4], index: 3, kind: input, shape index: {}]   ;;  %s5251_s4 = inlined_call_operand.vmem [shape: bf16[4,16], index: 4, kind: input, shape index: {}]   ;;  %s5252_s5 = inlined_call_operand.vmem [shape: bf16[8,4], index: 5, kind: input, shape index: {}]   ;;  %s5253_s6 = inlined_call_operand.vmem [shape: f32[16,4], index: 6, kind: input, shape index: {}]   ;;  %s5254_s7 = inlined_call_operand.vmem [shape: f32[2,8,256], index: 7, kind: output, shape index: {}]  }
   0x1 LB: > { %s3037_s25 = sadd.s32 4294967295, %s3311_s24   ;;  %p3041_p0 = scmp.ge.s32.totalorder %s3311_s24, 1  ;;  %s3311_s24 = sphi %s3476_s24, %s17_s24  }
   0x2   : > { %p237_p1 = scmp.lt.s32.totalorder %s3311_s24, 3 }
   0x4   : > { %p238_p2 = pnand %p3041_p0, %p237_p1 }
   0x5   : > { %s5258_s21 = smov (!%p238_p2), 1   ;;  %s3319_s26 = smov (!%p238_p2), 2  }
   0x6   : > { %241 = sbr.rel (%p238_p2) target bundleno = 1603 (0x643), region = 48  ;;  %s3320_s27 = smov (!%p238_p2), 4  }
   0x7   : > { %s3321_s30 = smov (!%p238_p2), 3   ;;  %s3322_s10 = smov (!%p238_p2), 5  }
   0x8   : > { %s3323_s13 = smov (!%p238_p2), 6   ;;  %s3326_s18 = smov (!%p238_p2), 16  }
   0x9   : > { %s5255_s15 = smov (!%p238_p2), 19   ;;  %s3333_s19 = smov (!%p238_p2), 20  }
   0xa   : > { %s3335_s29 = smov (!%p238_p2), 21   ;;  %s3339_s20 = smov (!%p238_p2), 32  }
   0xb   : > { %v408_v0 = vld [vmem:[%s5249_s2] sm:$0xf]  ;;  %v293_v2 = vlaneseq  ;;  %v5266_v3 = vmov 2   ;;  %v5269_v4 = vmov 0   ;;  %v3046_v7 = vld [vmem:[%s5248_s1 + $0x4] sm:$0x3] }
   0xc   : > { %v313_v1 = vld [vmem:[%s5249_s2] sm:$0xf]  ;;  %3235 = vset.pattern.permute.xlu1 %v5266_v3  ;;  %3233 = vset.pattern.permute.xlu0 %v5269_v4  ;;  %v3048_v11 = vld [vmem:[%s5248_s1 + $0x8] sm:$0x3]  ;;  %v5268_v12 = vmov 1   ;;  %v3316_v21 = vmov 4  }
   0xd   : > { %411 = vperm.xlu1 %3235, %v408_v0   ;;  %316 = vperm.xlu0 %3233, %v313_v1   ;;  %v3492_v5 = vshrl.u32 %v293_v2, 7  ;;  %v3045_v6 = vld [vmem:[%s5248_s1 + $0x2] sm:$0x3]  ;;  %v3047_v17 = vld [vmem:[%s5248_s1 + $0x6] sm:$0x3]  ;;  %v3318_v27 = vmov 3  }
   0xe   : > { %2781 = vmatprep.mubr.bf16.mxu0 %v5269_v4  ;;  %2870 = vmatprep.mubr.bf16.mxu1 %v5269_v4  ;;  %v358_v8 = vld [vmem:[%s5249_s2] sm:$0xf]  ;;  %v3049_v23 = vld [vmem:[%s5248_s1 + $0xa] sm:$0x3]  ;;  %v3050_v31 = vld [vmem:[%s5248_s1 + $0xc] sm:$0x3] }
   0xf   : > { %v3506_v9 = vsub.s32 0, %v3492_v5  ;;  %v3509_v10 = vsub.s32 1, %v3492_v5  ;;  %v458_v22 = vld [vmem:[%s5249_s2] sm:$0xf]  ;;  %v3051_v36 = vld [vmem:[%s5248_s1 + $0xe] sm:$0x3] }
  0x10   : > { %v508_v37 = vld [vmem:[%s5249_s2] sm:$0xf]  ;;  %v3052_v41 = vld [vmem:[%s5248_s1 + $0x10] sm:$0x3]  ;;  %v3053_v46 = vld [vmem:[%s5248_s1 + $0x12] sm:$0x3] }
  0x11   : > { %3234 = vset.pattern.permute.xlu0 %v5268_v12  ;;  %v343_v13 = vrot.slane %v3045_v6, %v3506_v9  ;;  %v347_v14 = vrot.slane %v3045_v6, %v3509_v10  ;;  %v393_v15 = vrot.slane %v3046_v7, %v3506_v9  ;;  %v397_v16 = vrot.slane %v3046_v7, %v3509_v10  ;;  %v558_v42 = vld [vmem:[%s5249_s2] sm:$0xf]  ;;  %v3054_v53 = vld [vmem:[%s5248_s1 + $0x14] sm:$0x3]  ;;  %v3055_v58 = vld [vmem:[%s5248_s1 + $0x16] sm:$0x3] }
  0x12   : > { %361 = vperm.xlu0 %3234, %v358_v8   ;;  %v493_v19 = vrot.slane %v3048_v11, %v3506_v9  ;;  %v497_v20 = vrot.slane %v3048_v11, %v3509_v10  ;;  %3237 = vset.pattern.permute.xlu1 %v3316_v21  ;;  %v443_v25 = vrot.slane %v3047_v17, %v3506_v9  ;;  %v3324_v47 = vmov 5   ;;  %v608_v52 = vld [vmem:[%s5249_s2] sm:$0xf]  ;;  %v3056_v0 = vld [vmem:[%s5248_s1 + $0x18] sm:$0x3]  ;;  %s3340_s8 = smov 33  }
  0x13   : > { %v348_v18 = vcombine.low %v343_v13, %v347_v14  ;;  %v398_v24 = vcombine.low %v393_v15, %v397_v16  ;;  %v447_v26 = vrot.slane %v3047_v17, %v3509_v10  ;;  %v543_v29 = vrot.slane %v3049_v23, %v3506_v9  ;;  %v658_v59 = vld [vmem:[%s5249_s2] sm:$0xf]  ;;  %v3057_v11 = vld [vmem:[%s5248_s1 + $0x1a] sm:$0x3]  ;;  %v3058_v17 = vld [vmem:[%s5248_s1 + $0x1c] sm:$0x3] }
  0x14   : > { %v498_v28 = vcombine.low %v493_v19, %v497_v20  ;;  %v547_v30 = vrot.slane %v3049_v23, %v3509_v10  ;;  %v593_v34 = vrot.slane %v3050_v31, %v3506_v9  ;;  %v597_v35 = vrot.slane %v3050_v31, %v3509_v10  ;;  %v708_v1 = vld [vmem:[%s5249_s2] sm:$0xf]  ;;  %v3059_v23 = vld [vmem:[%s5248_s1 + $0x1e] sm:$0x3]  ;;  %s3342_s12 = smov 34   ;;  %s3346_s9 = smov 36  }
  0x15   : > { %349 = vrot.lane.b32.xlu1 %v348_v18, %s5258_s21  ;;  %v448_v32 = vcombine.low %v443_v25, %v447_v26  ;;  %v643_v39 = vrot.slane %v3051_v36, %v3506_v9  ;;  %v647_v40 = vrot.slane %v3051_v36, %v3509_v10  ;;  %v693_v44 = vrot.slane %v3052_v41, %v3506_v9  ;;  %v758_v13 = vld [vmem:[%s5249_s2] sm:$0xf]  ;;  %s3348_s17 = smov 37   ;;  %s3351_s11 = smov 48  }
  0x16   : > { %3236 = vset.pattern.permute.xlu0 %v3318_v27  ;;  %v548_v33 = vcombine.low %v543_v29, %v547_v30  ;;  %v598_v38 = vcombine.low %v593_v34, %v597_v35  ;;  %v697_v45 = vrot.slane %v3052_v41, %v3509_v10  ;;  %v3325_v48 = vmov 25   ;;  %v3060_v29 = vld [vmem:[%s5248_s1 + $0x20] sm:$0x3]  ;;  %v3061_v35 = vld [vmem:[%s5248_s1 + $0x22] sm:$0x3]  ;;  %s3353_s16 = smov 49  }
  0x17   : > { %461 = vperm.xlu0 %3236, %v458_v22   ;;  %v648_v43 = vcombine.low %v643_v39, %v647_v40  ;;  %v743_v50 = vrot.slane %v3053_v46, %v3506_v9  ;;  %v747_v51 = vrot.slane %v3053_v46, %v3509_v10  ;;  %v3327_v54 = vmov 6   ;;  %v808_v22 = vld [vmem:[%s5249_s2] sm:$0xf]  ;;  %v3062_v41 = vld [vmem:[%s5248_s1 + $0x24] sm:$0x3]  ;;  %p269_p3 = scmp.lt.s32.totalorder %s3037_s25, 1 }
  0x18   : > { %v698_v49 = vcombine.low %v693_v44, %v697_v45  ;;  %v793_v56 = vrot.slane %v3054_v53, %v3506_v9  ;;  %v797_v57 = vrot.slane %v3054_v53, %v3509_v10  ;;  %v3329_v60 = vmov 7   ;;  %v858_v30 = vld [vmem:[%s5249_s2] sm:$0xf]  ;;  %v3063_v46 = vld [vmem:[%s5248_s1 + $0x26] sm:$0x3]  ;;  %s3364_s14 = smov 66  }
  0x19   : > { %399 = vrot.lane.b32.xlu1 %v398_v24, %s3319_s26  ;;  %v748_v55 = vcombine.low %v743_v50, %v747_v51  ;;  %v843_v62 = vrot.slane %v3055_v58, %v3506_v9  ;;  %v847_v63 = vrot.slane %v3055_v58, %v3509_v10  ;;  %v893_v6 = vrot.slane %v3056_v0, %v3506_v9  ;;  %v908_v36 = vld [vmem:[%s5249_s2] sm:$0xf]  ;;  %s5344_s25 = smov (!%p269_p3, %s3037_s25), 1  ;;  %s5264_s21 = smov 82  }
  0x1a   : > { %v798_v61 = vcombine.low %v793_v56, %v797_v57  ;;  %v897_v7 = vrot.slane %v3056_v0, %v3509_v10  ;;  %v3332_v8 = vmov 8   ;;  %v943_v15 = vrot.slane %v3057_v11, %v3506_v9  ;;  %v1007_v51 = vld [vmem:[%s5249_s2] sm:$0xf]  ;;  %v3065_v57 = vld [vmem:[%s5248_s1 + $0x2a] sm:$0x3]  ;;  %s3382_s23 = smov 83  }
  0x1b   : > { %499 = vrot.lane.b32.xlu0 %v498_v28, %s3320_s27  ;;  %s3328_s27 = smov 17   ;;  %v848_v2 = vcombine.low %v843_v62, %v847_v63  ;;  %v947_v16 = vrot.slane %v3057_v11, %v3509_v10  ;;  %v3334_v18 = vmov 9   ;;  %v993_v20 = vrot.slane %v3058_v17, %v3506_v9  ;;  %v1055_v58 = vld [vmem:[%s5249_s2] sm:$0xf]  ;;  %v3066_v63 = vld [vmem:[%s5248_s1 + $0x2c] sm:$0x3] }
  0x1c   : > { %3257 = vset.pattern.permute.xlu0 %v3325_v48  ;;  %v898_v14 = vcombine.low %v893_v6, %v897_v7  ;;  %v997_v21 = vrot.slane %v3058_v17, %v3509_v10  ;;  %v3336_v24 = vmov 10   ;;  %v1041_v26 = vrot.slane %v3059_v23, %v3506_v9  ;;  %v1103_v0 = vld [vmem:[%s5249_s2] sm:$0xf]  ;;  %s5260_s22 = smov 80  }
  0x1d   : > { %449 = vrot.lane.b32.xlu1 %v448_v32, %s3321_s30  ;;  %v948_v19 = vcombine.low %v943_v15, %v947_v16  ;;  %v1045_v28 = vrot.slane %v3059_v23, %v3509_v10  ;;  %v3338_v31 = vmov 11   ;;  %v1093_v34 = vrot.slane %v3060_v29, %v3509_v10  ;;  %v1494_v15 = vld [vmem:[%s5249_s2] sm:$0xf]  ;;  %v3070_v16 = vld [vmem:[%s5248_s1 + $0x36] sm:$0x3] }
  0x1e   : > { %v998_v25 = vcombine.low %v993_v20, %v997_v21  ;;  %v1141_v39 = vrot.slane %v3061_v35, %v3509_v10  ;;  %v3341_v40 = vmov 12   ;;  %v1185_v44 = vrot.slane %v3062_v41, %v3506_v9  ;;  %v1250_v20 = vld [vmem:[%s5249_s2] sm:$0xf] }
  0x1f   : > { %549 = vrot.lane.b32.xlu0 %v548_v33, %s3322_s10  ;;  %s3330_s10 = smov 18   ;;  %v1046_v32 = vcombine.low %v1041_v26, %v1045_v28  ;;  %v1089_v33 = vrot.slane %v3060_v29, %v3506_v9  ;;  %v1189_v45 = vrot.slane %v3062_v41, %v3509_v10  ;;  %v1239_v50 = vrot.slane %v3063_v46, %v3509_v10  ;;  %v1546_v21 = vld [vmem:[%s5249_s2] sm:$0xf]  ;;  %v3072_v29 = vld [vmem:[%s5248_s1 + $0x3a] sm:$0x3] }
  0x20   : > { %v3345_v53 = vmov 14   ;;  %v1339_v62 = vrot.slane %v3065_v57, %v3509_v10  ;;  %v1387_v6 = vrot.slane %v3066_v63, %v3509_v10  ;;  %v3350_v7 = vmov 16  }
  0x21   : > { %511 = vperm.xlu1 %3237, %v508_v37   ;;  %v1094_v37 = vcombine.low %v1089_v33, %v1093_v34  ;;  %v1190_v48 = vcombine.low %v1185_v44, %v1189_v45  ;;  %v3354_v17 = vmov 18   ;;  %v3355_v23 = vmov 19   ;;  %v3067_v44 = vld [vmem:[%s5248_s1 + $0x2e] sm:$0x3]  ;;  %v3075_v45 = vld [vmem:[%s5248_s1 + $0x40] sm:$0x3] }
  0x22   : > { %v1684_v33 = vrot.slane %v3072_v29, %v3506_v9  ;;  %v1688_v34 = vrot.slane %v3072_v29, %v3509_v10  ;;  %v3361_v41 = vmov 21   ;;  %v2005_v29 = vld [vmem:[%s5249_s2] sm:$0xf]  ;;  %vm5286_vm0 = vcmask 7168  }
  0x23   : > { %599 = vrot.lane.b32.xlu0 %v598_v38, %s3323_s13  ;;  %s3337_s13 = smov 22   ;;  %v1137_v38 = vrot.slane %v3061_v35, %v3506_v9  ;;  %v3073_v35 = vld [vmem:[%s5248_s1 + $0x3c] sm:$0x3]  ;;  %vm5290_vm1 = vcmask 15360   ;;  %vm5294_vm2 = vcmask 23552   ;;  %vm5284_vm3 = vcmask 31744  }
  0x24   : > { %vm552_vm4 = vcmask 39936   ;;  %vm602_vm5 = vcmask 48128   ;;  %vm5296_vm6 = vcmask 130048   ;;  %vm5297_vm7 = vcmask 138240  }
  0x25   : > { %3238 = vset.pattern.permute.xlu1 %v3324_v47  ;;  %v3343_v47 = vmov 13   ;;  %vm780_vm8 = vcmask 269312   ;;  %vm730_vm9 = vcmask 277504   ;;  %vm752_vm10 = vcmask 146432  }
  0x26   : > { %561 = vperm.xlu1 %3238, %v558_v42   ;;  %v958_v42 = vld [vmem:[%s5249_s2] sm:$0xf]  ;;  %vm680_vm11 = vcmask 285696   ;;  %vm1194_vm12 = vcmask 293888   ;;  %vm802_vm13 = vcmask 154624   ;;  %vm1244_vm14 = vcmask 302080  }
  0x27   : > { %649 = vrot.lane.b32.xlu0 %v648_v43, %s3326_s18  ;;  %v1142_v43 = vcombine.low %v1137_v38, %v1141_v39  ;;  %v1689_v38 = vcombine.low %v1684_v33, %v1688_v34  ;;  %v1735_v39 = vrot.slane %v3073_v35, %v3506_v9  ;;  %v2056_v33 = vld [vmem:[%s5249_s2] sm:$0xf]  ;;  %v3375_v34 = vmov 28  }
  0x28   : > { %vm1294_vm15 = vcmask 310272  }
  0x2a   : > { %3239 = vset.pattern.permute.xlu1 %v3327_v54 }
  0x2b   : > { %611 = vperm.xlu1 %3239, %v608_v52   ;;  %699 = vrot.lane.b32.xlu0 %v698_v49, %s3328_s27  ;;  %v1235_v49 = vrot.slane %v3063_v46, %v3506_v9  ;;  %v3064_v52 = vld [vmem:[%s5248_s1 + $0x28] sm:$0x3]  ;;  %v3363_v46 = vmov 22  }
  0x2c   : > { %v1289_v56 = vrot.slane %v3064_v52, %v3509_v10 }
  0x2d   : > { %v1240_v54 = vcombine.low %v1235_v49, %v1239_v50  ;;  %v300_v49 = vld [vmem:[%s5248_s1] sm:$0x3] }
  0x2e   : > { %v1445_v50 = vld [vmem:[%s5249_s2] sm:$0xf] }
  0x2f   : > { %3240 = vset.pattern.permute.xlu1 %v3329_v60  ;;  %749 = vrot.lane.b32.xlu0 %v748_v55, %s3330_s10  ;;  %v1285_v55 = vrot.slane %v3064_v52, %v3506_v9  ;;  %v1841_v52 = vrot.slane %v3075_v45, %v3509_v10 }
  0x30   : > { %661 = vperm.xlu1 %3240, %v658_v59   ;;  %v3347_v59 = vmov 15  }
  0x31   : > { %v1290_v60 = vcombine.low %v1285_v55, %v1289_v56  ;;  %v285_v56 = vld [vmem:[%s5249_s2] sm:$0xf] }
  0x33   : > { %799 = vrot.lane.b32.xlu0 %v798_v61, %s5255_s15  ;;  %v1335_v61 = vrot.slane %v3065_v57, %v3506_v9  ;;  %v3076_v57 = vld [vmem:[%s5248_s1 + $0x42] sm:$0x3]  ;;  %s3373_s15 = smov 53  }
  0x34   : > { %3241 = vset.pattern.permute.xlu1 %v3332_v8  ;;  %v1151_v8 = vld [vmem:[%s5249_s2] sm:$0xf] }
  0x35   : > { %711 = vperm.xlu1 %3241, %v708_v1   ;;  %v1340_v1 = vcombine.low %v1335_v61, %v1339_v62  ;;  %v309_v61 = vrot.slane %v300_v49, %v3509_v10 }
  0x37   : > { %849 = vrot.lane.b32.xlu0 %v848_v2, %s3333_s19  ;;  %s3344_s19 = smov 35   ;;  %v1383_v2 = vrot.slane %v3066_v63, %v3506_v9 }
  0x39   : > { %3242 = vset.pattern.permute.xlu1 %v3334_v18  ;;  %v1388_v11 = vcombine.low %v1383_v2, %v1387_v6  ;;  %v1582_v18 = vrot.slane %v3070_v16, %v3506_v9  ;;  %v1892_v2 = vrot.slane %v3076_v57, %v3509_v10  ;;  %v3069_v6 = vld [vmem:[%s5248_s1 + $0x34] sm:$0x3] }
  0x3a   : > { %761 = vperm.xlu1 %3242, %v758_v13   ;;  %v3352_v13 = vmov 17  }
  0x3b   : > { %899 = vrot.lane.b32.xlu0 %v898_v14, %s3335_s29  ;;  %v1200_v14 = vld [vmem:[%s5249_s2] sm:$0xf]  ;;  %s3367_s29 = smov 50  }
  0x3e   : > { %3243 = vset.pattern.permute.xlu1 %v3336_v24  ;;  %v3356_v24 = vmov 26  }
  0x3f   : > { %811 = vperm.xlu1 %3243, %v808_v22   ;;  %949 = vrot.lane.b32.xlu0 %v948_v19, %s3337_s13  ;;  %v1586_v19 = vrot.slane %v3070_v16, %v3509_v10  ;;  %v3071_v22 = vld [vmem:[%s5248_s1 + $0x38] sm:$0x3]  ;;  %s3362_s13 = smov 65   ;;  %v1535_v16 = vrot.slane %v3069_v6, %v3509_v10 }
  0x40   : > { %v1633_v26 = vrot.slane %v3071_v22, %v3506_v9  ;;  %v1637_v28 = vrot.slane %v3071_v22, %v3509_v10 }
  0x43   : > { %3244 = vset.pattern.permute.xlu1 %v3338_v31  ;;  %999 = vrot.lane.b32.xlu0 %v998_v25, %s3339_s20  ;;  %v1587_v25 = vcombine.low %v1582_v18, %v1586_v19  ;;  %v3357_v31 = vmov 20   ;;  %v3369_v18 = vmov 27   ;;  %v3370_v19 = vmov 35  }
  0x44   : > { %861 = vperm.xlu1 %3244, %v858_v30   ;;  %v1300_v30 = vld [vmem:[%s5249_s2] sm:$0xf] }
  0x47   : > { %1047 = vrot.lane.b32.xlu0 %v1046_v32, %s3340_s8  ;;  %v1638_v32 = vcombine.low %v1633_v26, %v1637_v28  ;;  %v1597_v26 = vld [vmem:[%s5249_s2] sm:$0xf] }
  0x48   : > { %3245 = vset.pattern.permute.xlu1 %v3341_v40  ;;  %v1739_v40 = vrot.slane %v3073_v35, %v3509_v10  ;;  %v3080_v35 = vld [vmem:[%s5248_s1 + $0x4a] sm:$0x3] }
  0x49   : > { %911 = vperm.xlu1 %3245, %v908_v36   ;;  %v3359_v36 = vmov 24  }
  0x4b   : > { %1095 = vrot.lane.b32.xlu0 %v1094_v37, %s3342_s12  ;;  %v1349_v37 = vld [vmem:[%s5249_s2] sm:$0xf] }
  0x4d   : > { %3246 = vset.pattern.permute.xlu1 %v3343_v47  ;;  %v1431_v47 = vrot.slane %v3067_v44, %v3506_v9 }
  0x4e   : > { %961 = vperm.xlu1 %3246, %v958_v42   ;;  %v1397_v42 = vld [vmem:[%s5249_s2] sm:$0xf] }
  0x4f   : > { %1143 = vrot.lane.b32.xlu0 %v1142_v43, %s3344_s19  ;;  %v1740_v43 = vcombine.low %v1735_v39, %v1739_v40  ;;  %v2092_v39 = vrot.slane %v3080_v35, %v3506_v9  ;;  %v2096_v40 = vrot.slane %v3080_v35, %v3509_v10 }
  0x52   : > { %3247 = vset.pattern.permute.xlu1 %v3345_v53  ;;  %v3068_v53 = vld [vmem:[%s5248_s1 + $0x32] sm:$0x3] }
  0x53   : > { %1010 = vperm.xlu1 %3247, %v1007_v51   ;;  %1191 = vrot.lane.b32.xlu0 %v1190_v48, %s3346_s9  ;;  %s3349_s9 = smov 38   ;;  %v1435_v48 = vrot.slane %v3067_v44, %v3509_v10  ;;  %v1837_v51 = vrot.slane %v3075_v45, %v3506_v9  ;;  %v1479_v62 = vrot.slane %v3068_v53, %v3506_v9  ;;  %v3377_v44 = vmov 29  }
  0x54   : > { %v1483_v63 = vrot.slane %v3068_v53, %v3509_v10  ;;  %v3378_v45 = vmov 37   ;;  %v3074_v53 = vld [vmem:[%s5248_s1 + $0x3e] sm:$0x3] }
  0x57   : > { %3248 = vset.pattern.permute.xlu1 %v3347_v59  ;;  %1241 = vrot.lane.b32.xlu0 %v1240_v54, %s3348_s17  ;;  %s3358_s17 = smov 54   ;;  %v3365_v54 = vmov 839922192   ;;  %v3366_v59 = vmov 23  }
  0x58   : > { %1058 = vperm.xlu1 %3248, %v1055_v58   ;;  %v291_v55 = vunpack.c.l.s4 %v3365_v54  ;;  %v305_v58 = vrot.slane %v300_v49, %v3506_v9  ;;  %v3379_v54 = vmov 30  }
  0x5b   : > { %1291 = vrot.lane.b32.xlu0 %v1290_v60, %s3349_s9  ;;  %s3360_s9 = smov 64   ;;  %v1436_v60 = vcombine.low %v1431_v47, %v1435_v48  ;;  %v2097_v47 = vcombine.low %v2092_v39, %v2096_v40  ;;  %v3386_v39 = vmov 33  }
  0x5c   : > { %3249 = vset.pattern.permute.xlu1 %v3350_v7  ;;  %v292_v7 = vunpack.c.0.s8 %v291_v55 }
  0x5d   : > { %1106 = vperm.xlu1 %3249, %v1103_v0   ;;  %v1842_v0 = vcombine.low %v1837_v51, %v1841_v52  ;;  %v3081_v51 = vld [vmem:[%s5248_s1 + $0x4c] sm:$0x3] }
  0x5f   : > { %1341 = vrot.lane.b32.xlu0 %v1340_v1, %s3351_s11  ;;  %v1888_v1 = vrot.slane %v3076_v57, %v3506_v9  ;;  %v2143_v57 = vrot.slane %v3081_v51, %v3506_v9 }
  0x61   : > { %3250 = vset.pattern.permute.xlu1 %v3352_v13 }
  0x62   : > { %1154 = vperm.xlu1 %3250, %v1151_v8   ;;  %v310_v8 = vcombine.low %v305_v58, %v309_v61  ;;  %v2147_v58 = vrot.slane %v3081_v51, %v3509_v10  ;;  %v1954_v51 = vld [vmem:[%s5249_s2] sm:$0xf] }
  0x63   : > { %1389 = vrot.lane.b32.xlu0 %v1388_v11, %s3353_s16  ;;  %v1531_v11 = vrot.slane %v3069_v6, %v3506_v9 }
  0x64   : > { %v2148_v6 = vcombine.low %v2143_v57, %v2147_v58 }
  0x66   : > { %3251 = vset.pattern.permute.xlu1 %v3354_v17  ;;  %v3769_v17 = vsub.s32 %v292_v7, %v3492_v5 }
  0x67   : > { %1203 = vperm.xlu1 %3251, %v1200_v14   ;;  %1497 = vperm.xlu0 %3257, %v1494_v15   ;;  %v1484_v14 = vcombine.low %v1479_v62, %v1483_v63  ;;  %v1893_v15 = vcombine.low %v1888_v1, %v1892_v2  ;;  %v3381_v2 = vmov 31  }
  0x6b   : > { %3252 = vset.pattern.permute.xlu1 %v3355_v23  ;;  %3258 = vset.pattern.permute.xlu0 %v3356_v24  ;;  %v1536_v23 = vcombine.low %v1531_v11, %v1535_v16 }
  0x6c   : > { %1253 = vperm.xlu1 %3252, %v1250_v20   ;;  %1549 = vperm.xlu0 %3258, %v1546_v21  }
  0x70   : > { %3253 = vset.pattern.permute.xlu1 %v3357_v31  ;;  %1588 = vrot.lane.b32.xlu0 %v1587_v25, %s3358_s17  ;;  %s5257_s17 = smov 51  }
  0x71   : > { %1303 = vperm.xlu1 %3253, %v1300_v30   ;;  %3264 = vset.pattern.permute.xlu0 %v3359_v36  ;;  %v3376_v36 = vmov 36  }
  0x74   : > { %1639 = vrot.lane.b32.xlu0 %v1638_v32, %s3360_s9  ;;  %s3101_s9 = smul.u32 12, %s5344_s25  ;;  %v1648_v32 = vld [vmem:[%s5249_s2] sm:$0xf] }
  0x75   : > { %3254 = vset.pattern.permute.xlu1 %v3361_v41 }
  0x76   : > { %1352 = vperm.xlu1 %3254, %v1349_v37   ;;  %s3760_s28 = scalar_lea.vmem %s5247_s0, %s3101_s9  ;;  %s3371_s9 = smov 52  }
  0x77   : > { %v3765_v13 = vld [vmem:[%s3760_s28] sm:$0xff]  ;;  %v3811_v48 = vld [vmem:[%s3760_s28 + $0x8] sm:$0xf] }
  0x78   : > { %1690 = vrot.lane.b32.xlu0 %v1689_v38, %s3362_s13  ;;  %s3368_s13 = smov 68   ;;  %v312_v20 = vmul.f32 %v310_v8, %v3765_v13  ;;  %v1699_v38 = vld [vmem:[%s5249_s2] sm:$0xf]  ;;  %v3082_v8 = vld [vmem:[%s5248_s1 + $0x4e] sm:$0x3] }
  0x7a   : > { %3255 = vset.pattern.permute.xlu1 %v3363_v46 }
  0x7b   : > { %1400 = vperm.xlu1 %3255, %v1397_v42   ;;  %v2107_v42 = vld [vmem:[%s5249_s2] sm:$0xf] }
  0x7c   : > { %1741 = vrot.lane.b32.xlu0 %v1740_v43, %s3364_s14  ;;  %s3372_s14 = smov 69  }
  0x7f   : > { %3256 = vset.pattern.permute.xlu1 %v3366_v59  ;;  %v1786_v59 = vrot.slane %v3074_v53, %v3506_v9 }
  0x80   : > { %1448 = vperm.xlu1 %3256, %v1445_v50   ;;  %288 = vperm.xlu0 %3264, %v285_v56   ;;  %v1750_v50 = vld [vmem:[%s5249_s2] sm:$0xf] }
  0x84   : > { %1437 = vrot.lane.b32.xlu1 %v1436_v60, %s3367_s29  ;;  %1843 = vrot.lane.b32.xlu0 %v1842_v0, %s3368_s13  ;;  %v1790_v60 = vrot.slane %v3074_v53, %v3509_v10  ;;  %v1801_v0 = vld [vmem:[%s5249_s2] sm:$0xf]  ;;  %s3383_s13 = smov 67   ;;  %v3084_v53 = vld [vmem:[%s5248_s1 + $0x52] sm:$0x3] }
  0x85   : > { %3259 = vset.pattern.permute.xlu1 %v3369_v18  ;;  %3268 = vset.pattern.permute.xlu0 %v3370_v19  ;;  %v2194_v18 = vrot.slane %v3082_v8, %v3506_v9  ;;  %v2198_v19 = vrot.slane %v3082_v8, %v3509_v10 }
  0x86   : > { %v1791_v7 = vcombine.low %v1786_v59, %v1790_v60  ;;  %v3388_v59 = vmov 34  }
  0x88   : > { %v412_v21 = vpop.permute.xlu1 %411  ;;  %v317_v22 = vpop.permute.xlu0 %316  ;;  %1485 = vrot.lane.b32.xlu1 %v1484_v14, %s3371_s9  ;;  %1894 = vrot.lane.b32.xlu0 %v1893_v15, %s3372_s14  ;;  %s3385_s9 = smov 84   ;;  %s3389_s14 = smov 85  }
  0x89   : > { %v324_v24 = vrot.slane %v317_v22, %v3769_v17  ;;  %v3828_v56 = vrot.slane %v412_v21, %v3769_v17  ;;  %v3384_v22 = vmov 32  }
  0x8b   : > { %v326_v25 = vmul.f32 %v324_v24, %v312_v20 }
  0x8c   : > { %1537 = vrot.lane.b32.xlu1 %v1536_v23, %s3373_s15  ;;  %v3773_v5 = vpop.permute.xlu1 %349  ;;  %v1852_v23 = vld [vmem:[%s5249_s2] sm:$0xf]  ;;  %s3387_s15 = smov 47  }
  0x8d   : > { %328 = vrot.lane.b32.xlu0 %v326_v25, %s5257_s17  ;;  %v3779_v28 = vpop.permute.xlu0 %361  ;;  %s3391_s17 = smov 46  }
  0x8e   : > { %v3927_v8 = vrot.slane %v3779_v28, %v3769_v17 }
  0x90   : > { %1600 = vperm.xlu1 %3259, %v1597_v26   ;;  %v3784_v30 = vpop.permute.xlu1 %399  ;;  %v2199_v26 = vcombine.low %v2194_v18, %v2198_v19 }
  0x91   : > { %2008 = vperm.xlu0 %3268, %v2005_v29   ;;  %v401_v43 = vrot.slane %v3784_v30, 4  ;;  %v3083_v29 = vld [vmem:[%s5248_s1 + $0x50] sm:$0x3] }
  0x92   : > { %v462_v31 = vpop.permute.xlu0 %461  ;;  %v2245_v35 = vrot.slane %v3083_v29, %v3506_v9 }
  0x93   : > { %v407_v52 = vmul.f32 %v401_v43, %v3811_v48  ;;  %v3851_v14 = vrot.slane %v462_v31, %v3769_v17 }
  0x94   : > { %3260 = vset.pattern.permute.xlu1 %v3375_v34  ;;  %v3802_v41 = vpop.permute.xlu1 %449 }
  0x95   : > { %1651 = vperm.xlu1 %3260, %v1648_v32   ;;  %3269 = vset.pattern.permute.xlu0 %v3376_v36  ;;  %v451_v61 = vrot.slane %v3802_v41, 4  ;;  %v422_v63 = vmul.f32 %v3828_v56, %v407_v52  ;;  %v2249_v36 = vrot.slane %v3083_v29, %v3509_v10 }
  0x96   : > { %2059 = vperm.xlu0 %3269, %v2056_v33   ;;  %v3795_v37 = vpop.permute.xlu0 %499  ;;  %v1903_v33 = vld [vmem:[%s5249_s2] sm:$0xf] }
  0x97   : > { %v457_v11 = vmul.f32 %v451_v61, %v3811_v48  ;;  %v501_v21 = vrot.slane %v3795_v37, 4  ;;  %v2250_v52 = vcombine.low %v2245_v35, %v2249_v36 }
  0x99   : > { %3261 = vset.pattern.permute.xlu1 %v3377_v44  ;;  %v472_v20 = vmul.f32 %v3851_v14, %v457_v11  ;;  %v507_v31 = vmul.f32 %v501_v21, %v3811_v48 }
  0x9a   : > { %1702 = vperm.xlu1 %3261, %v1699_v38   ;;  %3270 = vset.pattern.permute.xlu0 %v3378_v45  ;;  %v3808_v46 = vpop.permute.xlu0 %549  ;;  %v3077_v38 = vld [vmem:[%s5248_s1 + $0x44] sm:$0x3] }
  0x9b   : > { %2110 = vperm.xlu0 %3270, %v2107_v42   ;;  %v351_v42 = vrot.slane %v3773_v5, 4  ;;  %v551_v45 = vrot.slane %v3808_v46, 4 }
  0x9c   : > { %v512_v49 = vpop.permute.xlu1 %511 }
  0x9d   : > { %v3877_v32 = vrot.slane %v512_v49, %v3769_v17  ;;  %v1939_v49 = vrot.slane %v3077_v38, %v3506_v9  ;;  %v557_v57 = vmul.f32 %v551_v45, %v3811_v48 }
  0x9e   : > { %3262 = vset.pattern.permute.xlu1 %v3379_v54  ;;  %v3825_v55 = vpop.permute.xlu0 %599  ;;  %v353_v54 = vsel %vm5286_vm0, %v351_v42, %v3773_v5  ;;  %vm1897_vm0 = vcmask 564224  }
  0x9f   : > { %1753 = vperm.xlu1 %3262, %v1750_v50   ;;  %2098 = vrot.lane.b32.xlu0 %v2097_v47, %s5264_s21  ;;  %v522_v44 = vmul.f32 %v3877_v32, %v507_v31  ;;  %v1943_v50 = vrot.slane %v3077_v38, %v3509_v10  ;;  %v601_v18 = vrot.slane %v3825_v55, 4  ;;  %v3085_v31 = vld [vmem:[%s5248_s1 + $0x54] sm:$0x3]  ;;  %s3404_s21 = smov 31  }
  0xa0   : > { %3284 = vset.pattern.permute.xlu0 %v5269_v4 }
  0xa1   : > { %v562_v62 = vpop.permute.xlu1 %561  ;;  %v607_v35 = vmul.f32 %v601_v18, %v3811_v48 }
  0xa2   : > { %v3841_v1 = vpop.permute.xlu0 %649  ;;  %v3913_v58 = vrot.slane %v562_v62, %v3769_v17  ;;  %v356_v62 = vmul.f32 %v353_v54, %v3765_v13 }
  0xa3   : > { %3263 = vset.pattern.permute.xlu1 %v3381_v2  ;;  %427 = vrot.lane.b32.xlu0 %v422_v63, %s3353_s16  ;;  %v2296_v2 = vrot.slane %v3084_v53, %v3506_v9 }
  0xa4   : > { %1804 = vperm.xlu1 %3263, %v1801_v0   ;;  %v1944_v0 = vcombine.low %v1939_v49, %v1943_v50  ;;  %v572_v11 = vmul.f32 %v3913_v58, %v557_v57  ;;  %v371_v29 = vmul.f32 %v3927_v8, %v356_v62  ;;  %v2347_v49 = vrot.slane %v3085_v31, %v3506_v9 }
  0xa5   : > { %v651_v50 = vrot.slane %v3841_v1, 4 }
  0xa6   : > { %v3853_v15 = vpop.permute.xlu1 %611  ;;  %v3855_v16 = vpop.permute.xlu0 %699 }
  0xa7   : > { %2149 = vrot.lane.b32.xlu0 %v2148_v6, %s3382_s23  ;;  %v2300_v6 = vrot.slane %v3084_v53, %v3509_v10  ;;  %v3951_v36 = vrot.slane %v3853_v15, %v3769_v17 }
  0xa8   : > { %1792 = vrot.lane.b32.xlu1 %v1791_v7, %s3383_s13  ;;  %v3078_v7 = vld [vmem:[%s5248_s1 + $0x46] sm:$0x3]  ;;  %s3393_s13 = smov 86  }
  0xa9   : > { %3265 = vset.pattern.permute.xlu1 %v3384_v22  ;;  %v1990_v22 = vrot.slane %v3078_v7, %v3506_v9  ;;  %v2301_v28 = vcombine.low %v2296_v2, %v2300_v6  ;;  %v3086_v2 = vld [vmem:[%s5248_s1 + $0x56] sm:$0x3]  ;;  %v657_v6 = vmul.f32 %v651_v50, %v3811_v48 }
  0xaa   : > { %v3865_v24 = vpop.permute.xlu0 %749 }
  0xab   : > { %v3867_v25 = vpop.permute.xlu1 %661  ;;  %477 = vrot.lane.b32.xlu0 %v472_v20, %s3351_s11 }
  0xac   : > { %1855 = vperm.xlu1 %3265, %v1852_v23   ;;  %v1994_v23 = vrot.slane %v3078_v7, %v3509_v10  ;;  %v3983_v7 = vrot.slane %v3867_v25, %v3769_v17  ;;  %v453_v25 = vsel %vm5294_vm2, %v451_v61, %v3802_v41  ;;  %v3087_v41 = vld [vmem:[%s5248_s1 + $0x58] sm:$0x3]  ;;  %vm2050_vm2 = vcmask 662528  }
  0xae   : > { %v3882_v34 = vpop.permute.xlu0 %799 }
  0xaf   : > { %2200 = vrot.lane.b32.xlu0 %v2199_v26, %s3385_s9  ;;  %s3390_s9 = smov 70   ;;  %v3392_v26 = vmov 38  }
  0xb0   : > { %3266 = vset.pattern.permute.xlu1 %v3386_v39  ;;  %v3889_v40 = vpop.permute.xlu1 %711  ;;  %v1995_v39 = vcombine.low %v1990_v22, %v1994_v23  ;;  %v2400_v22 = vrot.slane %v3086_v2, %v3509_v10  ;;  %v357_v23 = vmul.f32 %v351_v42, %v3811_v48 }
  0xb1   : > { %1906 = vperm.xlu1 %3266, %v1903_v33   ;;  %v403_v33 = vsel %vm5290_vm1, %v401_v43, %v3784_v30  ;;  %v2351_v30 = vrot.slane %v3085_v31, %v3509_v10  ;;  %v3079_v43 = vld [vmem:[%s5248_s1 + $0x48] sm:$0x3]  ;;  %vm580_vm1 = vcmask 375808  }
  0xb2   : > { %v3894_v47 = vpop.permute.xlu0 %849  ;;  %v406_v15 = vmul.f32 %v403_v33, %v3765_v13  ;;  %v2041_v53 = vrot.slane %v3079_v43, %v3506_v9  ;;  %v2045_v54 = vrot.slane %v3079_v43, %v3509_v10  ;;  %v372_v42 = vmul.f32 %v3927_v8, %v357_v23 }
  0xb3   : > { %527 = vrot.lane.b32.xlu0 %v522_v44, %s3387_s15  ;;  %v2352_v57 = vcombine.low %v2347_v49, %v2351_v30  ;;  %v456_v33 = vmul.f32 %v453_v25, %v3765_v13  ;;  %v2445_v49 = vrot.slane %v3087_v41, %v3506_v9  ;;  %v2449_v30 = vrot.slane %v3087_v41, %v3509_v10 }
  0xb4   : > { %v801_v25 = vrot.slane %v3882_v34, 4 }
  0xb5   : > { %3267 = vset.pattern.permute.xlu1 %v3388_v59  ;;  %v3915_v60 = vpop.permute.xlu1 %761  ;;  %v471_v43 = vmul.f32 %v3851_v14, %v456_v33  ;;  %v2158_v14 = vld [vmem:[%s5249_s2] sm:$0xf] }
  0xb6   : > { %1957 = vperm.xlu1 %3267, %v1954_v51   ;;  %v3917_v63 = vpop.permute.xlu0 %899  ;;  %v622_v51 = vmul.f32 %v3951_v36, %v607_v35  ;;  %v4016_v35 = vrot.slane %v3889_v40, %v3769_v17  ;;  %v503_v40 = vsel %vm5284_vm3, %v501_v21, %v3795_v37  ;;  %v3088_v37 = vld [vmem:[%s5248_s1 + $0x5a] sm:$0x3]  ;;  %vm1642_vm3 = vcmask 523264  }
  0xb7   : > { %2251 = vrot.lane.b32.xlu0 %v2250_v52, %s3389_s14  ;;  %s3413_s14 = smov 14  }
  0xba   : > { %1945 = vrot.lane.b32.xlu1 %v1944_v0, %s3390_s9  ;;  %v3931_v19 = vpop.permute.xlu1 %811  ;;  %v3933_v20 = vpop.permute.xlu0 %949  ;;  %v421_v0 = vmul.f32 %v3828_v56, %v406_v15  ;;  %v2396_v56 = vrot.slane %v3086_v2, %v3506_v9  ;;  %v751_v15 = vrot.slane %v3865_v24, 4  ;;  %v4051_v2 = vrot.slane %v3915_v60, %v3769_v17  ;;  %s3425_s9 = smov 113  }
  0xbb   : > { %577 = vrot.lane.b32.xlu0 %v572_v11, %s3391_s17  ;;  %3271 = vset.pattern.permute.xlu1 %v3392_v26  ;;  %v2046_v11 = vcombine.low %v2041_v53, %v2045_v54  ;;  %v672_v26 = vmul.f32 %v3983_v7, %v657_v6  ;;  %v553_v60 = vsel %vm552_vm4, %v551_v45, %v3808_v46  ;;  %v3089_v46 = vld [vmem:[%s5248_s1 + $0x5c] sm:$0x3]  ;;  %vm852_vm4 = vcmask 162816  }
  0xbc   : > { %v2401_v5 = vcombine.low %v2396_v56, %v2400_v22  ;;  %v757_v21 = vmul.f32 %v751_v15, %v3811_v48  ;;  %v2498_v56 = vrot.slane %v3088_v37, %v3509_v10  ;;  %v556_v41 = vmul.f32 %v553_v60, %v3765_v13 }
  0xbd   : > { %v807_v45 = vmul.f32 %v801_v25, %v3811_v48 }
  0xbe   : > { %375 = vrot.lane.b32.xlu1 %v371_v29, %s3367_s29  ;;  %v3954_v38 = vpop.permute.xlu0 %999 }
  0xbf   : > { %v3956_v44 = vpop.permute.xlu1 %861  ;;  %2302 = vrot.lane.b32.xlu0 %v2301_v28, %s3393_s13  ;;  %s3395_s13 = smov 45   ;;  %v701_v28 = vrot.slane %v3855_v16, 4 }
  0xc1   : > { %v707_v61 = vmul.f32 %v701_v28, %v3811_v48 }
  0xc2   : > { %1996 = vrot.lane.b32.xlu1 %v1995_v39, %s5260_s22  ;;  %v3967_v52 = vpop.permute.xlu0 %1047  ;;  %s3396_s22 = smov 96  }
  0xc3   : > { %627 = vrot.lane.b32.xlu0 %v622_v51, %s3395_s13  ;;  %v722_v51 = vmul.f32 %v4016_v35, %v707_v61  ;;  %v4082_v61 = vrot.slane %v3931_v19, %v3769_v17  ;;  %v603_v19 = vsel %vm602_vm5, %v601_v18, %v3825_v55  ;;  %v3090_v18 = vld [vmem:[%s5248_s1 + $0x5e] sm:$0x3]  ;;  %vm480_vm5 = vcmask 392192  }
  0xc4   : > { %v3972_v59 = vpop.permute.xlu1 %911  ;;  %v606_v55 = vmul.f32 %v603_v19, %v3765_v13 }
  0xc6   : > { %425 = vrot.lane.b32.xlu1 %v421_v0, %s3353_s16  ;;  %v3986_v62 = vpop.permute.xlu0 %1095  ;;  %s5262_s16 = smov 81   ;;  %v506_v0 = vmul.f32 %v503_v40, %v3765_v13  ;;  %v2547_v40 = vrot.slane %v3089_v46, %v3509_v10 }
  0xc7   : > { %2353 = vrot.lane.b32.xlu0 %v2352_v57, %s3396_s22  ;;  %v2450_v57 = vcombine.low %v2445_v49, %v2449_v30 }
  0xc8   : > { %v521_v22 = vmul.f32 %v3877_v32, %v506_v0  ;;  %v2209_v32 = vld [vmem:[%s5249_s2] sm:$0xf] }
  0xc9   : > { %v4000_v29 = vpop.permute.xlu1 %961 }
  0xca   : > { %2047 = vrot.lane.b32.xlu1 %v2046_v11, %s5262_s16  ;;  %v4003_v31 = vpop.permute.xlu0 %1143  ;;  %s3398_s16 = smov 97   ;;  %v2494_v11 = vrot.slane %v3088_v37, %v3506_v9 }
  0xcb   : > { %677 = vrot.lane.b32.xlu0 %v672_v26, %s3344_s19  ;;  %v772_v26 = vmul.f32 %v4051_v2, %v757_v21  ;;  %v3402_v21 = vmov 40  }
  0xcc   : > { %v2499_v33 = vcombine.low %v2494_v11, %v2498_v56 }
  0xce   : > { %v4018_v39 = vpop.permute.xlu1 %1010  ;;  %377 = vrot.lane.b32.xlu1 %v372_v42, %s3367_s29  ;;  %v4021_v8 = vpop.permute.xlu0 %1191  ;;  %v3400_v42 = vmov 39   ;;  %s3407_s29 = smov 30  }
  0xcf   : > { %2402 = vrot.lane.b32.xlu0 %v2401_v5, %s3398_s16 }
  0xd2   : > { %475 = vrot.lane.b32.xlu1 %v471_v43, %s3351_s11  ;;  %v4034_v53 = vpop.permute.xlu0 %1241  ;;  %s3399_s11 = smov 98   ;;  %v2543_v43 = vrot.slane %v3089_v46, %v3506_v9 }
  0xd3   : > { %v4036_v54 = vpop.permute.xlu1 %1058  ;;  %727 = vrot.lane.b32.xlu0 %v722_v51, %s3342_s12  ;;  %v571_v51 = vmul.f32 %v3913_v58, %v556_v41  ;;  %v2260_v58 = vld [vmem:[%s5249_s2] sm:$0xf]  ;;  %v901_v41 = vrot.slane %v3917_v63, 4 }
  0xd4   : > { %v2548_v11 = vcombine.low %v2543_v43, %v2547_v40 }
  0xd5   : > { %v907_v19 = vmul.f32 %v901_v41, %v3811_v48 }
  0xd6   : > { %2161 = vperm.xlu1 %3271, %v2158_v14   ;;  %v4053_v6 = vpop.permute.xlu0 %1291  ;;  %v851_v14 = vrot.slane %v3894_v47, 4 }
  0xd7   : > { %2451 = vrot.lane.b32.xlu0 %v2450_v57, %s3399_s11  ;;  %v822_v57 = vmul.f32 %v4082_v61, %v807_v45  ;;  %v3405_v45 = vmov 41  }
  0xd8   : > { %v4059_v23 = vpop.permute.xlu1 %1106  ;;  %v857_v56 = vmul.f32 %v851_v14, %v3811_v48 }
  0xda   : > { %525 = vrot.lane.b32.xlu1 %v521_v22, %s3387_s15  ;;  %v4067_v5 = vpop.permute.xlu0 %1341  ;;  %s3401_s15 = smov 99   ;;  %v4115_v22 = vrot.slane %v3956_v44, %v3769_v17  ;;  %v653_v44 = vsel %vm5296_vm6, %v651_v50, %v3841_v1  ;;  %vm5298_vm6 = vcmask 416768  }
  0xdb   : > { %777 = vrot.lane.b32.xlu0 %v772_v26, %s3340_s8  ;;  %3272 = vset.pattern.permute.xlu1 %v3400_v42  ;;  %v2594_v42 = vrot.slane %v3090_v18, %v3506_v9  ;;  %v656_v1 = vmul.f32 %v653_v44, %v3765_v13 }
  0xdc   : > { %v872_v46 = vmul.f32 %v4115_v22, %v857_v56 }
  0xdd   : > { %v4084_v49 = vpop.permute.xlu1 %1154 }
  0xde   : > { %2212 = vperm.xlu1 %3272, %v2209_v32   ;;  %v4086_v30 = vpop.permute.xlu0 %1389  ;;  %v2598_v32 = vrot.slane %v3090_v18, %v3509_v10  ;;  %v671_v18 = vmul.f32 %v3983_v7, %v656_v1  ;;  %v1145_v1 = vrot.slane %v4003_v31, 4 }
  0xdf   : > { %2500 = vrot.lane.b32.xlu0 %v2499_v33, %s3401_s15  ;;  %v621_v33 = vmul.f32 %v3951_v36, %v606_v55  ;;  %v2311_v36 = vld [vmem:[%s5249_s2] sm:$0xf] }
  0xe0   : > { %v2599_v40 = vcombine.low %v2594_v42, %v2598_v32  ;;  %v1391_v42 = vrot.slane %v4086_v30, 4 }
  0xe2   : > { %v4097_v0 = vpop.permute.xlu1 %1203  ;;  %575 = vrot.lane.b32.xlu1 %v571_v51, %s3391_s17  ;;  %v4100_v37 = vpop.permute.xlu0 %1497  ;;  %s3403_s17 = smov 100   ;;  %v3091_v51 = vld [vmem:[%s5248_s1 + $0x60] sm:$0x3] }
  0xe3   : > { %827 = vrot.lane.b32.xlu0 %v822_v57, %s3339_s20  ;;  %3273 = vset.pattern.permute.xlu1 %v3402_v21  ;;  %v4148_v57 = vrot.slane %v3972_v59, %v3769_v17  ;;  %v1049_v21 = vrot.slane %v3967_v52, 4  ;;  %v2649_v55 = vrot.slane %v3091_v51, %v3509_v10  ;;  %v703_v59 = vsel %vm5297_vm7, %v701_v28, %v3855_v16  ;;  %v2361_v28 = vld [vmem:[%s5249_s2] sm:$0xf] }
  0xe4   : > { %v1097_v10 = vrot.slane %v3986_v62, 4  ;;  %v3408_v16 = vmov 42   ;;  %v706_v44 = vmul.f32 %v703_v59, %v3765_v13  ;;  %vm2152_vm7 = vcmask 678912  }
  0xe5   : > { %v922_v56 = vmul.f32 %v4148_v57, %v907_v19 }
  0xe6   : > { %2263 = vperm.xlu1 %3273, %v2260_v58  }
  0xe7   : > { %v4117_v60 = vpop.permute.xlu1 %1253  ;;  %2549 = vrot.lane.b32.xlu0 %v2548_v11, %s3403_s17  ;;  %v4119_v26 = vpop.permute.xlu0 %1549  ;;  %v2645_v11 = vrot.slane %v3091_v51, %v3506_v9  ;;  %v1050_v9 = vsel %vm780_vm8, %v1049_v21, %v3967_v52  ;;  %s3419_s17 = smov 29   ;;  %v1102_v52 = vmul.f32 %v1097_v10, %v3811_v48 }
  0xea   : > { %625 = vrot.lane.b32.xlu1 %v621_v33, %s3395_s13  ;;  %s3406_s13 = smov 101   ;;  %v2650_v33 = vcombine.low %v2645_v11, %v2649_v55  ;;  %v753_v11 = vsel %vm752_vm10, %v751_v15, %v3865_v24  ;;  %v721_v55 = vmul.f32 %v4016_v35, %v706_v44  ;;  %v5277_v24 = vrot.slane %v4021_v8, 4 }
  0xeb   : > { %877 = vrot.lane.b32.xlu0 %v872_v46, %s3404_s21  ;;  %3274 = vset.pattern.permute.xlu1 %v3405_v45  ;;  %v4132_v43 = vpop.permute.xlu0 %1588  ;;  %v1053_v46 = vmul.f32 %v1050_v9, %v3765_v13  ;;  %v4180_v45 = vrot.slane %v4036_v54, %v3769_v17  ;;  %v3410_v15 = vmov 43  }
  0xec   : > { %v4138_v50 = vpop.permute.xlu1 %1303 }
  0xed   : > { %v1068_v59 = vmul.f32 %v4180_v45, %v1053_v46 }
  0xee   : > { %2314 = vperm.xlu1 %3274, %v2311_v36   ;;  %v1396_v36 = vmul.f32 %v1391_v42, %v3811_v48 }
  0xef   : > { %2600 = vrot.lane.b32.xlu0 %v2599_v40, %s3406_s13  ;;  %v4151_v58 = vpop.permute.xlu0 %1639  ;;  %v1098_v40 = vsel %vm730_vm9, %v1097_v10, %v3986_v62  ;;  %s3420_s13 = smov 126   ;;  %v1150_v10 = vmul.f32 %v1145_v1, %v3811_v48 }
  0xf1   : > { %v4162_v32 = vpop.permute.xlu1 %1352 }
  0xf2   : > { %675 = vrot.lane.b32.xlu1 %v671_v18, %s3344_s19  ;;  %s3409_s19 = smov 102   ;;  %v1101_v18 = vmul.f32 %v1098_v40, %v3765_v13  ;;  %v1195_v40 = vsel %vm1194_vm12, %v5277_v24, %v4021_v8  ;;  %vm430_vm12 = vcmask 400384  }
  0xf3   : > { %927 = vrot.lane.b32.xlu0 %v922_v56, %s3407_s29  ;;  %3275 = vset.pattern.permute.xlu1 %v3408_v16  ;;  %v4171_v7 = vpop.permute.xlu0 %1690  ;;  %v4204_v56 = vrot.slane %v4059_v23, %v3769_v17  ;;  %v1146_v16 = vsel %vm680_vm11, %v1145_v1, %v4003_v31  ;;  %v5301_v1 = vrot.slane %v4021_v8, 4  ;;  %v4510_v8 = vld [vmem:[%s3760_s28 + $0x8] sm:$0xf] }
  0xf4   : > { %v1149_v44 = vmul.f32 %v1146_v16, %v3765_v13 }
  0xf5   : > { %v1116_v46 = vmul.f32 %v4204_v56, %v1101_v18 }
  0xf6   : > { %v1401_v51 = vpop.permute.xlu1 %1400  ;;  %2364 = vperm.xlu1 %3275, %v2361_v28   ;;  %v2410_v28 = vld [vmem:[%s5249_s2] sm:$0xf] }
  0xf7   : > { %v4191_v19 = vrot.slane %v1401_v51, %v3769_v17  ;;  %2651 = vrot.lane.b32.xlu0 %v2650_v33, %s3409_s19  ;;  %v4193_v54 = vpop.permute.xlu0 %1741  ;;  %v756_v33 = vmul.f32 %v753_v11, %v3765_v13  ;;  %v5275_v51 = vrot.slane %v4034_v53, 4  ;;  %s5300_s19 = smov 19  }
  0xf9   : > { %v4207_v9 = vmul.f32 %v4191_v19, %v1396_v36  ;;  %v4228_v36 = vrot.slane %v4084_v49, %v3769_v17  ;;  %v771_v18 = vmul.f32 %v4051_v2, %v756_v33  ;;  %v803_v49 = vsel %vm802_vm13, %v801_v25, %v3882_v34 }
  0xfa   : > { %725 = vrot.lane.b32.xlu1 %v721_v55, %s3342_s12  ;;  %v3411_v34 = vmov 44   ;;  %v806_v33 = vmul.f32 %v803_v49, %v3765_v13  ;;  %s3423_s12 = smov 115  }
  0xfb   : > { %v4215_v35 = vpop.permute.xlu1 %1448  ;;  %1072 = vrot.lane.b32.xlu0 %v1068_v59, %s3330_s10  ;;  %3276 = vset.pattern.permute.xlu1 %v3410_v15  ;;  %v4218_v23 = vpop.permute.xlu0 %288  ;;  %v1198_v59 = vmul.f32 %v1195_v40, %v3765_v13  ;;  %v1164_v16 = vmul.f32 %v4228_v36, %v1149_v44  ;;  %v4248_v15 = vrot.slane %v4097_v0, %v3769_v17  ;;  %v2459_v0 = vld [vmem:[%s5249_s2] sm:$0xf] }
  0xfd   : > { %v1213_v40 = vmul.f32 %v4248_v15, %v1198_v59  ;;  %v821_v59 = vmul.f32 %v4082_v61, %v806_v33 }
  0xfe   : > { %2413 = vperm.xlu1 %3276, %v2410_v28   ;;  %v1245_v28 = vsel %vm1244_vm14, %v5275_v51, %v4034_v53  ;;  %vm902_vm14 = vcmask 171008  }
  0xff   : > { %v4234_v55 = vpop.permute.xlu1 %1437  ;;  %1120 = vrot.lane.b32.xlu0 %v1116_v46, %s3328_s27  ;;  %v4237_v11 = vpop.permute.xlu0 %1843  ;;  %v5274_v46 = vrot.slane %v4053_v6, 4  ;;  %v1248_v44 = vmul.f32 %v1245_v28, %v3765_v13 }
 0x102   : > { %775 = vrot.lane.b32.xlu1 %v771_v18, %s3340_s8  ;;  %v4268_v18 = vrot.slane %v4117_v60, %v3769_v17  ;;  %s3412_s8 = smov 15   ;;  %v853_v60 = vsel %vm852_vm4, %v851_v14, %v3894_v47  ;;  %v3414_v47 = vmov 45   ;;  %v2508_v14 = vld [vmem:[%s5249_s2] sm:$0xf]  ;;  %vm952_vm4 = vcmask 179200  }
 0x103   : > { %v4255_v2 = vpop.permute.xlu1 %1485  ;;  %1168 = vrot.lane.b32.xlu0 %v1164_v16, %s3326_s18  ;;  %3277 = vset.pattern.permute.xlu1 %v3411_v34  ;;  %v4258_v25 = vpop.permute.xlu0 %1894  ;;  %v1295_v16 = vsel %vm1294_vm15, %v5274_v46, %v4053_v6  ;;  %v5273_v34 = vrot.slane %v4067_v5, 4  ;;  %vm380_vm15 = vcmask 408576  }
 0x104   : > { %v1298_v28 = vmul.f32 %v1295_v16, %v3765_v13  ;;  %v1263_v12 = vmul.f32 %v4268_v18, %v1248_v44 }
 0x106   : > { %2462 = vperm.xlu1 %3277, %v2459_v0   ;;  %v4287_v0 = vrot.slane %v4138_v50, %v3769_v17  ;;  %v856_v50 = vmul.f32 %v853_v60, %v3765_v13 }
 0x107   : > { %v4274_v3 = vpop.permute.xlu1 %1537  ;;  %1217 = vrot.lane.b32.xlu0 %v1213_v40, %s3412_s8  ;;  %v4277_v49 = vpop.permute.xlu0 %328  ;;  %v1344_v40 = vsel %vm480_vm5, %v5273_v34, %v4067_v5 }
 0x108   : > { %v1347_v44 = vmul.f32 %v1344_v40, %v3765_v13  ;;  %v1313_v16 = vmul.f32 %v4287_v0, %v1298_v28  ;;  %v871_v60 = vmul.f32 %v4115_v22, %v856_v50  ;;  %v3416_v22 = vmov 46  }
 0x10a   : > { %825 = vrot.lane.b32.xlu1 %v821_v59, %s3339_s20  ;;  %v4307_v59 = vrot.slane %v4162_v32, %v3769_v17  ;;  %s3415_s20 = smov 13   ;;  %v903_v32 = vsel %vm902_vm14, %v901_v41, %v3917_v63  ;;  %v951_v41 = vrot.slane %v3933_v20, 4  ;;  %vm1540_vm14 = vcmask 433152  }
 0x10b   : > { %v4294_v61 = vpop.permute.xlu1 %1600  ;;  %1267 = vrot.lane.b32.xlu0 %v1263_v12, %s3413_s14  ;;  %3278 = vset.pattern.permute.xlu1 %v3414_v47  ;;  %v1392_v12 = vsel %vm430_vm12, %v1391_v42, %v4086_v30  ;;  %v1439_v47 = vrot.slane %v4234_v55, 4  ;;  %v906_v63 = vmul.f32 %v903_v32, %v3765_v13 }
 0x10c   : > { %v4301_v33 = vpop.permute.xlu0 %2008  ;;  %v1395_v40 = vmul.f32 %v1392_v12, %v3765_v13  ;;  %v1362_v4 = vmul.f32 %v4307_v59, %v1347_v44  ;;  %v953_v32 = vsel %vm952_vm4, %v951_v41, %v3933_v20  ;;  %v3417_v20 = vmov 47  }
 0x10d   : > { %v1440_v42 = vsel %vm380_vm15, %v1439_v47, %v4234_v55  ;;  %v5272_v55 = vrot.slane %v4255_v2, 4  ;;  %vm830_vm4 = vcmask 261120   ;;  %v1444_v34 = vmul.f32 %v1439_v47, %v3811_v48 }
 0x10e   : > { %2511 = vperm.xlu1 %3278, %v2508_v14   ;;  %v2558_v14 = vld [vmem:[%s5249_s2] sm:$0xf]  ;;  %v1410_v50 = vmul.f32 %v4191_v19, %v1395_v40  ;;  %v1443_v44 = vmul.f32 %v1440_v42, %v3765_v13  ;;  %v921_v19 = vmul.f32 %v4148_v57, %v906_v63  ;;  %v4349_v40 = vrot.slane %v4100_v37, %v3769_v17 }
 0x10f   : > { %1317 = vrot.lane.b32.xlu0 %v1313_v16, %s3415_s20  ;;  %v2609_v37 = vld [vmem:[%s5249_s2] sm:$0xf]  ;;  %v956_v63 = vmul.f32 %v953_v32, %v3765_v13 }
 0x110   : > { %v4316_v28 = vpop.permute.xlu1 %1651 }
 0x111   : > { %v4323_v30 = vpop.permute.xlu0 %2059 }
 0x112   : > { %875 = vrot.lane.b32.xlu1 %v871_v60, %s3404_s21  ;;  %v1456_v60 = vrot.slane %v4215_v35, %v3769_v17  ;;  %s5299_s21 = smov 1  }
 0x113   : > { %1366 = vrot.lane.b32.xlu0 %v1362_v4, %s3321_s30  ;;  %3279 = vset.pattern.permute.xlu1 %v3416_v22  ;;  %v5271_v4 = vrot.slane %v4274_v3, 4  ;;  %v1493_v22 = vmul.f32 %v5272_v55, %v3811_v48 }
 0x114   : > { %v1458_v42 = vmul.f32 %v1456_v60, %v1443_v44  ;;  %v1001_v44 = vrot.slane %v3954_v38, 4 }
 0x115   : > { %v4337_v16 = vpop.permute.xlu1 %1702  ;;  %v1541_v35 = vsel %vm1540_vm14, %v5271_v4, %v4274_v3  ;;  %vm1488_vm14 = vcmask 424960  }
 0x116   : > { %2561 = vperm.xlu1 %3279, %v2558_v14   ;;  %v4340_v12 = vpop.permute.xlu0 %2110  ;;  %v1544_v4 = vmul.f32 %v1541_v35, %v3765_v13  ;;  %v1002_v32 = vsel %vm830_vm4, %v1001_v44, %v3954_v38  ;;  %v2660_v38 = vld [vmem:[%s5249_s2] sm:$0xf] }
 0x117   : > { %1414 = vrot.lane.b32.xlu0 %v1410_v50, %s3319_s26  ;;  %v969_v50 = vrot.slane %v4000_v29, %v3769_v17  ;;  %v1005_v47 = vmul.f32 %v1002_v32, %v3765_v13  ;;  %v957_v13 = vmul.f32 %v951_v41, %v3811_v48  ;;  %v1006_v41 = vmul.f32 %v1001_v44, %v3811_v48 }
 0x119   : > { %v971_v29 = vmul.f32 %v969_v50, %v956_v63  ;;  %v3421_v63 = vmov 48  }
 0x11a   : > { %v4357_v14 = vpop.permute.xlu1 %1753  ;;  %925 = vrot.lane.b32.xlu1 %v921_v19, %s3407_s29  ;;  %v4360_v57 = vpop.permute.xlu0 %2098  ;;  %v4372_v19 = vrot.slane %v4119_v26, %v3769_v17  ;;  %s3418_s29 = smov 127   ;;  %v5276_v26 = vrot.slane %v4132_v43, 4 }
 0x11b   : > { %1462 = vrot.lane.b32.xlu0 %v1458_v42, %s5299_s21  ;;  %3280 = vset.pattern.permute.xlu1 %v3417_v20  ;;  %v1508_v42 = vmul.f32 %v4349_v40, %v1493_v22 }
 0x11c   : > { %v1559_v35 = vmul.f32 %v4372_v19, %v1544_v4  ;;  %v1018_v4 = vrot.slane %v4018_v39, %v3769_v17 }
 0x11e   : > { %2612 = vperm.xlu1 %3280, %v2609_v37   ;;  %v4376_v20 = vpop.permute.xlu0 %427  ;;  %v1020_v39 = vmul.f32 %v1018_v4, %v1005_v47 }
 0x11f   : > { %v4378_v55 = vpop.permute.xlu1 %1804  ;;  %1513 = vrot.lane.b32.xlu0 %v1508_v42, %s3418_s29  ;;  %v1596_v42 = vmul.f32 %v5276_v26, %v3811_v48  ;;  %v1692_v26 = vrot.slane %v4171_v7, 4 }
 0x120   : > { %v4470_v62 = vrot.slane %v4378_v55, %v3769_v17 }
 0x121   : > { %v1698_v47 = vmul.f32 %v1692_v26, %v3811_v48 }
 0x122   : > { %975 = vrot.lane.b32.xlu1 %v971_v29, %s3419_s17  ;;  %v4387_v22 = vpop.permute.xlu0 %2149  ;;  %v1641_v29 = vrot.slane %v4151_v58, 4 }
 0x123   : > { %v4389_v37 = vpop.permute.xlu1 %1792  ;;  %1563 = vrot.lane.b32.xlu0 %v1559_v35, %s3420_s13  ;;  %3281 = vset.pattern.permute.xlu1 %v3421_v63  ;;  %v4404_v35 = vrot.slane %v4294_v61, %v3769_v17  ;;  %v1459_v63 = vmul.f32 %v1456_v60, %v1444_v34  ;;  %v4417_v34 = vrot.slane %v4316_v28, %v3769_v17  ;;  %v1743_v28 = vrot.slane %v4193_v54, 4 }
 0x124   : > { %v1647_v32 = vmul.f32 %v1641_v29, %v3811_v48  ;;  %v972_v60 = vmul.f32 %v969_v50, %v957_v13  ;;  %v1021_v50 = vmul.f32 %v1018_v4, %v1006_v41  ;;  %v5281_v4 = vrot.slane %v4237_v11, 4 }
 0x125   : > { %v1611_v24 = vmul.f32 %v4404_v35, %v1596_v42  ;;  %v1749_v44 = vmul.f32 %v1743_v28, %v3811_v48 }
 0x126   : > { %2663 = vperm.xlu1 %3281, %v2660_v38   ;;  %v4406_v46 = vpop.permute.xlu0 %477  ;;  %v1662_v42 = vmul.f32 %v4417_v34, %v1647_v32 }
 0x127   : > { %v1856_v51 = vpop.permute.xlu1 %1855  ;;  %1464 = vrot.lane.b32.xlu0 %v1459_v63, %s5299_s21  ;;  %s3422_s21 = smov 125   ;;  %v4432_v63 = vrot.slane %v4337_v16, %v3769_v17  ;;  %v4447_v16 = vrot.slane %v4357_v14, %v3769_v17 }
 0x129   : > { %v1713_v13 = vmul.f32 %v4432_v63, %v1698_v47  ;;  %v1764_v14 = vmul.f32 %v4447_v16, %v1749_v44  ;;  %v4482_v44 = vrot.slane %v1856_v51, %v3769_v17 }
 0x12a   : > { %1024 = vrot.lane.b32.xlu1 %v1020_v39, %s5300_s19  ;;  %v4420_v61 = vpop.permute.xlu0 %2200  ;;  %v1794_v39 = vrot.slane %v4389_v37, 4 }
 0x12b   : > { %1616 = vrot.lane.b32.xlu0 %v1611_v24, %s3422_s21  ;;  %3282 = vset.pattern.permute.xlu1 %v3318_v27  ;;  %v1054_v27 = vmul.f32 %v1049_v21, %v3811_v48 }
 0x12c   : > { %v1907_v38 = vpop.permute.xlu1 %1906  ;;  %v1800_v41 = vmul.f32 %v1794_v39, %v3811_v48 }
 0x12d   : > { %v1069_v21 = vmul.f32 %v4180_v45, %v1054_v27  ;;  %v1117_v45 = vmul.f32 %v4204_v56, %v1102_v52  ;;  %v1851_v27 = vmul.f32 %v5281_v4, %v3811_v48  ;;  %v1199_v56 = vmul.f32 %v5301_v1, %v3811_v48 }
 0x12e   : > { %977 = vrot.lane.b32.xlu1 %v972_v60, %s3419_s17  ;;  %v4435_v24 = vpop.permute.xlu0 %527  ;;  %s3424_s17 = smov 114   ;;  %v1165_v52 = vmul.f32 %v4228_v36, %v1150_v10 }
 0x12f   : > { %1667 = vrot.lane.b32.xlu0 %v1662_v42, %s3423_s12 }
 0x131   : > { %v1958_v32 = vpop.permute.xlu1 %1957 }
 0x132   : > { %1026 = vrot.lane.b32.xlu1 %v1021_v50, %s5300_s19  ;;  %v4451_v60 = vpop.permute.xlu0 %2251  ;;  %v5280_v50 = vrot.slane %v4258_v25, 4 }
 0x133   : > { %1718 = vrot.lane.b32.xlu0 %v1713_v13, %s3424_s17  ;;  %v1815_v13 = vmul.f32 %v4470_v62, %v1800_v41 }
 0x134   : > { %v1902_v51 = vmul.f32 %v5280_v50, %v3811_v48  ;;  %v5302_v48 = vrot.slane %v4034_v53, 4  ;;  %v4527_v53 = vrot.slane %v1958_v32, %v3769_v17 }
 0x135   : > { %v4463_v47 = vpop.permute.xlu1 %1945 }
 0x136   : > { %1074 = vrot.lane.b32.xlu1 %v1069_v21, %s3330_s10  ;;  %v4466_v42 = vpop.permute.xlu0 %577  ;;  %s3426_s10 = smov 112   ;;  %v1866_v21 = vmul.f32 %v4482_v44, %v1851_v27  ;;  %v5278_v41 = vrot.slane %v4463_v47, 4  ;;  %v1249_v36 = vmul.f32 %v4510_v8, %v5302_v48  ;;  %v4536_v48 = vrot.slane %v4301_v33, %v3769_v17 }
 0x137   : > { %1769 = vrot.lane.b32.xlu0 %v1764_v14, %s3425_s9  ;;  %v4500_v14 = vrot.slane %v1907_v38, %v3769_v17  ;;  %v1214_v38 = vmul.f32 %v4248_v15, %v1199_v56  ;;  %v5303_v15 = vrot.slane %v4053_v6, 4  ;;  %v5304_v33 = vrot.slane %v4067_v5, 4 }
 0x138   : > { %v1953_v27 = vmul.f32 %v4510_v8, %v5278_v41 }
 0x139   : > { %v4484_v55 = vpop.permute.xlu1 %375  ;;  %v1917_v10 = vmul.f32 %v4500_v14, %v1902_v51  ;;  %v1299_v56 = vmul.f32 %v4510_v8, %v5303_v15  ;;  %v1264_v51 = vmul.f32 %v4268_v18, %v1249_v36  ;;  %v5282_v18 = vrot.slane %v4360_v57, 4 }
 0x13a   : > { %1122 = vrot.lane.b32.xlu1 %v1117_v45, %s3328_s27  ;;  %v4488_v31 = vpop.permute.xlu0 %2302  ;;  %s3427_s27 = smov 111   ;;  %v1968_v32 = vmul.f32 %v4527_v53, %v1953_v27  ;;  %v1348_v36 = vmul.f32 %v4510_v8, %v5304_v33  ;;  %v5305_v27 = vrot.slane %v4255_v2, 4  ;;  %v5283_v33 = vrot.slane %v4387_v22, 4 }
 0x13b   : > { %1820 = vrot.lane.b32.xlu0 %v1815_v13, %s3426_s10  ;;  %v1314_v15 = vmul.f32 %v4287_v0, %v1299_v56  ;;  %v4572_v0 = vrot.slane %v4340_v12, %v3769_v17  ;;  %v4580_v56 = vld [vmem:[%s3760_s28] sm:$0xff] }
 0x13d   : > { %v4503_v45 = vpop.permute.xlu1 %1996 }
 0x13e   : > { %1170 = vrot.lane.b32.xlu1 %v1165_v52, %s3326_s18  ;;  %v4506_v13 = vpop.permute.xlu0 %627  ;;  %v5279_v1 = vrot.slane %v4503_v45, 4  ;;  %s3428_s18 = smov 110  }
 0x13f   : > { %1871 = vrot.lane.b32.xlu0 %v1866_v21, %s3427_s27 }
 0x141   : > { %v4521_v52 = vpop.permute.xlu1 %425 }
 0x142   : > { %1219 = vrot.lane.b32.xlu1 %v1214_v38, %s3412_s8  ;;  %v4524_v21 = vpop.permute.xlu0 %2353  ;;  %v2004_v38 = vmul.f32 %v4510_v8, %v5279_v1  ;;  %s3429_s8 = smov 109   ;;  %v1489_v1 = vsel %vm1488_vm14, %v5305_v27, %v4255_v2  ;;  %v2106_v2 = vmul.f32 %v4510_v8, %v5282_v18  ;;  %vm1591_vm14 = vcmask 441344  }
 0x143   : > { %1922 = vrot.lane.b32.xlu0 %v1917_v10, %s3428_s18 }
 0x144   : > { %v2019_v5 = vmul.f32 %v4536_v48, %v2004_v38  ;;  %v1492_v38 = vmul.f32 %v4580_v56, %v1489_v1  ;;  %v2157_v1 = vmul.f32 %v4510_v8, %v5283_v33 }
 0x145   : > { %v4541_v41 = vpop.permute.xlu1 %2047 }
 0x146   : > { %v2049_v10 = vrot.slane %v4541_v41, 4  ;;  %1269 = vrot.lane.b32.xlu1 %v1264_v51, %s3413_s14  ;;  %v4546_v6 = vpop.permute.xlu0 %677  ;;  %v4559_v51 = vrot.slane %v4323_v30, %v3769_v17  ;;  %v1363_v30 = vmul.f32 %v4307_v59, %v1348_v36  ;;  %v1507_v59 = vmul.f32 %v4349_v40, %v1492_v38  ;;  %s3432_s14 = smov 93  }
 0x147   : > { %1973 = vrot.lane.b32.xlu0 %v1968_v32, %s3429_s8  ;;  %v5285_v40 = vrot.slane %v4420_v61, 4 }
 0x148   : > { %v2055_v50 = vmul.f32 %v4510_v8, %v2049_v10 }
 0x149   : > { %v4564_v4 = vpop.permute.xlu1 %377 }
 0x14a   : > { %1319 = vrot.lane.b32.xlu1 %v1314_v15, %s3415_s20  ;;  %v4568_v32 = vpop.permute.xlu0 %2402  ;;  %v2070_v27 = vmul.f32 %v4559_v51, %v2055_v50  ;;  %s5313_s20 = smov 82  }
 0x14b   : > { %2024 = vrot.lane.b32.xlu0 %v2019_v5, %s3401_s15  ;;  %v2121_v5 = vmul.f32 %v4572_v0, %v2106_v2 }
 0x14d   : > { %v4584_v15 = vpop.permute.xlu1 %475 }
 0x14e   : > { %1368 = vrot.lane.b32.xlu1 %v1363_v30, %s3321_s30  ;;  %v4588_v12 = vpop.permute.xlu0 %727  ;;  %v5306_v30 = vrot.slane %v4274_v3, 4  ;;  %s3431_s30 = smov 94  }
 0x14f   : > { %2075 = vrot.lane.b32.xlu0 %v2070_v27, %s3399_s11  ;;  %v5307_v27 = vrot.slane %v4132_v43, 4 }
 0x150   : > { %v1545_v2 = vmul.f32 %v4510_v8, %v5306_v30 }
 0x151   : > { %v2162_v36 = vpop.permute.xlu1 %2161  ;;  %v1592_v33 = vsel %vm1591_vm14, %v5307_v27, %v4132_v43  ;;  %v1643_v43 = vsel %vm1642_vm3, %v1641_v29, %v4151_v58  ;;  %vm1693_vm14 = vcmask 531456   ;;  %vm1744_vm3 = vcmask 539648  }
 0x152   : > { %v4597_v18 = vrot.slane %v2162_v36, %v3769_v17  ;;  %1511 = vrot.lane.b32.xlu1 %v1507_v59, %s3418_s29  ;;  %v4600_v50 = vpop.permute.xlu0 %2451  ;;  %v1595_v3 = vmul.f32 %v4580_v56, %v1592_v33  ;;  %v1646_v33 = vmul.f32 %v4580_v56, %v1643_v43  ;;  %v1694_v58 = vsel %vm1693_vm14, %v1692_v26, %v4171_v7 }
 0x153   : > { %2126 = vrot.lane.b32.xlu0 %v2121_v5, %s3398_s16  ;;  %v2208_v5 = vmul.f32 %v4510_v8, %v5285_v40  ;;  %v5288_v40 = vrot.slane %v4451_v60, 4  ;;  %v1745_v7 = vsel %vm1744_vm3, %v1743_v28, %v4193_v54  ;;  %vm1795_vm14 = vcmask 547840  }
 0x154   : > { %v2172_v38 = vmul.f32 %v4597_v18, %v2157_v1  ;;  %v1560_v1 = vmul.f32 %v4372_v19, %v1545_v2  ;;  %v1610_v27 = vmul.f32 %v4404_v35, %v1595_v3  ;;  %v1697_v35 = vmul.f32 %v4580_v56, %v1694_v58 }
 0x155   : > { %v4611_v36 = vpop.permute.xlu1 %525  ;;  %v1661_v3 = vmul.f32 %v4417_v34, %v1646_v33  ;;  %v5287_v33 = vrot.slane %v4488_v31, 4  ;;  %v4665_v54 = vrot.slane %v4218_v23, %v3769_v17  ;;  %vm1846_vm3 = vcmask 556032  }
 0x156   : > { %1416 = vrot.lane.b32.xlu1 %v4207_v9, %s3319_s26  ;;  %v4615_v59 = vpop.permute.xlu0 %777  ;;  %s3430_s26 = smov 95   ;;  %v1712_v34 = vmul.f32 %v4432_v63, %v1697_v35  ;;  %v1796_v28 = vsel %vm1795_vm14, %v1794_v39, %v4389_v37  ;;  %v5308_v58 = vrot.slane %v4237_v11, 4  ;;  %vm1948_vm14 = vcmask 572416  }
 0x157   : > { %2177 = vrot.lane.b32.xlu0 %v2172_v38, %s3396_s22  ;;  %v2310_v37 = vmul.f32 %v4510_v8, %v5287_v33  ;;  %v299_v39 = vmul.f32 %v4510_v8, %v4665_v54 }
 0x158   : > { %v1847_v23 = vsel %vm1846_vm3, %v5308_v58, %v4237_v11  ;;  %v5291_v58 = vrot.slane %v4524_v21, 4  ;;  %vm530_vm3 = vcmask 384000  }
 0x159   : > { %v2213_v30 = vpop.permute.xlu1 %2212 }
 0x15a   : > { %v4627_v9 = vrot.slane %v2213_v30, %v3769_v17  ;;  %1565 = vrot.lane.b32.xlu1 %v1560_v1, %s3420_s13  ;;  %v4630_v38 = vpop.permute.xlu0 %2500  ;;  %v1748_v30 = vmul.f32 %v4580_v56, %v1745_v7  ;;  %v5289_v7 = vrot.slane %v4484_v55, 4 }
 0x15c   : > { %v2223_v19 = vmul.f32 %v4627_v9, %v2208_v5  ;;  %v2259_v5 = vmul.f32 %v4510_v8, %v5288_v40  ;;  %v1763_v35 = vmul.f32 %v4447_v16, %v1748_v30  ;;  %v1850_v16 = vmul.f32 %v4580_v56, %v1847_v23 }
 0x15d   : > { %v4639_v29 = vpop.permute.xlu1 %575  ;;  %v5309_v30 = vrot.slane %v4258_v25, 4 }
 0x15e   : > { %1614 = vrot.lane.b32.xlu1 %v1610_v27, %s3422_s21  ;;  %2228 = vrot.lane.b32.xlu0 %v2223_v19, %s3430_s26  ;;  %v4643_v2 = vpop.permute.xlu0 %827 }
 0x161   : > { %v2264_v26 = vpop.permute.xlu1 %2263 }
 0x162   : > { %v4654_v1 = vrot.slane %v2264_v26, %v3769_v17  ;;  %1665 = vrot.lane.b32.xlu1 %v1661_v3, %s3423_s12  ;;  %v4657_v43 = vpop.permute.xlu0 %2549  ;;  %v1799_v3 = vmul.f32 %v4580_v56, %v1796_v28 }
 0x164   : > { %v2274_v27 = vmul.f32 %v4654_v1, %v2259_v5  ;;  %v1814_v28 = vmul.f32 %v4470_v62, %v1799_v3 }
 0x165   : > { %v4670_v19 = vpop.permute.xlu1 %625 }
 0x166   : > { %1716 = vrot.lane.b32.xlu1 %v1712_v34, %s3424_s17  ;;  %2279 = vrot.lane.b32.xlu0 %v2274_v27, %s3431_s30  ;;  %v4674_v63 = vpop.permute.xlu0 %877  ;;  %v1898_v34 = vsel %vm1897_vm0, %v5309_v30, %v4258_v25  ;;  %v330_v27 = vrot.slane %v4277_v49, 4  ;;  %v5292_v25 = vrot.slane %v4521_v52, 4  ;;  %v5293_v30 = vrot.slane %v4584_v15, 4 }
 0x167   : > { %vm5295_vm0 = vcmask 654336  }
 0x168   : > { %v336_v23 = vadd.f32 %v330_v27, %v299_v39  ;;  %v5310_v39 = vrot.slane %v4463_v47, 4 }
 0x169   : > { %v2315_v5 = vpop.permute.xlu1 %2314 }
 0x16a   : > { %v4688_v26 = vrot.slane %v2315_v5, %v3769_v17  ;;  %1767 = vrot.lane.b32.xlu1 %v1763_v35, %s3425_s9  ;;  %v4691_v11 = vpop.permute.xlu0 %2600  ;;  %v382_v5 = vsel %vm380_vm15, %v5289_v7, %v4564_v4  ;;  %v1901_v4 = vmul.f32 %v4580_v56, %v1898_v34  ;;  %v1949_v40 = vsel %vm1948_vm14, %v5310_v39, %v4463_v47 }
 0x16b   : > { %v386_v3 = vadd.f32 %v382_v5, %v336_v23  ;;  %v2360_v7 = vmul.f32 %v4510_v8, %v5291_v58  ;;  %v432_v34 = vsel %vm430_vm12, %v5292_v25, %v4376_v20  ;;  %v579_v47 = vrot.slane %v4639_v29, 4 }
 0x16c   : > { %v2325_v35 = vmul.f32 %v4688_v26, %v2310_v37  ;;  %v1865_v37 = vmul.f32 %v4482_v44, %v1850_v16  ;;  %v482_v44 = vsel %vm480_vm5, %v5293_v30, %v4406_v46  ;;  %v1916_v23 = vmul.f32 %v4500_v14, %v1901_v4 }
 0x16d   : > { %v4707_v33 = vpop.permute.xlu1 %675  ;;  %v1952_v39 = vmul.f32 %v4580_v56, %v1949_v40  ;;  %v5311_v20 = vrot.slane %v4503_v45, 4  ;;  %v436_v25 = vadd.f32 %v432_v34, %v386_v3  ;;  %v2404_v46 = vrot.slane %v4568_v32, 4 }
 0x16e   : > { %1818 = vrot.lane.b32.xlu1 %v1814_v28, %s3426_s10  ;;  %2330 = vrot.lane.b32.xlu0 %v2325_v35, %s3432_s14  ;;  %v4713_v62 = vpop.permute.xlu0 %927  ;;  %v529_v28 = vrot.slane %v4611_v36, 4  ;;  %vm630_vm14 = vcmask 367616   ;;  %v679_v4 = vrot.slane %v4707_v33, 4 }
 0x16f   : > { %v2000_v58 = vsel %vm5295_vm0, %v5311_v20, %v4503_v45  ;;  %v486_v14 = vadd.f32 %v482_v44, %v436_v25  ;;  %v582_v45 = vsel %vm580_vm1, %v579_v47, %v4466_v42  ;;  %vm2101_vm0 = vcmask 670720  }
 0x170   : > { %v1967_v3 = vmul.f32 %v4527_v53, %v1952_v39  ;;  %v2409_v34 = vmul.f32 %v4510_v8, %v2404_v46  ;;  %v682_v53 = vsel %vm680_vm11, %v679_v4, %v4546_v6 }
 0x171   : > { %v2365_v35 = vpop.permute.xlu1 %2364 }
 0x172   : > { %v4734_v16 = vrot.slane %v2365_v35, %v3769_v17  ;;  %1869 = vrot.lane.b32.xlu1 %v1865_v37, %s3427_s27  ;;  %v4737_v5 = vpop.permute.xlu0 %2651  ;;  %v532_v35 = vsel %vm530_vm3, %v529_v28, %v4435_v24  ;;  %v629_v37 = vrot.slane %v4670_v19, 4  ;;  %v2003_v24 = vmul.f32 %v4580_v56, %v2000_v58 }
 0x173   : > { %v2051_v58 = vsel %vm2050_vm2, %v2049_v10, %v4541_v41 }
 0x174   : > { %v2375_v30 = vmul.f32 %v4734_v16, %v2360_v7  ;;  %v536_v7 = vadd.f32 %v532_v35, %v486_v14  ;;  %v632_v42 = vsel %vm630_vm14, %v629_v37, %v4506_v13  ;;  %v5312_v13 = vrot.slane %v4360_v57, 4 }
 0x175   : > { %v4752_v40 = vpop.permute.xlu1 %725  ;;  %v2018_v41 = vmul.f32 %v4536_v48, %v2003_v24  ;;  %v2054_v35 = vmul.f32 %v4580_v56, %v2051_v58  ;;  %v2453_v14 = vrot.slane %v4600_v50, 4  ;;  %v332_v48 = vsel %vm5298_vm6, %v330_v27, %v4277_v49 }
 0x176   : > { %1920 = vrot.lane.b32.xlu1 %v1916_v23, %s3428_s18  ;;  %2380 = vrot.lane.b32.xlu0 %v2375_v30, %s3382_s23  ;;  %v4762_v25 = vpop.permute.xlu0 %1072  ;;  %v729_v44 = vrot.slane %v4752_v40, 4  ;;  %v586_v30 = vadd.f32 %v582_v45, %v536_v7  ;;  %v2102_v20 = vsel %vm2101_vm0, %v5312_v13, %v4360_v57  ;;  %v298_v7 = vmul.f32 %v4580_v56, %v4665_v54 }
 0x177   : > { %v5314_v54 = vrot.slane %v4387_v22, 4  ;;  %v5315_v58 = vrot.slane %v4484_v55, 4  ;;  %v2069_v49 = vmul.f32 %v4559_v51, %v2054_v35  ;;  %v2458_v27 = vmul.f32 %v4510_v8, %v2453_v14 }
 0x178   : > { %v636_v10 = vadd.f32 %v632_v42, %v586_v30  ;;  %v732_v6 = vsel %vm730_vm9, %v729_v44, %v4588_v12  ;;  %v2105_v12 = vmul.f32 %v4580_v56, %v2102_v20  ;;  %v335_v13 = vadd.f32 %v332_v48, %v298_v7 }
 0x179   : > { %v2414_v23 = vpop.permute.xlu1 %2413  ;;  %v381_v30 = vsel %vm380_vm15, %v5315_v58, %v4484_v55  ;;  %vm2203_vm6 = vcmask 687104   ;;  %vm2254_vm15 = vcmask 695296   ;;  %v2502_v48 = vrot.slane %v4630_v38, 4 }
 0x17a   : > { %v4782_v39 = vrot.slane %v2414_v23, %v3769_v17  ;;  %1971 = vrot.lane.b32.xlu1 %v1967_v3, %s3429_s8  ;;  %v686_v3 = vadd.f32 %v682_v53, %v636_v10  ;;  %v4799_v57 = vpop.permute.xlu0 %1120  ;;  %v2120_v10 = vmul.f32 %v4572_v0, %v2105_v12  ;;  %s5340_s8 = smov 51  }
 0x17c   : > { %v2424_v45 = vmul.f32 %v4782_v39, %v2409_v34  ;;  %v2153_v34 = vsel %vm2152_vm7, %v5314_v54, %v4387_v22  ;;  %v736_v42 = vadd.f32 %v732_v6, %v686_v3 }
 0x17d   : > { %v4801_v23 = vpop.permute.xlu1 %775  ;;  %v2156_v35 = vmul.f32 %v4580_v56, %v2153_v34  ;;  %v531_v34 = vsel %vm530_vm3, %v529_v28, %v4611_v36  ;;  %v581_v36 = vsel %vm580_vm1, %v579_v47, %v4639_v29  ;;  %vm2182_vm1 = vcmask 785408  }
 0x17e   : > { %v779_v24 = vrot.slane %v4801_v23, 4  ;;  %2022 = vrot.lane.b32.xlu1 %v2018_v41, %s3401_s15  ;;  %2429 = vrot.lane.b32.xlu0 %v2424_v45, %s5313_s20  ;;  %v5316_v41 = vrot.slane %v4521_v52, 4  ;;  %v4837_v6 = vpop.permute.xlu0 %1168  ;;  %v5317_v45 = vrot.slane %v4420_v61, 4  ;;  %vm980_vm3 = vcmask 236544   ;;  %s3435_s15 = smov 77  }
 0x180   : > { %v782_v53 = vsel %vm780_vm8, %v779_v24, %v4615_v59  ;;  %v431_v55 = vsel %vm430_vm12, %v5316_v41, %v4521_v52  ;;  %v385_v59 = vadd.f32 %v381_v30, %v335_v13  ;;  %v2204_v7 = vsel %vm2203_vm6, %v5317_v45, %v4420_v61 }
 0x181   : > { %v786_v22 = vadd.f32 %v782_v53, %v736_v42  ;;  %v2463_v20 = vpop.permute.xlu1 %2462  ;;  %v5318_v52 = vrot.slane %v4584_v15, 4  ;;  %v2207_v61 = vmul.f32 %v4580_v56, %v2204_v7  ;;  %vm2305_vm6 = vcmask 703488  }
 0x182   : > { %v4832_v51 = vrot.slane %v2463_v20, %v3769_v17  ;;  %2073 = vrot.lane.b32.xlu1 %v2069_v49, %s3399_s11  ;;  %v435_v0 = vadd.f32 %v431_v55, %v385_v59  ;;  %s5319_s11 = smov 81   ;;  %v2171_v49 = vmul.f32 %v4597_v18, %v2156_v35  ;;  %v4868_v13 = vpop.permute.xlu0 %1217  ;;  %v631_v18 = vsel %vm630_vm14, %v629_v37, %v4670_v19 }
 0x183   : > { %v481_v3 = vsel %vm480_vm5, %v5318_v52, %v4584_v15  ;;  %v5320_v15 = vrot.slane %v4451_v60, 4  ;;  %v681_v19 = vsel %vm680_vm11, %v679_v4, %v4707_v33  ;;  %vm880_vm5 = vcmask 252928  }
 0x184   : > { %v2473_v54 = vmul.f32 %v4832_v51, %v2458_v27  ;;  %v485_v30 = vadd.f32 %v481_v3, %v435_v0  ;;  %v2507_v27 = vmul.f32 %v4510_v8, %v2502_v48  ;;  %v5323_v33 = vrot.slane %v4524_v21, 4 }
 0x185   : > { %v826_v12 = vpop.permute.xlu1 %825  ;;  %v2255_v58 = vsel %vm2254_vm15, %v5320_v15, %v4451_v60  ;;  %vm2131_vm11 = vcmask 793600   ;;  %vm2029_vm12 = vcmask 809984   ;;  %vm2552_vm14 = vcmask 818176  }
 0x186   : > { %v829_v42 = vrot.slane %v826_v12, 4  ;;  %2124 = vrot.lane.b32.xlu1 %v2120_v10, %s3398_s16  ;;  %2478 = vrot.lane.b32.xlu0 %v2473_v54, %s5319_s11  ;;  %v535_v53 = vadd.f32 %v531_v34, %v485_v30  ;;  %v2258_v29 = vmul.f32 %v4580_v56, %v2255_v58  ;;  %v2551_v10 = vrot.slane %v4657_v43, 4  ;;  %v4900_v52 = vpop.permute.xlu0 %1267  ;;  %s3433_s16 = smov 79  }
 0x187   : > { %v2356_v4 = vsel %vm2182_vm1, %v5323_v33, %v4524_v21  ;;  %v2602_v58 = vrot.slane %v4691_v11, 4  ;;  %vm2603_vm15 = vcmask 826368  }
 0x188   : > { %v832_v28 = vsel %vm830_vm4, %v829_v42, %v4643_v2  ;;  %v5321_v2 = vrot.slane %v4488_v31, 4  ;;  %v585_v55 = vadd.f32 %v581_v36, %v535_v53  ;;  %v2273_v3 = vmul.f32 %v4654_v1, %v2258_v29 }
 0x189   : > { %v2512_v60 = vpop.permute.xlu1 %2511  ;;  %v836_v20 = vadd.f32 %v832_v28, %v786_v22  ;;  %v2222_v22 = vmul.f32 %v4627_v9, %v2207_v61  ;;  %v831_v61 = vsel %vm830_vm4, %v829_v42, %v826_v12  ;;  %v2359_v1 = vmul.f32 %v4580_v56, %v2356_v4 }
 0x18a   : > { %v4875_v41 = vrot.slane %v2512_v60, %v3769_v17  ;;  %2175 = vrot.lane.b32.xlu1 %v2171_v49, %s3396_s22  ;;  %v2306_v47 = vsel %vm2305_vm6, %v5321_v2, %v4488_v31  ;;  %v635_v35 = vadd.f32 %v631_v18, %v585_v55  ;;  %v731_v31 = vsel %vm730_vm9, %v729_v44, %v4752_v40  ;;  %s5322_s22 = smov 80   ;;  %v4926_v49 = vpop.permute.xlu0 %1317 }
 0x18b   : > { %v2309_v9 = vmul.f32 %v4580_v56, %v2306_v47  ;;  %v2557_v40 = vmul.f32 %v4510_v8, %v2551_v10  ;;  %v781_v44 = vsel %vm780_vm8, %v779_v24, %v4801_v23  ;;  %v2405_v23 = vsel %vm2131_vm11, %v2404_v46, %v4568_v32 }
 0x18c   : > { %v2522_v37 = vmul.f32 %v4875_v41, %v2507_v27  ;;  %v685_v7 = vadd.f32 %v681_v19, %v635_v35  ;;  %vm930_vm8 = vcmask 244736   ;;  %vm2080_vm9 = vcmask 801792  }
 0x18d   : > { %v876_v59 = vpop.permute.xlu1 %875  ;;  %v2408_v32 = vmul.f32 %v4580_v56, %v2405_v23  ;;  %v2608_v46 = vmul.f32 %v4510_v8, %v2602_v58  ;;  %v2374_v28 = vmul.f32 %v4734_v16, %v2359_v1  ;;  %v2653_v18 = vrot.slane %v4737_v5, 4 }
 0x18e   : > { %v879_v45 = vrot.slane %v876_v59, 4  ;;  %2226 = vrot.lane.b32.xlu1 %v2222_v22, %s3430_s26  ;;  %2527 = vrot.lane.b32.xlu0 %v2522_v37, %s5322_s22  ;;  %v735_v0 = vadd.f32 %v731_v31, %v685_v7  ;;  %vm2654_vm4 = vcmask 834560   ;;  %v4941_v16 = vpop.permute.xlu0 %1366  ;;  %v1172_v23 = vrot.slane %v4837_v6, 4 }
 0x18f   : > { %v2423_v22 = vmul.f32 %v4782_v39, %v2408_v32  ;;  %vm5324_vm6 = vcmask 138240  }
 0x190   : > { %v882_v54 = vsel %vm880_vm5, %v879_v45, %v4674_v63  ;;  %v785_v24 = vadd.f32 %v781_v44, %v735_v0  ;;  %v2324_v63 = vmul.f32 %v4688_v26, %v2309_v9  ;;  %v881_v30 = vsel %vm880_vm5, %v879_v45, %v876_v59 }
 0x191   : > { %v2562_v21 = vpop.permute.xlu1 %2561  ;;  %v886_v34 = vadd.f32 %v882_v54, %v836_v20  ;;  %v2454_v20 = vsel %vm2080_vm9, %v2453_v14, %v4600_v50  ;;  %v2503_v50 = vsel %vm2029_vm12, %v2502_v48, %v4630_v38  ;;  %v2655_v14 = vsel %vm2654_vm4, %v2653_v18, %v4737_v5 }
 0x192   : > { %v4914_v15 = vrot.slane %v2562_v21, %v3769_v17  ;;  %2277 = vrot.lane.b32.xlu1 %v2273_v3, %s3431_s30  ;;  %v835_v42 = vadd.f32 %v831_v61, %v785_v24  ;;  %v2506_v39 = vmul.f32 %v4580_v56, %v2503_v50  ;;  %v2658_v59 = vmul.f32 %v4580_v56, %v2655_v14  ;;  %v4961_v45 = vpop.permute.xlu0 %1414  ;;  %s3100_s30 = sshll.u32 %s5344_s25, 4 }
 0x193   : > { %v2553_v48 = vsel %vm2552_vm14, %v2551_v10, %v4657_v43  ;;  %v1076_v54 = vrot.slane %v4762_v25, 4  ;;  %v1124_v21 = vrot.slane %v4799_v57, 4  ;;  %vm1222_vm5 = vcmask 121856  }
 0x194   : > { %v2572_v12 = vmul.f32 %v4914_v15, %v2557_v40  ;;  %v885_v26 = vadd.f32 %v881_v30, %v835_v42  ;;  %v2556_v7 = vmul.f32 %v4580_v56, %v2553_v48  ;;  %v2521_v3 = vmul.f32 %v4875_v41, %v2506_v39 }
 0x195   : > { %v926_v27 = vpop.permute.xlu1 %925  ;;  %v2604_v40 = vsel %vm2603_vm15, %v2602_v58, %v4691_v11  ;;  %v1077_v1 = vsel %vm752_vm10, %v1076_v54, %v4762_v25  ;;  %v5327_v5 = vmov 0   ;;  %vm5329_vm14 = vcmask 23552  }
 0x196   : > { %v929_v36 = vrot.slane %v926_v27, 4  ;;  %2328 = vrot.lane.b32.xlu1 %v2324_v63, %s3432_s14  ;;  %2577 = vrot.lane.b32.xlu0 %v2572_v12, %s3433_s16  ;;  %v4971_v10 = vpop.permute.xlu0 %1462  ;;  %v2607_v0 = vmul.f32 %v4580_v56, %v2604_v40  ;;  %v2571_v41 = vmul.f32 %v4914_v15, %v2556_v7  ;;  %v1221_v15 = vrot.slane %v4868_v13, 4 }
 0x197   : > { %vm5330_vm15 = vcmask 15360  }
 0x198   : > { %v931_v53 = vsel %vm930_vm8, %v929_v36, %v926_v27  ;;  %v932_v60 = vsel %vm930_vm8, %v929_v36, %v4713_v62  ;;  %v2457_v62 = vmul.f32 %v4580_v56, %v2454_v20  ;;  %v1125_v56 = vsel %vm5324_vm6, %v1124_v21, %v4799_v57  ;;  %v4994_v57 = vld [vmem:[%s5253_s6] sm:$0xf] }
 0x199   : > { %v935_v29 = vadd.f32 %v931_v53, %v885_v26  ;;  %v2613_v2 = vpop.permute.xlu1 %2612  ;;  %v936_v47 = vadd.f32 %v932_v60, %v886_v34  ;;  %vm5325_vm8 = vcmask 130048  }
 0x19a   : > { %v2620_v55 = vrot.slane %v2613_v2, %v3769_v17  ;;  %2378 = vrot.lane.b32.xlu1 %v2374_v28, %s3382_s23  ;;  %s3434_s23 = smov 78   ;;  %v2472_v31 = vmul.f32 %v4832_v51, %v2457_v62  ;;  %v4985_v12 = vpop.permute.xlu0 %1513  ;;  %v1173_v25 = vsel %vm5325_vm8, %v1172_v23, %v4837_v6  ;;  %v1223_v28 = vsel %vm1222_vm5, %v1221_v15, %v4868_v13  ;;  %vm5328_vm4 = vmmov %vm5325_vm8 }
 0x19b   : > { %vm1517_vm8 = vcmask 1043456  }
 0x19c   : > { %v2623_v19 = vmul.f32 %v2620_v55, %v2608_v46  ;;  %v2622_v30 = vmul.f32 %v2620_v55, %v2607_v0  ;;  %v2659_v46 = vmul.f32 %v4510_v8, %v2653_v18 }
 0x19d   : > { %v976_v37 = vpop.permute.xlu1 %975 }
 0x19e   : > { %v979_v35 = vrot.slane %v976_v37, 4  ;;  %2427 = vrot.lane.b32.xlu1 %v2423_v22, %s5313_s20  ;;  %2628 = vrot.lane.b32.xlu0 %v2623_v19, %s3434_s23  ;;  %v5005_v20 = vpop.permute.xlu0 %1563 }
 0x1a0   : > { %v981_v38 = vsel %vm980_vm3, %v979_v35, %v976_v37 }
 0x1a1   : > { %v985_v9 = vadd.f32 %v981_v38, %v935_v29  ;;  %v2664_v33 = vpop.permute.xlu1 %2663 }
 0x1a2   : > { %v2671_v4 = vrot.slane %v2664_v33, %v3769_v17  ;;  %2476 = vrot.lane.b32.xlu1 %v2472_v31, %s5319_s11  ;;  %v1465_v13 = vpop.permute.xlu0 %1464  ;;  %v1321_v33 = vrot.slane %v4926_v49, 4  ;;  %s278_s11 = scalar_lea.vmem %s5254_s7, %s3100_s30 }
 0x1a4   : > { %v2673_v51 = vmul.f32 %v2671_v4, %v2658_v59  ;;  %v2674_v2 = vmul.f32 %v2671_v4, %v2659_v46 }
 0x1a5   : > { %v1025_v44 = vpop.permute.xlu1 %1024 }
 0x1a6   : > { %v1028_v43 = vrot.slane %v1025_v44, 4  ;;  %2525 = vrot.lane.b32.xlu1 %v2521_v3, %s5322_s22  ;;  %2677 = vrot.lane.b32.xlu0 %v2673_v51, %s3435_s15  ;;  %v5012_v14 = vpop.permute.xlu0 %1616  ;;  %v1370_v51 = vrot.slane %v4941_v16, 4 }
 0x1a8   : > { %v1029_v34 = vsel %vm802_vm13, %v1028_v43, %v1025_v44 }
 0x1a9   : > { %v1033_v11 = vadd.f32 %v1029_v34, %v985_v9  ;;  %v978_v61 = vpop.permute.xlu1 %977  ;;  %v1271_v9 = vrot.slane %v4900_v52, 4 }
 0x1aa   : > { %v982_v24 = vsel %vm980_vm3, %v979_v35, %v978_v61  ;;  %2575 = vrot.lane.b32.xlu1 %v2571_v41, %s3433_s16  ;;  %v5014_v39 = vpop.permute.xlu0 %1667  ;;  %vm1322_vm3 = vcmask 105472  }
 0x1ab   : > { %v1081_v63 = vadd.f32 %v1077_v1, %v1033_v11  ;;  %v986_v58 = vadd.f32 %v982_v24, %v936_v47 }
 0x1ad   : > { %v1129_v42 = vadd.f32 %v1125_v56, %v1081_v63  ;;  %v1027_v27 = vpop.permute.xlu1 %1026 }
 0x1ae   : > { %v1030_v36 = vsel %vm802_vm13, %v1028_v43, %v1027_v27  ;;  %2626 = vrot.lane.b32.xlu1 %v2622_v30, %s3434_s23  ;;  %vm5326_vm13 = vmmov %vm5324_vm6  ;;  %v5016_v38 = vpop.permute.xlu0 %1718  ;;  %vm5331_vm6 = vcmask 7168  }
 0x1af   : > { %v1177_v32 = vadd.f32 %v1173_v25, %v1129_v42  ;;  %v1034_v26 = vadd.f32 %v1030_v36, %v986_v58 }
 0x1b1   : > { %v5001_v53 = vadd.f32 %v1223_v28, %v1177_v32  ;;  %v1075_v6 = vpop.permute.xlu1 %1074 }
 0x1b2   : > { %v1078_v60 = vsel %vm752_vm10, %v1076_v54, %v1075_v6  ;;  %2692 = vperm.xlu1 %3282, %v4994_v57   ;;  %vm1272_vm10 = vcmask 113664   ;;  %v5023_v7 = vpop.permute.xlu0 %1769  ;;  %v1418_v54 = vrot.slane %v4961_v45, 4 }
 0x1b3   : > { %v1082_v29 = vadd.f32 %v1078_v60, %v1034_v26 }
 0x1b5   : > { %v1123_v47 = vpop.permute.xlu1 %1122 }
 0x1b6   : > { %v1126_v55 = vsel %vm5326_vm13, %v1124_v21, %v1123_v47  ;;  %2679 = vrot.lane.b32.xlu1 %v2674_v2, %s3435_s15  ;;  %v5030_v34 = vpop.permute.xlu0 %1820  ;;  %v1273_v2 = vsel %vm1272_vm10, %v1271_v9, %v4900_v52  ;;  %vm5333_vm13 = vmmov %vm5330_vm15 }
 0x1b7   : > { %v1130_v8 = vadd.f32 %v1126_v55, %v1082_v29  ;;  %3283 = vset.pattern.permute.xlu1 %v5327_v5 }
 0x1b9   : > { %v1171_v18 = vpop.permute.xlu1 %1170 }
 0x1ba   : > { %v1174_v62 = vsel %vm5328_vm4, %v1172_v23, %v1171_v18  ;;  %v1466_v23 = vrot.slane %v4971_v10, 4  ;;  %v5036_v63 = vpop.permute.xlu0 %1871  ;;  %v1323_v18 = vsel %vm1322_vm3, %v1321_v33, %v4926_v49  ;;  %v1516_v49 = vrot.slane %v4985_v12, 4 }
 0x1bb   : > { %v1178_v22 = vadd.f32 %v1174_v62, %v1130_v8  ;;  %vm1519_vm4 = vcmask 1039360  }
 0x1bc   : > { %v1468_v24 = vsel %vm5331_vm6, %v1466_v23, %v1465_v13  ;;  %v1277_v13 = vadd.f32 %v1273_v2, %v5001_v53 }
 0x1bd   : > { %v1220_v19 = vpop.permute.xlu1 %1219 }
 0x1be   : > { %v1224_v50 = vsel %vm1222_vm5, %v1221_v15, %v1220_v19  ;;  %v5043_v42 = vpop.permute.xlu0 %1922  ;;  %v1327_v19 = vadd.f32 %v1323_v18, %v1277_v13  ;;  %vm5332_vm5 = vmmov %vm5329_vm14  ;;  %v1823_v13 = vrot.slane %v5030_v34, 4 }
 0x1bf   : > { %v1228_v37 = vadd.f32 %v1224_v50, %v1178_v22  ;;  %v1371_v52 = vsel %vm5332_vm5, %v1370_v51, %v4941_v16  ;;  %vm1774_vm5 = vcmask 924672  }
 0x1c1   : > { %v1270_v35 = vpop.permute.xlu1 %1269 }
 0x1c2   : > { %v1274_v4 = vsel %vm1272_vm10, %v1271_v9, %v1270_v35  ;;  %v5047_v36 = vpop.permute.xlu0 %1973  ;;  %v1419_v9 = vsel %vm5333_vm13, %v1418_v54, %v4961_v45  ;;  %vm1570_vm10 = vcmask 1031168   ;;  %vm1825_vm13 = vcmask 916480  }
 0x1c3   : > { %v1278_v44 = vadd.f32 %v1274_v4, %v1228_v37 }
 0x1c5   : > { %v1320_v59 = vpop.permute.xlu1 %1319 }
 0x1c6   : > { %v1324_v40 = vsel %vm1322_vm3, %v1321_v33, %v1320_v59  ;;  %v5055_v6 = vpop.permute.xlu0 %2024  ;;  %v1375_v59 = vadd.f32 %v1371_v52, %v1327_v19  ;;  %vm5334_vm3 = vmmov %vm5331_vm6  ;;  %vm1723_vm6 = vcmask 932864  }
 0x1c7   : > { %v1328_v0 = vadd.f32 %v1324_v40, %v1278_v44 }
 0x1c9   : > { %v1369_v31 = vpop.permute.xlu1 %1368 }
 0x1ca   : > { %v1372_v43 = vsel %vm5329_vm14, %v1370_v51, %v1369_v31  ;;  %v5062_v47 = vpop.permute.xlu0 %2075  ;;  %v1423_v51 = vadd.f32 %v1419_v9, %v1375_v59  ;;  %vm1621_vm14 = vcmask 1022976   ;;  %v1874_v59 = vrot.slane %v5036_v63, 4 }
 0x1cb   : > { %v1376_v11 = vadd.f32 %v1372_v43, %v1328_v0 }
 0x1cd   : > { %v5018_v48 = vpop.permute.xlu1 %1511 }
 0x1ce   : > { %v5073_v50 = vpop.permute.xlu0 %2126  ;;  %v1515_v53 = vrot.slane %v5018_v48, 4 }
 0x1d0   : > { %v1518_v40 = vsel %vm1517_vm8, %v1515_v53, %v1516_v49 }
 0x1d1   : > { %v1417_v3 = vpop.permute.xlu1 %1416  ;;  %v1520_v0 = vsel %vm1519_vm4, %v5018_v48, %v1518_v40  ;;  %vm1876_vm4 = vcmask 908288  }
 0x1d2   : > { %v1420_v41 = vsel %vm5330_vm15, %v1418_v54, %v1417_v3  ;;  %v5084_v33 = vpop.permute.xlu0 %2177  ;;  %v1567_v3 = vrot.slane %v5005_v20, 4  ;;  %v1467_v54 = vsel %vm5334_vm3, %v1466_v23, %v4971_v10  ;;  %vm1672_vm15 = vcmask 941056  }
 0x1d3   : > { %v1424_v61 = vadd.f32 %v1420_v41, %v1376_v11  ;;  %v1670_v11 = vrot.slane %v5014_v39, 4  ;;  %v1721_v10 = vrot.slane %v5016_v38, 4  ;;  %vm1978_vm3 = vcmask 891904  }
 0x1d5   : > { %v1566_v21 = vpop.permute.xlu1 %1565  ;;  %v1472_v58 = vadd.f32 %v1468_v24, %v1424_v61  ;;  %v1471_v61 = vadd.f32 %v1467_v54, %v1423_v51 }
 0x1d6   : > { %v1568_v31 = vrot.slane %v1566_v21, 4 }
 0x1d7   : > { %v1524_v15 = vadd.f32 %v4985_v12, %v1472_v58  ;;  %v1619_v12 = vrot.slane %v5012_v14, 4  ;;  %v5104_v58 = vpop.permute.xlu0 %2228  ;;  %v1523_v48 = vadd.f32 %v1520_v0, %v1471_v61 }
 0x1d8   : > { %v1569_v43 = vsel %vm1517_vm8, %v1567_v3, %v1568_v31  ;;  %v1925_v31 = vrot.slane %v5043_v42, 4 }
 0x1d9   : > { %v5032_v1 = vpop.permute.xlu1 %1614  ;;  %v1575_v27 = vadd.f32 %v1566_v21, %v1524_v15  ;;  %v1571_v15 = vsel %vm1570_vm10, %v5005_v20, %v1569_v43  ;;  %vm1927_vm10 = vcmask 900096  }
 0x1da   : > { %v1618_v44 = vrot.slane %v5032_v1, 4  ;;  %v1574_v2 = vadd.f32 %v1571_v15, %v1523_v48 }
 0x1db   : > { %v1626_v32 = vadd.f32 %v5012_v14, %v1575_v27  ;;  %v5122_v52 = vpop.permute.xlu0 %2279 }
 0x1dc   : > { %v1620_v14 = vsel %vm1517_vm8, %v1618_v44, %v1619_v12  ;;  %v1976_v44 = vrot.slane %v5047_v36, 4 }
 0x1dd   : > { %v5038_v56 = vpop.permute.xlu1 %1665  ;;  %v1677_v46 = vadd.f32 %v5014_v39, %v1626_v32  ;;  %v1622_v39 = vsel %vm1621_vm14, %v5032_v1, %v1620_v14  ;;  %v2078_v14 = vrot.slane %v5062_v47, 4  ;;  %vm2633_vm14 = vcmask 637952  }
 0x1de   : > { %v1669_v45 = vrot.slane %v5038_v56, 4  ;;  %v1625_v18 = vadd.f32 %v1622_v39, %v1574_v2 }
 0x1df   : > { %v1728_v60 = vadd.f32 %v5016_v38, %v1677_v46 }
 0x1e0   : > { %v1671_v23 = vsel %vm1517_vm8, %v1669_v45, %v1670_v11  ;;  %v5135_v51 = vpop.permute.xlu0 %2330  ;;  %v2027_v45 = vrot.slane %v5055_v6, 4 }
 0x1e1   : > { %v5041_v30 = vpop.permute.xlu1 %1716  ;;  %v1779_v55 = vadd.f32 %v5023_v7, %v1728_v60  ;;  %v1772_v60 = vrot.slane %v5023_v7, 4  ;;  %v1673_v38 = vsel %vm1672_vm15, %v5038_v56, %v1671_v23  ;;  %vm5339_vm15 = vcmask 130048  }
 0x1e2   : > { %v1720_v24 = vrot.slane %v5041_v30, 4  ;;  %v1676_v56 = vadd.f32 %v1673_v38, %v1625_v18 }
 0x1e3   : > { %v1830_v62 = vadd.f32 %v5030_v34, %v1779_v55 }
 0x1e4   : > { %v1722_v20 = vsel %vm1517_vm8, %v1720_v24, %v1721_v10  ;;  %v2129_v10 = vrot.slane %v5073_v50, 4 }
 0x1e5   : > { %v5045_v25 = vpop.permute.xlu1 %1767  ;;  %v1881_v37 = vadd.f32 %v5036_v63, %v1830_v62  ;;  %v1724_v7 = vsel %vm1723_vm6, %v5041_v30, %v1722_v20  ;;  %vm5341_vm6 = vcmask 416768  }
 0x1e6   : > { %v1771_v27 = vrot.slane %v5045_v25, 4  ;;  %v1727_v9 = vadd.f32 %v1724_v7, %v1676_v56  ;;  %v2333_v56 = vrot.slane %v5135_v51, 4 }
 0x1e7   : > { %v1932_v4 = vadd.f32 %v5043_v42, %v1881_v37 }
 0x1e8   : > { %v1773_v62 = vsel %vm1517_vm8, %v1771_v27, %v1772_v60  ;;  %v2381_v11 = vpop.permute.xlu0 %2380  ;;  %v2180_v60 = vrot.slane %v5084_v33, 4 }
 0x1e9   : > { %v5050_v26 = vpop.permute.xlu1 %1818  ;;  %v1983_v21 = vadd.f32 %v5047_v36, %v1932_v4  ;;  %v1775_v49 = vsel %vm1774_vm5, %v5045_v25, %v1773_v62 }
 0x1ea   : > { %v1822_v55 = vrot.slane %v5050_v26, 4  ;;  %v1778_v25 = vadd.f32 %v1775_v49, %v1727_v9 }
 0x1eb   : > { %v2034_v32 = vadd.f32 %v5055_v6, %v1983_v21 }
 0x1ec   : > { %v1824_v53 = vsel %vm1517_vm8, %v1822_v55, %v1823_v13  ;;  %v2231_v55 = vrot.slane %v5104_v58, 4 }
 0x1ed   : > { %v5053_v28 = vpop.permute.xlu1 %1869  ;;  %v2085_v19 = vadd.f32 %v5062_v47, %v2034_v32  ;;  %v1826_v63 = vsel %vm1825_vm13, %v5050_v26, %v1824_v53 }
 0x1ee   : > { %v1873_v1 = vrot.slane %v5053_v28, 4  ;;  %v1829_v54 = vadd.f32 %v1826_v63, %v1778_v25 }
 0x1ef   : > { %v2136_v3 = vadd.f32 %v5073_v50, %v2085_v19  ;;  %v2282_v19 = vrot.slane %v5122_v52, 4 }
 0x1f0   : > { %v1875_v4 = vsel %vm1517_vm8, %v1873_v1, %v1874_v59 }
 0x1f1   : > { %v5058_v29 = vpop.permute.xlu1 %1920  ;;  %v1877_v43 = vsel %vm1876_vm4, %v5053_v28, %v1875_v4  ;;  %v2187_v21 = vadd.f32 %v5084_v33, %v2136_v3  ;;  %v2383_v4 = vrot.slane %v2381_v11, 4 }
 0x1f2   : > { %v1924_v34 = vrot.slane %v5058_v29, 4  ;;  %v1880_v24 = vadd.f32 %v1877_v43, %v1829_v54 }
 0x1f3   : > { %v2238_v32 = vadd.f32 %v5104_v58, %v2187_v21 }
 0x1f4   : > { %v1926_v12 = vsel %vm1517_vm8, %v1924_v34, %v1925_v31 }
 0x1f5   : > { %v5065_v8 = vpop.permute.xlu1 %1971  ;;  %v1928_v36 = vsel %vm1927_vm10, %v5058_v29, %v1926_v12  ;;  %v2430_v29 = vpop.permute.xlu0 %2429 }
 0x1f6   : > { %v1975_v30 = vrot.slane %v5065_v8, 4  ;;  %v1931_v48 = vadd.f32 %v1928_v36, %v1880_v24 }
 0x1f8   : > { %v1977_v0 = vsel %vm1517_vm8, %v1975_v30, %v1976_v44  ;;  %v2432_v44 = vrot.slane %v2430_v29, 4 }
 0x1f9   : > { %v5071_v22 = vpop.permute.xlu1 %2022  ;;  %v1979_v6 = vsel %vm1978_vm3, %v5065_v8, %v1977_v0  ;;  %v2479_v62 = vpop.permute.xlu0 %2478 }
 0x1fa   : > { %v2026_v42 = vrot.slane %v5071_v22, 4  ;;  %v1982_v2 = vadd.f32 %v1979_v6, %v1931_v48 }
 0x1fc   : > { %v2028_v15 = vsel %vm1517_vm8, %v2026_v42, %v2027_v45 }
 0x1fd   : > { %v5078_v35 = vpop.permute.xlu1 %2073  ;;  %v2030_v47 = vsel %vm2029_vm12, %v5071_v22, %v2028_v15  ;;  %v2289_v22 = vadd.f32 %v5122_v52, %v2238_v32  ;;  %vm2233_vm12 = vcmask 777216  }
 0x1fe   : > { %v2077_v26 = vrot.slane %v5078_v35, 4  ;;  %v2033_v38 = vadd.f32 %v2030_v47, %v1982_v2 }
 0x200   : > { %v2079_v23 = vsel %vm1517_vm8, %v2077_v26, %v2078_v14  ;;  %v2528_v31 = vpop.permute.xlu0 %2527 }
 0x201   : > { %v5087_v16 = vpop.permute.xlu1 %2124  ;;  %v2081_v50 = vsel %vm2080_vm9, %v5078_v35, %v2079_v23  ;;  %vm2284_vm9 = vcmask 769024   ;;  %v2530_v14 = vrot.slane %v2528_v31, 4 }
 0x202   : > { %v2128_v28 = vrot.slane %v5087_v16, 4  ;;  %v2084_v7 = vadd.f32 %v2081_v50, %v2033_v38 }
 0x204   : > { %v2130_v20 = vsel %vm1517_vm8, %v2128_v28, %v2129_v10 }
 0x205   : > { %v5099_v41 = vpop.permute.xlu1 %2175  ;;  %v2132_v33 = vsel %vm2131_vm11, %v5087_v16, %v2130_v20  ;;  %v2340_v16 = vadd.f32 %v5135_v51, %v2289_v22  ;;  %vm2335_vm11 = vcmask 760832  }
 0x206   : > { %v2179_v27 = vrot.slane %v5099_v41, 4  ;;  %v2135_v53 = vadd.f32 %v2132_v33, %v2084_v7 }
 0x207   : > { %v2389_v43 = vadd.f32 %v2381_v11, %v2340_v16 }
 0x208   : > { %v2181_v13 = vsel %vm1517_vm8, %v2179_v27, %v2180_v60  ;;  %v2578_v45 = vpop.permute.xlu0 %2577 }
 0x209   : > { %v5112_v46 = vpop.permute.xlu1 %2226  ;;  %v2183_v59 = vsel %vm2182_vm1, %v5099_v41, %v2181_v13  ;;  %v2438_v28 = vadd.f32 %v2430_v29, %v2389_v43  ;;  %v2580_v48 = vrot.slane %v2578_v45, 4  ;;  %vm5335_vm1 = vcmask 654336  }
 0x20a   : > { %v2230_v8 = vrot.slane %v5112_v46, 4  ;;  %v2186_v30 = vadd.f32 %v2183_v59, %v2135_v53 }
 0x20b   : > { %v2487_v29 = vadd.f32 %v2479_v62, %v2438_v28 }
 0x20c   : > { %v2232_v35 = vsel %vm1517_vm8, %v2230_v8, %v2231_v55 }
 0x20d   : > { %v5125_v37 = vpop.permute.xlu1 %2277  ;;  %v2234_v52 = vsel %vm2233_vm12, %v5112_v46, %v2232_v35  ;;  %v2481_v46 = vrot.slane %v2479_v62, 4  ;;  %v2536_v38 = vadd.f32 %v2528_v31, %v2487_v29 }
 0x20e   : > { %v2281_v18 = vrot.slane %v5125_v37, 4  ;;  %v2237_v25 = vadd.f32 %v2234_v52, %v2186_v30  ;;  %v5200_v30 = vld [vmem:[%s5253_s6] sm:$0xff] }
 0x20f   : > { %v2587_v33 = vadd.f32 %v2578_v45, %v2536_v38 }
 0x210   : > { %v2283_v34 = vsel %vm1517_vm8, %v2281_v18, %v2282_v19  ;;  %v2629_v6 = vpop.permute.xlu0 %2628 }
 0x211   : > { %v5138_v40 = vpop.permute.xlu1 %2328  ;;  %v2285_v41 = vsel %vm2284_vm9, %v5125_v37, %v2283_v34  ;;  %v2631_v47 = vrot.slane %v2629_v6, 4  ;;  %v2638_v35 = vadd.f32 %v2629_v6, %v2587_v33 }
 0x212   : > { %v2332_v58 = vrot.slane %v5138_v40, 4  ;;  %v2288_v0 = vadd.f32 %v2285_v41, %v2237_v25 }
 0x214   : > { %v2334_v3 = vsel %vm1517_vm8, %v2332_v58, %v2333_v56 }
 0x215   : > { %v2379_v61 = vpop.permute.xlu1 %2378  ;;  %v2336_v51 = vsel %vm2335_vm11, %v5138_v40, %v2334_v3  ;;  %v5336_v3 = vmov 1  }
 0x216   : > { %v2382_v49 = vrot.slane %v2379_v61, 4  ;;  %v2339_v24 = vadd.f32 %v2336_v51, %v2288_v0 }
 0x218   : > { %v2384_v12 = vsel %vm1517_vm8, %v2382_v49, %v2383_v4  ;;  %v2678_v50 = vpop.permute.xlu0 %2677 }
 0x219   : > { %v2428_v39 = vpop.permute.xlu1 %2427  ;;  %v2385_v36 = vsel %vm2152_vm7, %v2379_v61, %v2384_v12  ;;  %vm2582_vm7 = vcmask 646144  }
 0x21a   : > { %v2431_v63 = vrot.slane %v2428_v39, 4  ;;  %v2388_v40 = vadd.f32 %v2385_v36, %v2339_v24 }
 0x21c   : > { %v2433_v26 = vsel %vm1517_vm8, %v2431_v63, %v2432_v44  ;;  %v5337_v63 = vmov 2  }
 0x21d   : > { %v2477_v1 = vpop.permute.xlu1 %2476  ;;  %v2434_v11 = vsel %vm2101_vm0, %v2428_v39, %v2433_v26  ;;  %vm2684_vm0 = vcmask 629760  }
 0x21e   : > { %v2480_v42 = vrot.slane %v2477_v1, 4  ;;  %v2437_v60 = vadd.f32 %v2434_v11, %v2388_v40 }
 0x220   : > { %v2482_v37 = vsel %vm1517_vm8, %v2480_v42, %v2481_v46 }
 0x221   : > { %v2526_v9 = vpop.permute.xlu1 %2525  ;;  %v2483_v32 = vsel %vm2050_vm2, %v2477_v1, %v2482_v37  ;;  %v2681_v1 = vrot.slane %v2678_v50, 4  ;;  %vm2742_vm2 = vcmask 1041408  }
 0x222   : > { %v2529_v21 = vrot.slane %v2526_v9, 4  ;;  %v2486_v8 = vadd.f32 %v2483_v32, %v2437_v60 }
 0x224   : > { %v2531_v23 = vsel %vm1517_vm8, %v2529_v21, %v2530_v14 }
 0x225   : > { %v2576_v54 = vpop.permute.xlu1 %2575  ;;  %v2532_v2 = vsel %vm5335_vm1, %v2526_v9, %v2531_v23 }
 0x226   : > { %v2579_v15 = vrot.slane %v2576_v54, 4  ;;  %v2535_v13 = vadd.f32 %v2532_v2, %v2486_v8 }
 0x228   : > { %v2581_v61 = vsel %vm1517_vm8, %v2579_v15, %v2580_v48 }
 0x229   : > { %v2627_v10 = vpop.permute.xlu1 %2626  ;;  %v2583_v55 = vsel %vm2582_vm7, %v2576_v54, %v2581_v61 }
 0x22a   : > { %v2630_v27 = vrot.slane %v2627_v10, 4  ;;  %v2586_v19 = vadd.f32 %v2583_v55, %v2535_v13 }
 0x22c   : > { %v2632_v39 = vsel %vm1517_vm8, %v2630_v27, %v2631_v47 }
 0x22d   : > { %v2693_v20 = vpop.permute.xlu1 %2692  ;;  %v2634_v18 = vsel %vm2633_vm14, %v2627_v10, %v2632_v39 }
 0x22e   : > { %v2637_v58 = vadd.f32 %v2634_v18, %v2586_v19  ;;  %v2700_v56 = vrot.slane %v2693_v20, %v3769_v17  ;;  %v283_v17 = vld [vmem:[%s5253_s6 + $0x8] sm:$0xff] }
 0x231   : > { %v2680_v22 = vpop.permute.xlu1 %2679 }
 0x232   : > { %v2682_v7 = vrot.slane %v2680_v22, 4  ;;  %v2689_v34 = vadd.f32 %v2680_v22, %v2638_v35 }
 0x234   : > { %v2683_v59 = vsel %vm1517_vm8, %v2681_v1, %v2682_v7  ;;  %v2703_v16 = vadd.f32 %v2700_v56, %v2689_v34  ;;  %vm5338_vm8 = vcmask 31744  }
 0x235   : > { %v2685_v62 = vsel %vm2684_vm0, %v2678_v50, %v2683_v59  ;;  %vm5342_vm5 = vmmov %vm5338_vm8 }
 0x236   : > { %v2688_v53 = vadd.f32 %v2685_v62, %v2637_v58  ;;  %v2711_v4 = vpack.c.bf16 %v2703_v16, %v2703_v16  ;;  %v2828_v16 = vld [vmem:[%s5251_s4] sm:$0x3] }
 0x238   : > { %v2702_v49 = vadd.f32 %v2700_v56, %v2688_v53 }
 0x23a   : > { %v2709_v31 = vpack.c.bf16 %v2702_v49, %v2702_v49  ;;  %v2707_v52 = vcombine.high %v2702_v49, %v2702_v49 }
 0x23c   : > { %2730 = vrot.lane.b32.xlu0 %v2709_v31, %s3435_s15  ;;  %v2710_v9 = vpack.c.bf16 %v2707_v52, %v2707_v52 }
 0x23e   : > { %2732 = vrot.lane.b32.xlu1 %v2710_v9, %s3435_s15 }
 0x240   : > { %2734 = vrot.lane.b32.xlu0 %v2711_v4, %s3435_s15 }
 0x242   : > { %2714 = vperm.xlu1 %3283, %v5200_v30  }
 0x244   : > { %2719 = vperm.xlu0 %3284, %v283_v17  }
 0x246   : > { %3285 = vset.pattern.permute.xlu1 %v5336_v3 }
 0x247   : > { %2832 = vperm.xlu1 %3285, %v4994_v57   ;;  %v3288_v57 = vld [vmem:[%s5250_s3] sm:$0xff]  }
 0x248   : > { %3287 = vset.pattern.permute.xlu0 %v5337_v63 }
 0x24b   : > { %3286 = vset.pattern.permute.xlu1 %v5337_v63 }
 0x2ae   : > { %v2731_v41 = vpop.permute.xlu0 %2730 }
 0x2b0   : > { %v2733_v44 = vpop.permute.xlu1 %2732 }
 0x2b1   : > { %v2737_v25 = vsel %vm2684_vm0, %v2731_v41, %v2733_v44 }
 0x2b2   : > { %v2735_v12 = vpop.permute.xlu0 %2734  ;;  %v2744_v43 = vsel %vm2742_vm2, %v2737_v25, 0 }
 0x2b3   : > { %v2738_v42 = vsel %vm2684_vm0, %v2733_v44, %v2735_v12 }
 0x2b4   : > { %3093 = vmatprep.subr.msk.bf16.mxu0 %vm2742_vm2, %v2738_v42  ;;  %v3303_v42 = vld [vmem:[%s3760_s28 + $0x8] sm:$0xf] }
 0x2b5   : > { %2764 = vmatpush1.bf16.msra.mxu0 %v2744_v43 }
 0x2b8   : > { %3094 = vmatmul.mubr.msk.bf16.vlgmr.msra.gmra.mxu0 %vm5338_vm8, %v3288_v57  ;;  %v3304_v57 = vld [vmem:[%s3760_s28] sm:$0xff] }
 0x2b9   : > { %2971 = vmatprep.mubr.bf16.mxu0 %v5327_v5 }
 0x2bd   : > { %v2715_v45 = vpop.permute.xlu1 %2714 }
 0x2bf   : > { %v2720_v0 = vpop.permute.xlu0 %2719 }
 0x2c2   : > { %v2833_v52 = vpop.permute.xlu1 %2832 }
 0x378   : > { %v2783_v51 = vpop.f32.mrf.mxu0 }
 0x379   : > { %v2784_v54 = vadd.f32 %v2783_v51, %v2715_v45 }
 0x37a   : > { %v2785_v46 = vpop.f32.mrf.mxu0 }
 0x37b   : > { %v2796_v26 = vmul.f32 %v2784_v54, %v2784_v54  ;;  %v2786_v21 = vadd.f32 %v2785_v46, %v2715_v45  ;;  %v2792_v58 = vmul.f32 0.5, %v2784_v54 }
 0x37c   : > { %v2787_v36 = vpop.f32.mrf.mxu0 }
 0x37d   : > { %v2800_v14 = vmul.f32 %v2796_v26, %v2784_v54  ;;  %v2797_v24 = vmul.f32 %v2786_v21, %v2786_v21  ;;  %v2788_v37 = vadd.f32 %v2787_v36, %v2720_v0  ;;  %v2793_v19 = vmul.f32 0.5, %v2786_v21 }
 0x37e   : > { %v2789_v15 = vpop.f32.mrf.mxu0 }
 0x37f   : > { %v2804_v28 = vmul.f32 0.044715, %v2800_v14  ;;  %v2801_v6 = vmul.f32 %v2797_v24, %v2786_v21  ;;  %v2798_v11 = vmul.f32 %v2788_v37, %v2788_v37  ;;  %v2790_v10 = vadd.f32 %v2789_v15, %v2720_v0 }
 0x380   : > { %v2794_v33 = vmul.f32 0.5, %v2788_v37 }
 0x381   : > { %v2808_v48 = vadd.f32 %v2804_v28, %v2784_v54  ;;  %v2805_v40 = vmul.f32 0.044715, %v2801_v6  ;;  %v2802_v23 = vmul.f32 %v2798_v11, %v2788_v37  ;;  %v2799_v5 = vmul.f32 %v2790_v10, %v2790_v10 }
 0x382   : > { %v2795_v7 = vmul.f32 0.5, %v2790_v10 }
 0x383   : > { %v2806_v27 = vmul.f32 0.044715, %v2802_v23  ;;  %v2803_v32 = vmul.f32 %v2799_v5, %v2790_v10  ;;  %v2809_v47 = vadd.f32 %v2805_v40, %v2786_v21  ;;  %v2812_v60 = vmul.f32 0.7978846, %v2808_v48 }
 0x385   : > { %v2810_v61 = vadd.f32 %v2806_v27, %v2788_v37  ;;  %v2807_v2 = vmul.f32 0.044715, %v2803_v32  ;;  %v2813_v20 = vmul.f32 0.7978846, %v2809_v47 }
 0x387   : > { %v2814_v29 = vmul.f32 0.7978846, %v2810_v61  ;;  %v2811_v8 = vadd.f32 %v2807_v2, %v2790_v10  ;;  %3289 = vtanh.f32 %v2813_v20 }
 0x388   : > { %3291 = vtanh.f32 %v2812_v60 }
 0x389   : > { %v2815_v39 = vmul.f32 0.7978846, %v2811_v8  ;;  %3293 = vtanh.f32 %v2814_v29 }
 0x38b   : > { %3295 = vtanh.f32 %v2815_v39  ;;  %v2908_v39 = vld [vmem:[%s5252_s5] sm:$0xf] }
 0x394   : > { %v3290_v50 = vpop.eup %3289 }
 0x395   : > { %v3292_v55 = vpop.eup %3291  ;;  %v2821_v13 = vadd.f32 1.0, %v3290_v50 }
 0x396   : > { %v3294_v38 = vpop.eup %3293  ;;  %v2820_v1 = vadd.f32 1.0, %v3292_v55 }
 0x397   : > { %v2822_v18 = vadd.f32 1.0, %v3294_v38  ;;  %v2825_v62 = vmul.f32 %v2821_v13, %v2793_v19 }
 0x398   : > { %v3296_v22 = vpop.eup %3295  ;;  %v2824_v53 = vmul.f32 %v2820_v1, %v2792_v58 }
 0x399   : > { %v2823_v35 = vadd.f32 1.0, %v3296_v22  ;;  %v2826_v59 = vmul.f32 %v2822_v18, %v2794_v33 }
 0x39b   : > { %v2827_v56 = vmul.f32 %v2823_v35, %v2795_v7  ;;  %v2829_v49 = vpack.c.bf16 %v2826_v59, %v2824_v53 }
 0x39d   : > { %v2830_v34 = vpack.c.bf16 %v2827_v56, %v2825_v62 }
 0x39f   : > { %2852 = vmatprep.subr.bf16.mxu1 %v2830_v34 }
 0x3a0   : > { %2853 = vmatpush1.bf16.msra.mxu1 %v2829_v49 }
 0x3a3   : > { %3095 = vmatmul.mubr.msk.bf16.vlgmr.msra.gmra.mxu1 %vm5339_vm15, %v2828_v16 }
 0x463   : > { %v2872_v31 = vpop.f32.mrf.mxu1 }
 0x464   : > { %v2873_v4 = vadd.f32 %v2872_v31, %v2833_v52 }
 0x465   : > { %v2874_v9 = vpop.f32.mrf.mxu1 }
 0x466   : > { %v2875_v17 = vadd.f32 %v2874_v9, %v2833_v52 }
 0x467   : > { %v2876_v3 = vpop.f32.mrf.mxu1 }
 0x468   : > { %v2881_v63 = vcombine.low %v2873_v4, %v2875_v17 }
 0x469   : > { %v2877_v41 = vpop.f32.mrf.mxu1 }
 0x46a   : > { %2882 = vrot.lane.b32.xlu1 %v2881_v63, %s5340_s8 }
 0x4dc   : > { %v2883_v44 = vpop.permute.xlu1 %2882 }
 0x4dd   : > { %v2884_v25 = vrot.slane %v2883_v44, 4 }
 0x4df   : > { %v2885_v12 = vsel %vm5341_vm6, %v2884_v25, %v2883_v44  ;;  %v2889_v43 = vadd.f32 %v3303_v42, %v2884_v25 }
 0x4e0   : > { %v2888_v45 = vadd.f32 %v3304_v57, %v2885_v12 }
 0x4e1   : > { %v2893_v51 = vmul.f32 %v2889_v43, %v2889_v43  ;;  %v2891_v40 = vmul.f32 0.5, %v2889_v43 }
 0x4e2   : > { %v2892_v54 = vmul.f32 %v2888_v45, %v2888_v45  ;;  %v2890_v6 = vmul.f32 0.5, %v2888_v45 }
 0x4e3   : > { %v2895_v46 = vmul.f32 %v2893_v51, %v2889_v43 }
 0x4e4   : > { %v2894_v0 = vmul.f32 %v2892_v54, %v2888_v45 }
 0x4e5   : > { %v2897_v26 = vmul.f32 0.044715, %v2895_v46 }
 0x4e6   : > { %v2896_v21 = vmul.f32 0.044715, %v2894_v0 }
 0x4e7   : > { %v2899_v36 = vadd.f32 %v2897_v26, %v2889_v43 }
 0x4e8   : > { %v2898_v14 = vadd.f32 %v2896_v21, %v2888_v45 }
 0x4e9   : > { %v2901_v24 = vmul.f32 0.7978846, %v2899_v36 }
 0x4ea   : > { %v2900_v37 = vmul.f32 0.7978846, %v2898_v14 }
 0x4eb   : > { %3297 = vtanh.f32 %v2901_v24 }
 0x4ec   : > { %3299 = vtanh.f32 %v2900_v37 }
 0x4f8   : > { %v3298_v15 = vpop.eup %3297 }
 0x4f9   : > { %v3300_v28 = vpop.eup %3299  ;;  %v2905_v10 = vadd.f32 1.0, %v3298_v15 }
 0x4fa   : > { %v2904_v11 = vadd.f32 1.0, %v3300_v28 }
 0x4fb   : > { %v2907_v27 = vmul.f32 %v2905_v10, %v2891_v40 }
 0x4fc   : > { %v2906_v48 = vmul.f32 %v2904_v11, %v2890_v6 }
 0x4fd   : > { %v2914_v47 = vpack.c.bf16 %v2907_v27, %v2907_v27 }
 0x4fe   : > { %v2912_v23 = vpack.c.bf16 %v2906_v48, %v2906_v48  ;;  %v2910_v5 = vcombine.high %v2906_v48, %v2906_v48 }
 0x500   : > { %2922 = vrot.lane.b32.xlu0 %v2912_v23, %s3435_s15  ;;  %v2913_v32 = vpack.c.bf16 %v2910_v5, %v2910_v5 }
 0x502   : > { %2924 = vrot.lane.b32.xlu1 %v2913_v32, %s3435_s15 }
 0x504   : > { %2926 = vrot.lane.b32.xlu0 %v2914_v47, %s3435_s15 }
 0x506   : > { %2916 = vperm.xlu1 %3286, %v5200_v30  }
 0x572   : > { %v2923_v60 = vpop.permute.xlu0 %2922 }
 0x574   : > { %v2925_v61 = vpop.permute.xlu1 %2924 }
 0x575   : > { %v2928_v2 = vsel %vm2684_vm0, %v2923_v60, %v2925_v61 }
 0x576   : > { %v2927_v20 = vpop.permute.xlu0 %2926  ;;  %v2934_v8 = vsel %vm2742_vm2, %v2928_v2, 0 }
 0x577   : > { %v2929_v29 = vsel %vm2684_vm0, %v2925_v61, %v2927_v20 }
 0x578   : > { %3096 = vmatprep.subr.msk.bf16.mxu0 %vm2742_vm2, %v2929_v29 }
 0x579   : > { %2954 = vmatpush1.bf16.msra.mxu0 %v2934_v8 }
 0x57c   : > { %3097 = vmatmul.mubr.msk.bf16.vlgmr.msra.gmra.mxu0 %vm5342_vm5, %v2908_v39 }
 0x581   : > { %v2917_v30 = vpop.permute.xlu1 %2916 }
 0x63c   : > { %v2973_v50 = vpop.f32.mrf.mxu0 }
 0x63d   : > { %v2974_v55 = vadd.f32 %v2973_v50, %v2917_v30 }
 0x63e   : > { %v2975_v38 = vpop.f32.mrf.mxu0 }
 0x63f   : > { %v2976_v13 = vadd.f32 %v2975_v38, %v2917_v30  ;;  %2980 = vst [vmem:[%s278_s11] sm:$0xff] %v2974_v55 }
 0x640   : > { %v2977_v18 = vpop.f32.mrf.mxu0 }
 0x641   : > { %2981 = vst [vmem:[%s278_s11 + $0x8] sm:$0xff] %v2976_v13 }
 0x642   : > { %v2978_v22 = vpop.f32.mrf.mxu0 }
 0x643 PF: > { %s17_s24 = sadd.s32 1, %s3311_s24  }
 0x644   : > { %p14_p4 = scmp.ge.s32.totalorder %s17_s24, 4  }
 0x646   :  { %16 = sbr.rel (!%p14_p4) target bundleno = 1 (0x1), region = 125 }

</bundles_post_ra>
